<compile_context>
chip_gen: v7x
topology: tpu7x:2x2x1
jax: 0.10.0
libtpu: 0.0.40
codegen_flags: <defaults>
</compile_context>

<pallas_src>
import functools

import jax
import jax.numpy as jnp
import numpy as np
from jax.experimental import pallas as pl
from jax.experimental.pallas import tpu as pltpu

DIM = 768          # model dim (the module's reshape to (16,16,3) forces dim == 768)
HID = 768          # adapter hidden dim
H = W = 16
CH = 3
KS = 3


# ---------------- fused Pallas kernel ----------------

def _make_kernel(rows_per_chunk: int, n_chunks: int):
    """Kernel over one (tm, DIM) token tile, processed in n_chunks row sub-chunks so the
    activation (VPU/EUP) work of one chunk overlaps the MXU matmuls of the next."""

    def kernel(x_ref, wu_ref, bu_ref, wc_ref, bc_ref, wd_ref, bd_ref, o_ref):
        # Resident operands, loaded once per tile.
        wu = wu_ref[...]     # (DIM, HID) bf16
        wc = wc_ref[...]     # (HID, HID) bf16  (conv folded to dense)
        wd = wd_ref[...]     # (HID, DIM) bf16
        bu = bu_ref[...]     # (1, HID) f32
        bc = bc_ref[...]     # (1, HID) f32
        bd = bd_ref[...]     # (1, DIM) f32

        for c in range(n_chunks):                      # statically unrolled
            r0 = c * rows_per_chunk
            x = x_ref[pl.ds(r0, rows_per_chunk), :].astype(jnp.bfloat16)

            # adapter_up + QuickGELU  (sigmoid(1.702 h) = 0.5*(1 + tanh(0.851 h)))
            h = jnp.dot(x, wu, preferred_element_type=jnp.float32) + bu
            h = h * (0.5 * (1.0 + jnp.tanh(0.851 * h)))

            # 3x3 conv (reshape->NCHW->conv->NHWC->flatten) as a dense 768x768 matmul
            y = jnp.dot(h.astype(jnp.bfloat16), wc,
                        preferred_element_type=jnp.float32) + bc

            # QuickGELU + adapter_down
            g = y * (0.5 * (1.0 + jnp.tanh(0.851 * y)))
            o_ref[pl.ds(r0, rows_per_chunk), :] = (
                jnp.dot(g.astype(jnp.bfloat16), wd,
                        preferred_element_type=jnp.float32) + bd)

    return kernel


# -------- weight preprocessing (once per parameter set, OUTSIDE the per-call path) --------

def _conv_to_dense(w_conv, b_conv):
    """Fold reshape(M,16,16,3) -> NHWC->NCHW -> Conv2d(3,3,k=3,pad=1) -> NCHW->NHWC ->
    reshape(M,768) into `y = h @ cmat + cbias` by pushing the 768 basis vectors through
    the exact same (linear) transform."""
    eye = jnp.eye(DIM, dtype=jnp.float32)                      # 768 basis "tokens"
    img = eye.reshape(DIM, H, W, CH).transpose(0, 3, 1, 2)     # NCHW (matches torch permute)
    y = jax.lax.conv_general_dilated(
        img, w_conv, window_strides=(1, 1), padding="SAME",
        dimension_numbers=("NCHW", "OIHW", "NCHW"))
    cmat = y.transpose(0, 2, 3, 1).reshape(DIM, DIM)           # row k = image of basis vec k
    cbias = jnp.tile(b_conv, H * W)                            # flat index (i*W+j)*3 + co
    return cmat, cbias


def prepare_params(params):
    """One-time preprocessing: conv fold + bf16 MXU-operand casts.  Call once; reuse the
    result for every forward so no conv/transpose/cast XLA ops sit in the call path."""
    cmat, cbias = _conv_to_dense(params["w_conv"].astype(jnp.float32),
                                 params["b_conv"].astype(jnp.float32))
    proc = dict(
        wu=params["w_up"].astype(jnp.bfloat16),                # (DIM, HID)
        wc=cmat.astype(jnp.bfloat16),                          # (HID, HID)
        wd=params["w_down"].astype(jnp.bfloat16),              # (HID, DIM)
        bu=params["b_up"].reshape(1, HID).astype(jnp.float32),
        bc=cbias.reshape(1, HID).astype(jnp.float32),
        bd=params["b_down"].reshape(1, DIM).astype(jnp.float32),
    )
    return {k: jax.block_until_ready(v) for k, v in proc.items()}


# ---------------- wrapper ----------------

def _pick_tile(M: int):
    """Largest sublane-friendly tile (<=1024 rows) that still gives >=2 grid tiles so the
    parallel axis can shard across both TensorCores on v7x; plus an intra-tile chunk count."""
    tm = 8
    if M > 8:
        for t in (1024, 512, 256, 128, 64, 32, 16, 8):
            if 2 * t <= M:
                tm = t
                break
    if tm >= 512:
        n_chunks = 4
    elif tm >= 128:
        n_chunks = 2
    else:
        n_chunks = 1
    return tm, n_chunks


@functools.partial(jax.jit, static_argnames=("tm", "n_chunks"))
def _licm_fused_call(xf, wu, bu, wc, bc, wd, bd, *, tm, n_chunks):
    M, C = xf.shape
    n_tiles = pl.cdiv(M, tm)          # no padding: partial last block is masked by Pallas
    kernel = _make_kernel(tm // n_chunks, n_chunks)
    return pl.pallas_call(
        kernel,
        out_shape=jax.ShapeDtypeStruct((M, C), jnp.float32),
        grid=(n_tiles,),
        in_specs=[
            pl.BlockSpec((tm, C), lambda i: (i, 0)),       # x tile
            pl.BlockSpec((C, HID), lambda i: (0, 0)),      # W_up   (resident)
            pl.BlockSpec((1, HID), lambda i: (0, 0)),      # b_up
            pl.BlockSpec((HID, HID), lambda i: (0, 0)),    # conv-as-matrix (resident)
            pl.BlockSpec((1, HID), lambda i: (0, 0)),      # conv bias
            pl.BlockSpec((HID, C), lambda i: (0, 0)),      # W_down (resident)
            pl.BlockSpec((1, C), lambda i: (0, 0)),        # b_down
        ],
        out_specs=pl.BlockSpec((tm, C), lambda i: (i, 0)),
        compiler_params=pltpu.CompilerParams(
            dimension_semantics=("parallel",),
            vmem_limit_bytes=48 * 1024 * 1024,             # fits v7x's 64 MiB/TC budget
        ),
    )(xf, wu, bu, wc, bc, wd, bd)


def licm_pallas(x, proc):
    """x: (B, N, 768) f32; proc = prepare_params(params)."""
    B, N, C = x.shape
    assert C == DIM, "the module's reshape to (16,16,3) requires dim == 768"
    M = B * N
    tm, n_chunks = _pick_tile(M)
    out = _licm_fused_call(x.reshape(M, C),
                           proc["wu"], proc["bu"], proc["wc"], proc["bc"],
                           proc["wd"], proc["bd"], tm=tm, n_chunks=n_chunks)
    return out.reshape(B, N, C)


# ---------------- pure-JAX reference (for verification) ----------------

def licm_reference(x, p):
    B, N, C = x.shape
    h = x @ p["w_up"] + p["b_up"]
    h = h * jax.nn.sigmoid(1.702 * h)
    img = h.reshape(B * N, H, W, CH).transpose(0, 3, 1, 2)
    y = jax.lax.conv_general_dilated(
        img, p["w_conv"], window_strides=(1, 1), padding="SAME",
        dimension_numbers=("NCHW", "OIHW", "NCHW"))
    y = y + p["b_conv"].reshape(1, CH, 1, 1)
    y = y.transpose(0, 2, 3, 1).reshape(B, N, CH * H * W)
    g = y * jax.nn.sigmoid(1.702 * y)
    return g @ p["w_down"] + p["b_down"]


if __name__ == "__main__":
    key = jax.random.PRNGKey(0)
    ks = jax.random.split(key, 7)
    # Deterministic synthetic params. Linear weights stored as (in, out) so the kernel does
    # x @ W (equivalent to torch's x @ weight.T with weight of shape (out, in)).
    params = dict(
        w_up=jax.random.normal(ks[0], (DIM, HID), jnp.float32) * 0.02,
        b_up=jax.random.normal(ks[1], (HID,), jnp.float32) * 0.02,
        w_conv=jax.random.normal(ks[2], (CH, CH, KS, KS), jnp.float32) * 0.1,  # torch OIHW
        b_conv=jax.random.normal(ks[3], (CH,), jnp.float32) * 0.1,
        w_down=jax.random.normal(ks[4], (HID, DIM), jnp.float32) * 0.02,
        b_down=jax.random.normal(ks[5], (DIM,), jnp.float32) * 0.02,
    )

    proc = prepare_params(params)      # one-time conv fold + bf16 casts (not per-call)

    B, N = 2, 8                        # small shapes; C must be 768 per the module's reshape
    x = jax.random.normal(ks[6], (B, N, DIM), jnp.float32)

    out = jax.block_until_ready(licm_pallas(x, proc))

    ref = licm_reference(x, params)
    # NOTE: three chained bf16 matmuls approximate the f32 PyTorch module; 2e-2 tolerance.
    np.testing.assert_allclose(np.asarray(out), np.asarray(ref), rtol=2e-2, atol=2e-2)

    print("KERNEL_OK")
</pallas_src>

<mosaic_0001>
module attributes {stable_mosaic.version = 11 : i64} {
  func.func @kernel(%arg0: i32, %arg1: memref<8x768xf32, #tpu.memory_space<vmem>>, %arg2: memref<768x768xbf16, #tpu.memory_space<vmem>>, %arg3: memref<1x768xf32, #tpu.memory_space<vmem>>, %arg4: memref<768x768xbf16, #tpu.memory_space<vmem>>, %arg5: memref<1x768xf32, #tpu.memory_space<vmem>>, %arg6: memref<768x768xbf16, #tpu.memory_space<vmem>>, %arg7: memref<1x768xf32, #tpu.memory_space<vmem>>, %arg8: memref<8x768xf32, #tpu.memory_space<vmem>>) attributes {dimension_semantics = [#tpu.dimension_semantics<parallel>], iteration_bounds = array<i64: 2>, scalar_prefetch = 0 : i64, scratch_operands = 0 : i64, tpu.core_type = #tpu.core_type<tc>, window_params = [{transform_indices = @transform_0, window_bounds = array<i64: 8, 768>}, {pipeline_mode = #tpu.pipeline_mode<synchronous>, transform_indices = @transform_1, window_bounds = array<i64: 768, 768>}, {pipeline_mode = #tpu.pipeline_mode<synchronous>, transform_indices = @transform_2, window_bounds = array<i64: 1, 768>}, {pipeline_mode = #tpu.pipeline_mode<synchronous>, transform_indices = @transform_3, window_bounds = array<i64: 768, 768>}, {pipeline_mode = #tpu.pipeline_mode<synchronous>, transform_indices = @transform_4, window_bounds = array<i64: 1, 768>}, {pipeline_mode = #tpu.pipeline_mode<synchronous>, transform_indices = @transform_5, window_bounds = array<i64: 768, 768>}, {pipeline_mode = #tpu.pipeline_mode<synchronous>, transform_indices = @transform_6, window_bounds = array<i64: 1, 768>}, {transform_indices = @transform_7, window_bounds = array<i64: 8, 768>}]} {
    %c0 = arith.constant 0 : index
    %c0_0 = arith.constant 0 : index
    %0 = vector.load %arg2[%c0, %c0_0] : memref<768x768xbf16, #tpu.memory_space<vmem>>, vector<768x768xbf16>
    %c0_1 = arith.constant 0 : index
    %c0_2 = arith.constant 0 : index
    %1 = vector.load %arg4[%c0_1, %c0_2] : memref<768x768xbf16, #tpu.memory_space<vmem>>, vector<768x768xbf16>
    %c0_3 = arith.constant 0 : index
    %c0_4 = arith.constant 0 : index
    %2 = vector.load %arg6[%c0_3, %c0_4] : memref<768x768xbf16, #tpu.memory_space<vmem>>, vector<768x768xbf16>
    %c0_5 = arith.constant 0 : index
    %c0_6 = arith.constant 0 : index
    %3 = vector.load %arg3[%c0_5, %c0_6] : memref<1x768xf32, #tpu.memory_space<vmem>>, vector<1x768xf32>
    %c0_7 = arith.constant 0 : index
    %c0_8 = arith.constant 0 : index
    %4 = vector.load %arg5[%c0_7, %c0_8] : memref<1x768xf32, #tpu.memory_space<vmem>>, vector<1x768xf32>
    %c0_9 = arith.constant 0 : index
    %c0_10 = arith.constant 0 : index
    %5 = vector.load %arg7[%c0_9, %c0_10] : memref<1x768xf32, #tpu.memory_space<vmem>>, vector<1x768xf32>
    %c0_11 = arith.constant 0 : index
    %c0_12 = arith.constant 0 : index
    %6 = vector.load %arg1[%c0_11, %c0_12] : memref<8x768xf32, #tpu.memory_space<vmem>>, vector<8x768xf32>
    %7 = arith.truncf %6 : vector<8x768xf32> to vector<8x768xbf16>
    %cst = arith.constant dense<0.000000e+00> : vector<8x768xf32>
    %8 = tpu.matmul %7, %0, %cst {dimension_numbers = #tpu.dot_dimension_numbers<[1], [0], [0], [1], [0, 0, 1, 1], [], []>} : vector<8x768xbf16>, vector<768x768xbf16>, vector<8x768xf32> -> vector<8x768xf32>
    %9 = vector.broadcast %3 : vector<1x768xf32> to vector<8x768xf32>
    %10 = arith.addf %8, %9 : vector<8x768xf32>
    %cst_13 = arith.constant 8.510000e-01 : f32
    %11 = vector.broadcast %cst_13 : f32 to vector<8x768xf32>
    %12 = arith.mulf %11, %10 : vector<8x768xf32>
    %13 = math.tanh %12 : vector<8x768xf32>
    %cst_14 = arith.constant 1.000000e+00 : f32
    %14 = vector.broadcast %cst_14 : f32 to vector<8x768xf32>
    %15 = arith.addf %14, %13 : vector<8x768xf32>
    %cst_15 = arith.constant 5.000000e-01 : f32
    %16 = vector.broadcast %cst_15 : f32 to vector<8x768xf32>
    %17 = arith.mulf %16, %15 : vector<8x768xf32>
    %18 = arith.mulf %10, %17 : vector<8x768xf32>
    %19 = arith.truncf %18 : vector<8x768xf32> to vector<8x768xbf16>
    %cst_16 = arith.constant dense<0.000000e+00> : vector<8x768xf32>
    %20 = tpu.matmul %19, %1, %cst_16 {dimension_numbers = #tpu.dot_dimension_numbers<[1], [0], [0], [1], [0, 0, 1, 1], [], []>} : vector<8x768xbf16>, vector<768x768xbf16>, vector<8x768xf32> -> vector<8x768xf32>
    %21 = vector.broadcast %4 : vector<1x768xf32> to vector<8x768xf32>
    %22 = arith.addf %20, %21 : vector<8x768xf32>
    %cst_17 = arith.constant 8.510000e-01 : f32
    %23 = vector.broadcast %cst_17 : f32 to vector<8x768xf32>
    %24 = arith.mulf %23, %22 : vector<8x768xf32>
    %25 = math.tanh %24 : vector<8x768xf32>
    %cst_18 = arith.constant 1.000000e+00 : f32
    %26 = vector.broadcast %cst_18 : f32 to vector<8x768xf32>
    %27 = arith.addf %26, %25 : vector<8x768xf32>
    %cst_19 = arith.constant 5.000000e-01 : f32
    %28 = vector.broadcast %cst_19 : f32 to vector<8x768xf32>
    %29 = arith.mulf %28, %27 : vector<8x768xf32>
    %30 = arith.mulf %22, %29 : vector<8x768xf32>
    %31 = arith.truncf %30 : vector<8x768xf32> to vector<8x768xbf16>
    %cst_20 = arith.constant dense<0.000000e+00> : vector<8x768xf32>
    %32 = tpu.matmul %31, %2, %cst_20 {dimension_numbers = #tpu.dot_dimension_numbers<[1], [0], [0], [1], [0, 0, 1, 1], [], []>} : vector<8x768xbf16>, vector<768x768xbf16>, vector<8x768xf32> -> vector<8x768xf32>
    %33 = vector.broadcast %5 : vector<1x768xf32> to vector<8x768xf32>
    %34 = arith.addf %32, %33 : vector<8x768xf32>
    %c0_21 = arith.constant 0 : index
    %c0_22 = arith.constant 0 : index
    %35 = vector.load %arg8[%c0_21, %c0_22] : memref<8x768xf32, #tpu.memory_space<vmem>>, vector<8x768xf32>
    tpu.vector_store %arg8[%c0_21, %c0_22], %34 {strides = array<i32>} : memref<8x768xf32, #tpu.memory_space<vmem>>, vector<8x768xf32>,
    return
  }
  func.func @transform_0(%arg0: i32) -> (i32, i32) {
    %c0_i32 = arith.constant 0 : i32
    %c0_i32_0 = arith.constant 0 : i32
    return %arg0, %c0_i32 : i32, i32
  }
  func.func @transform_1(%arg0: i32) -> (i32, i32) {
    %c0_i32 = arith.constant 0 : i32
    %c0_i32_0 = arith.constant 0 : i32
    %c0_i32_1 = arith.constant 0 : i32
    return %c0_i32, %c0_i32_0 : i32, i32
  }
  func.func @transform_2(%arg0: i32) -> (i32, i32) {
    %c0_i32 = arith.constant 0 : i32
    %c0_i32_0 = arith.constant 0 : i32
    %c0_i32_1 = arith.constant 0 : i32
    return %c0_i32, %c0_i32_0 : i32, i32
  }
  func.func @transform_3(%arg0: i32) -> (i32, i32) {
    %c0_i32 = arith.constant 0 : i32
    %c0_i32_0 = arith.constant 0 : i32
    %c0_i32_1 = arith.constant 0 : i32
    return %c0_i32, %c0_i32_0 : i32, i32
  }
  func.func @transform_4(%arg0: i32) -> (i32, i32) {
    %c0_i32 = arith.constant 0 : i32
    %c0_i32_0 = arith.constant 0 : i32
    %c0_i32_1 = arith.constant 0 : i32
    return %c0_i32, %c0_i32_0 : i32, i32
  }
  func.func @transform_5(%arg0: i32) -> (i32, i32) {
    %c0_i32 = arith.constant 0 : i32
    %c0_i32_0 = arith.constant 0 : i32
    %c0_i32_1 = arith.constant 0 : i32
    return %c0_i32, %c0_i32_0 : i32, i32
  }
  func.func @transform_6(%arg0: i32) -> (i32, i32) {
    %c0_i32 = arith.constant 0 : i32
    %c0_i32_0 = arith.constant 0 : i32
    %c0_i32_1 = arith.constant 0 : i32
    return %c0_i32, %c0_i32_0 : i32, i32
  }
  func.func @transform_7(%arg0: i32) -> (i32, i32) {
    %c0_i32 = arith.constant 0 : i32
    %c0_i32_0 = arith.constant 0 : i32
    return %arg0, %c0_i32 : i32, i32
  }
}

</mosaic_0001>

<bundles_post_ra>
// kernel: _licm_fused_call.1
= control target key start
LH: loop header
LB: loop body
LE: loop exit
PB: predicated region body
PF: predicated region fallthrough
CT: control target
= control target key end

     0   :  { %s10219_s0 = inlined_call_operand.hbm [shape: f32[16,768], index: 0, kind: input, shape index: {}]   ;;  %s10220_s1 = inlined_call_operand.hbm [shape: bf16[768,768], index: 1, kind: input, shape index: {}]   ;;  %s10221_s2 = inlined_call_operand.hbm [shape: f32[1,768], index: 2, kind: input, shape index: {}]   ;;  %s10222_s3 = inlined_call_operand.hbm [shape: bf16[768,768], index: 3, kind: input, shape index: {}]   ;;  %s10223_s4 = inlined_call_operand.hbm [shape: f32[1,768], index: 4, kind: input, shape index: {}]   ;;  %s10224_s5 = inlined_call_operand.hbm [shape: bf16[768,768], index: 5, kind: input, shape index: {}]   ;;  %s10225_s6 = inlined_call_operand.hbm [shape: f32[1,768], index: 6, kind: input, shape index: {}]   ;;  %s10226_s7 = inlined_call_operand.hbm [shape: f32[16,768], index: 7, kind: output, shape index: {}]  }
   0x1   :  { %10230 = sst [smem:[#allocation20_spill]] %s10220_s1 }
   0x2   :  { %12 = vsyncpa [#allocation3], 0 }
   0x3   :  { %14 = vsyncpa [#allocation3 + $0x1], 0 }
   0x4   :  { %15 = vsyncpa [#allocation6], 0 }
   0x5   :  { %16 = vsyncpa [#allocation9], 0 }
   0x6   :  { %17 = vsyncpa [#allocation12], 0 }
   0x7   :  { %18 = vsyncpa [#allocation4], 0 }
   0x8   :  { %20 = vsyncpa [#allocation4 + $0x1], 0  ;;  %s9729_s24 = smov 0   ;;  %s9731_s25 = smov 0  }
   0x9   :  { %s9733_s26 = smov 0   ;;  %s9735_s27 = smov 0  }
   0xa LB: > { %s9679_s28 = smov [#allocation5]   ;;  %s9750_s30 = sadd.s32 4294967295, %s9677_s27   ;;  %s9677_s27 = sphi %s9735_s27, %s10253_s27   ;;  %s9673_s26 = sphi %s9733_s26, %s10252_s26   ;;  %s9669_s25 = sphi %s9731_s25, %s10251_s25   ;;  %s9665_s24 = sphi %s9729_s24, %s10250_s24  }
   0xb   : > { %s221_s29 = sshll.u32 %s9679_s28, 4  ;;  %p6996_p0 = scmp.ge.s32.totalorder %s9677_s27, 1  ;;  %s9755_s29 = int_to_ptr.vmem [resolvable:$true] %s221_s29 }
   0xc   : > { %p10227_p1 = scmp.eq.s32.totalorder %s9750_s30, 0  ;;  %p209_p2 = scmp.lt.s32.totalorder %s9677_s27, 3 }
   0xd   : > { %s9680_s9 = smov [#allocation8]   ;;  %s9681_s12 = smov [#allocation11]  }
   0xe   : > { %p9757_p3 = pnand %p6996_p0, %p209_p2  ;;  %s245_s10 = sshll.u32 %s9680_s9, 4  ;;  %s9770_s10 = int_to_ptr.vmem [resolvable:$true] %s245_s10 }
   0xf   : > { %s269_s13 = sshll.u32 %s9681_s12, 4  ;;  %s10233_s1 = sld [smem:[#allocation20_spill]]  ;;  %s9772_s13 = int_to_ptr.vmem [resolvable:$true] %s269_s13 }
  0x10   : > { %s10231_s8 = scalar_select %p9757_p3, 1, 0 }
  0x11   : > { %p7999_p5 = pneg %p9757_p3 }
  0x13   : > { %p9766_p6 = pnand %p7999_p5, %p10227_p1 }
  0x15   : > { %s9401_s16 = scalar_lea.hbm %s10233_s1, 36864  ;;  %p9782_p8 = pneg %p9766_p6 }
  0x16   : > { %p9402_p7 = scmp.ne.s32.totalorder %s10233_s1, %s9401_s16  ;;  %p9408_p11 = scmp.lt.u32.totalorder %s9401_s16, %s10233_s1 }
  0x18   : > { %p9404_p9 = pnand %p9782_p8, %p9402_p7 }
  0x1a   : > { %p9405_p10 = pneg %p9404_p9 }
  0x1c   : > { %p9410_p12 = pnand %p9408_p11, %p9405_p10 }
  0x1e   : > { %9413 = shalt.err (!%p9410_p12)
}
  0x1f   : > { %s9414_s22 = scalar_lea.vmem %s9755_s29, 36864  ;;  %p9422_p5 = scmp.lt.s32.totalorder %s9755_s29, %s9755_s29 }
  0x20   : > { %p9415_p13 = scmp.ne.s32.totalorder %s9755_s29, %s9414_s22  ;;  %p9423_p4 = scmp.lt.s32.totalorder %s9414_s22, %s9414_s22 }
  0x22   : > { %p9417_p0 = pnand %p9415_p13, %p9782_p8  ;;  %p9424_p7 = por %p9423_p4, %p9422_p5 }
  0x24   : > { %p9418_p2 = pneg %p9417_p0 }
  0x26   : > { %p9425_p9 = pnand %p9424_p7, %p9418_p2 }
  0x28   : > { %9428 = shalt.err (!%p9425_p9)
}
  0x29   : > { %s9682_s23 = smov 384   ;;  %s9683_s28 = smov 24  }
  0x2a   : > { %8002 = dma.hbm_to_vmem [thread:$0]  (!%p9766_p6), %s10233_s1, 36864, %s9755_s29, [#allocation6], %s9682_s23, %s9682_s23, %s9683_s28  }
  0x2b   : > { %s9429_s16 = scalar_lea.hbm %s10222_s3, 36864 }
  0x2c   : > { %p9430_p4 = scmp.ne.s32.totalorder %s10222_s3, %s9429_s16  ;;  %p9436_p12 = scmp.lt.u32.totalorder %s9429_s16, %s10222_s3 }
  0x2e   : > { %p9432_p10 = pnand %p9430_p4, %p9782_p8 }
  0x30   : > { %p9433_p11 = pneg %p9432_p10 }
  0x32   : > { %p9438_p13 = pnand %p9436_p12, %p9433_p11 }
  0x34   : > { %9441 = shalt.err (!%p9438_p13)
}
  0x35   : > { %s9442_s29 = scalar_lea.vmem %s9770_s10, 36864  ;;  %p9450_p7 = scmp.lt.s32.totalorder %s9770_s10, %s9770_s10 }
  0x36   : > { %p9443_p0 = scmp.ne.s32.totalorder %s9770_s10, %s9442_s29  ;;  %p9451_p9 = scmp.lt.s32.totalorder %s9442_s29, %s9442_s29 }
  0x38   : > { %p9445_p2 = pnand %p9443_p0, %p9782_p8  ;;  %p9452_p4 = por %p9451_p9, %p9450_p7 }
  0x3a   : > { %p9446_p5 = pneg %p9445_p2 }
  0x3c   : > { %p9453_p10 = pnand %p9452_p4, %p9446_p5 }
  0x3e   : > { %9456 = shalt.err (!%p9453_p10)
}
  0x3f   : > { %8008 = dma.hbm_to_vmem [thread:$0]  (!%p9766_p6), %s10222_s3, 36864, %s9770_s10, [#allocation9], %s9682_s23, %s9682_s23, %s9683_s28  }
  0x40   : > { %s9457_s15 = scalar_lea.hbm %s10224_s5, 36864 }
  0x41   : > { %p9458_p11 = scmp.ne.s32.totalorder %s10224_s5, %s9457_s15  ;;  %p9464_p0 = scmp.lt.u32.totalorder %s9457_s15, %s10224_s5 }
  0x43   : > { %p9460_p12 = pnand %p9458_p11, %p9782_p8 }
  0x45   : > { %p9461_p13 = pneg %p9460_p12 }
  0x47   : > { %p9466_p2 = pnand %p9464_p0, %p9461_p13 }
  0x49   : > { %9469 = shalt.err (!%p9466_p2)
}
  0x4a   : > { %s9470_s10 = scalar_lea.vmem %s9772_s13, 36864  ;;  %p9478_p4 = scmp.lt.s32.totalorder %s9772_s13, %s9772_s13 }
  0x4b   : > { %p9471_p5 = scmp.ne.s32.totalorder %s9772_s13, %s9470_s10  ;;  %p9479_p10 = scmp.lt.s32.totalorder %s9470_s10, %s9470_s10 }
  0x4d   : > { %p9473_p7 = pnand %p9471_p5, %p9782_p8  ;;  %p9480_p11 = por %p9479_p10, %p9478_p4 }
  0x4f   : > { %p9474_p9 = pneg %p9473_p7 }
  0x51   : > { %p9481_p12 = pnand %p9480_p11, %p9474_p9 }
  0x53   : > { %9484 = shalt.err (!%p9481_p12)
}
  0x54   : > { %8014 = dma.hbm_to_vmem [thread:$0]  (!%p9766_p6), %s10224_s5, 36864, %s9772_s13, [#allocation12], %s9682_s23, %s9682_s23, %s9683_s28  }
  0x55   : > { %s9684_s22 = smov [#allocation7]   ;;  %s9685_s12 = smov [#allocation10]  }
  0x56   : > { %s235_s9 = sshll.u32 %s9684_s22, 4  ;;  %s259_s14 = sshll.u32 %s9685_s12, 4  ;;  %s236_s9 = int_to_ptr.vmem [resolvable:$true] %s235_s9  ;;  %s260_s14 = int_to_ptr.vmem [resolvable:$true] %s259_s14 }
  0x57   : > { %s9485_s17 = scalar_lea.hbm %s10221_s2, 96 }
  0x58   : > { %p9486_p13 = scmp.ne.s32.totalorder %s10221_s2, %s9485_s17  ;;  %p9492_p5 = scmp.lt.u32.totalorder %s9485_s17, %s10221_s2 }
  0x5a   : > { %p9488_p0 = pnand %p9486_p13, %p9782_p8 }
  0x5c   : > { %p9489_p2 = pneg %p9488_p0 }
  0x5e   : > { %p9494_p7 = pnand %p9492_p5, %p9489_p2 }
  0x60   : > { %9497 = shalt.err (!%p9494_p7)
}
  0x61   : > { %s9498_s13 = scalar_lea.vmem %s236_s9, 96  ;;  %p9506_p11 = scmp.lt.s32.totalorder %s236_s9, %s236_s9 }
  0x62   : > { %p9499_p9 = scmp.ne.s32.totalorder %s236_s9, %s9498_s13  ;;  %p9507_p12 = scmp.lt.s32.totalorder %s9498_s13, %s9498_s13 }
  0x64   : > { %p9501_p4 = pnand %p9499_p9, %p9782_p8  ;;  %p9508_p1 = por %p9507_p12, %p9506_p11 }
  0x66   : > { %p9502_p10 = pneg %p9501_p4 }
  0x68   : > { %p9509_p3 = pnand %p9508_p1, %p9502_p10 }
  0x6a   : > { %9512 = shalt.err (!%p9509_p3)
}
  0x6b   : > { %8005 = dma.hbm_to_vmem [thread:$0]  (!%p9766_p6), %s10221_s2, 96, %s236_s9, [#allocation6]  }
  0x6c   : > { %s9513_s12 = scalar_lea.hbm %s10223_s4, 96 }
  0x6d   : > { %p9514_p13 = scmp.ne.s32.totalorder %s10223_s4, %s9513_s12  ;;  %p9520_p3 = scmp.lt.u32.totalorder %s9513_s12, %s10223_s4 }
  0x6f   : > { %p9516_p0 = pnand %p9514_p13, %p9782_p8 }
  0x71   : > { %p9517_p1 = pneg %p9516_p0 }
  0x73   : > { %p9522_p2 = pnand %p9520_p3, %p9517_p1 }
  0x75   : > { %9525 = shalt.err (!%p9522_p2)
}
  0x76   : > { %s9526_s20 = scalar_lea.vmem %s260_s14, 96  ;;  %p9534_p4 = scmp.lt.s32.totalorder %s260_s14, %s260_s14 }
  0x77   : > { %p9527_p5 = scmp.ne.s32.totalorder %s260_s14, %s9526_s20  ;;  %p9535_p10 = scmp.lt.s32.totalorder %s9526_s20, %s9526_s20 }
  0x79   : > { %p9529_p7 = pnand %p9527_p5, %p9782_p8  ;;  %p9536_p11 = por %p9535_p10, %p9534_p4 }
  0x7b   : > { %p9530_p9 = pneg %p9529_p7 }
  0x7d   : > { %p9537_p12 = pnand %p9536_p11, %p9530_p9 }
  0x7f   : > { %9540 = shalt.err (!%p9537_p12)
}
  0x80   : > { %8011 = dma.hbm_to_vmem [thread:$0]  (!%p9766_p6), %s10223_s4, 96, %s260_s14, [#allocation9]  }
  0x81   : > { %s9686_s21 = smov [#allocation13]   ;;  %s9541_s29 = scalar_lea.hbm %s10225_s6, 96 }
  0x82   : > { %s283_s13 = sshll.u32 %s9686_s21, 4  ;;  %p9542_p13 = scmp.ne.s32.totalorder %s10225_s6, %s9541_s29  ;;  %s284_s13 = int_to_ptr.vmem [resolvable:$true] %s283_s13 }
  0x83   : > { %p9548_p3 = scmp.lt.u32.totalorder %s9541_s29, %s10225_s6 }
  0x84   : > { %p9544_p0 = pnand %p9542_p13, %p9782_p8 }
  0x86   : > { %p9545_p1 = pneg %p9544_p0 }
  0x88   : > { %p9550_p2 = pnand %p9548_p3, %p9545_p1 }
  0x8a   : > { %9553 = shalt.err (!%p9550_p2)
}
  0x8b   : > { %s9554_s14 = scalar_lea.vmem %s284_s13, 96  ;;  %p9562_p4 = scmp.lt.s32.totalorder %s284_s13, %s284_s13 }
  0x8c   : > { %p9555_p5 = scmp.ne.s32.totalorder %s284_s13, %s9554_s14  ;;  %p9563_p10 = scmp.lt.s32.totalorder %s9554_s14, %s9554_s14 }
  0x8e   : > { %p9557_p7 = pnand %p9555_p5, %p9782_p8  ;;  %p9564_p11 = por %p9563_p10, %p9562_p4 }
  0x90   : > { %p9558_p9 = pneg %p9557_p7 }
  0x92   : > { %p9565_p12 = pnand %p9564_p11, %p9558_p9 }
  0x94   : > { %9568 = shalt.err (!%p9565_p12)
}
  0x95   : > { %8017 = dma.hbm_to_vmem [thread:$0]  (!%p9766_p6), %s10225_s6, 96, %s284_s13, [#allocation12]  }
  0x96   : > { %s6995_s19 = sadd.s32 4294967294, %s9677_s27   ;;  %s9914_s11 = sadd.s32 1, %s9677_s27  }
  0x97   : > { %s30_s20 = ssub.s32 %s9677_s27, %s9914_s11  ;;  %s33_s9 = sadd.s32 1, %s9673_s26 }
  0x98   : > { %p31_p8 = scmp.eq.s32.totalorder %s30_s20, 0  ;;  %p40_p13 = scmp.ne.s32.totalorder %s9673_s26, %s9669_s25 }
  0x99   : > { %p41_p0 = scmp.eq.s32.totalorder %s9677_s27, 0  ;;  %p46_p1 = scmp.ne.s32.totalorder %s9669_s25, %s9665_s24 }
  0x9a   : > { %s9925_s10 = scalar_select %p31_p8, %s9673_s26, %s33_s9  }
  0x9b   : > { %p42_p3 = por %p41_p0, %p40_p13  ;;  %p10235_p2 = scmp.eq.s32.totalorder %s9750_s30, 0 }
  0x9c   : > { %p196_p6 = scmp.eq.s32.totalorder %s9750_s30, 1  ;;  %p202_p7 = scmp.eq.s32.totalorder %s6995_s19, 1 }
  0x9d   : > { %p9929_p5 = por %p10235_p2, %p46_p1  ;;  %p8032_p9 = scmp.lt.s32.totalorder %s9677_s27, 2 }
  0x9e   : > { %s294_s13 = sand.u32 1, %s9673_s26   ;;  %p9936_p4 = por %p196_p6, %p40_p13 }
  0x9f   : > { %p9940_p10 = por %p202_p7, %p46_p1  ;;  %s7967_s29 = smul.u32 48, %s294_s13 }
  0xa0   : > { %s10237_s23 = scalar_select %p9936_p4, 1, 0 }
  0xa1   : > { %s10238_s28 = scalar_select %p9940_p10, 1, 0 }
  0xa2   : > { %s7968_s22 = smul.u32 768, %s9677_s27  ;;  %p9945_p11 = pnand %p8032_p9, %p42_p3 }
  0xa3   : > { %s298_s17 = scalar_lea.vmem [#allocation2], %s7967_s29  ;;  %s295_s19 = scalar_lea.sflag [#allocation3], %s294_s13 }
  0xa4   : > { %s9952_s14 = scalar_lea.hbm %s10219_s0, %s7968_s22  ;;  %s306_s18 = sshll.u32 %s298_s17, 4  ;;  %s9954_s18 = int_to_ptr.vmem [resolvable:$true] %s306_s18 }
  0xa5   : > { %s9569_s20 = scalar_lea.hbm %s9952_s14, 768  ;;  %p9571_p8 = pneg %p9945_p11 }
  0xa6   : > { %p9570_p12 = scmp.ne.s32.totalorder %s9952_s14, %s9569_s20  ;;  %s9574_s15 = scalar_lea.hbm %s10219_s0, 1536 }
  0xa7   : > { %p9575_p1 = scmp.lt.u32.totalorder %s9952_s14, %s10219_s0  ;;  %p9576_p3 = scmp.lt.u32.totalorder %s9574_s15, %s9569_s20 }
  0xa8   : > { %p9572_p13 = pnand %p9571_p8, %p9570_p12  ;;  %p9578_p6 = scmp.lt.u32.totalorder %s9569_s20, %s9952_s14 }
  0xa9   : > { %p9577_p2 = por %p9576_p3, %p9575_p1 }
  0xaa   : > { %p9573_p0 = pneg %p9572_p13 }
  0xab   : > { %p9579_p7 = por %p9578_p6, %p9577_p2 }
  0xad   : > { %p9580_p9 = pnand %p9579_p7, %p9573_p0 }
  0xaf   : > { %9583 = shalt.err (!%p9580_p9)
}
  0xb0   : > { %s9584_s13 = scalar_lea.vmem %s9954_s18, 768  ;;  %s9687_s29 = smov [#allocation2]  }
  0xb1   : > { %p9585_p12 = scmp.ne.s32.totalorder %s9954_s18, %s9584_s13  ;;  %s9589_s17 = sshll.u32 %s9687_s29, 4  ;;  %s9590_s17 = int_to_ptr.vmem [resolvable:$false] %s9589_s17 }
  0xb2   : > { %s9591_s1 = scalar_lea.vmem %s9590_s17, 1536  ;;  %p9592_p4 = scmp.lt.s32.totalorder %s9954_s18, %s9590_s17 }
  0xb3   : > { %p9587_p13 = pnand %p9585_p12, %p9571_p8  ;;  %p9593_p1 = scmp.lt.s32.totalorder %s9591_s1, %s9584_s13 }
  0xb5   : > { %p9588_p10 = pneg %p9587_p13  ;;  %p9594_p3 = por %p9593_p1, %p9592_p4 }
  0xb7   : > { %p9595_p2 = pnand %p9594_p3, %p9588_p10 }
  0xb9   : > { %9598 = shalt.err (!%p9595_p2)
}
  0xba   : > { %8021 = dma.hbm_to_vmem [thread:$0]  (!%p9945_p11), %s9952_s14, 768, %s9954_s18, %s295_s19  }
  0xbb   : > { %p10240_p0 = scmp.ne.s32.totalorder %s10231_s8, 0 }
  0xbc   : > { %s9984_s20 = sand.u32 (!%p10240_p0), 1, %s9669_s25  }
  0xbd   : > { %315 = sbr.rel (%p10240_p0) target bundleno = 1615 (0x64f), region = 48  ;;  %s318_s22 = scalar_lea.sflag (!%p10240_p0), [#allocation3], %s9984_s20 }
  0xbe   : > { %s7969_s9 = smul.u32 (!%p10240_p0), 48, %s9984_s20 }
  0xc0   : > { %s9990_s15 = scalar_lea.vmem (!%p10240_p0), [#allocation2], %s7969_s9 }
  0xc4   : > { %9644 = dma.done.wait (%p9929_p5), %s318_s22, 768  }
  0xc5   : > { %9646 = vsyncadd (%p9929_p5), %s318_s22, 4294966528  ;;  %p10241_p4 = scmp.eq.s32.totalorder %s9750_s30, 0 }
  0xc7   : > { %9648 = dma.done.wait (%p10241_p4), [#allocation6], 36960   ;;  %p10242_p10 = pmov %p10241_p4 }
  0xc8   : > { %p10243_p11 = pmov %p10241_p4 }
  0xc9   : > { %9650 = vsyncadd (%p10242_p10), [#allocation6], 4294930336 }
  0xca   : > { %9652 = dma.done.wait (%p10243_p11), [#allocation9], 36960   ;;  %p10244_p8 = pmov %p10241_p4 }
  0xcb   : > { %p10245_p6 = pmov %p10241_p4 }
  0xcc   : > { %9654 = vsyncadd (%p10244_p8), [#allocation9], 4294930336 }
  0xcd   : > { %9656 = dma.done.wait (%p10245_p6), [#allocation12], 36960   ;;  %p10246_p7 = pmov %p10241_p4 }
  0xce   : > { %v8080_v0 = vld [vmem:[#allocation5 + $0x4] ss:$24 sps:$4 sm:$0xff]   ;;  %v8084_v2 = vld [vmem:[#allocation5] ss:$24 sps:$4 sm:$0xff]   ;;  %v8086_v4 = vld [vmem:[#allocation5 + $0x34] ss:$24 sps:$4 sm:$0xff]  }
  0xcf   : > { %9658 = vsyncadd (%p10246_p7), [#allocation12], 4294930336  ;;  %v8082_v1 = vld [vmem:[#allocation5 + $0x304] ss:$24 sps:$4 sm:$0xff]   ;;  %2726 = vmatprep.subr.bf16.mxu1 %v8080_v0  ;;  %v8085_v3 = vld [vmem:[#allocation5 + $0x300] ss:$24 sps:$4 sm:$0xff]  }
  0xd0   : > { %2767 = vmatprep.subr.bf16.mxu0 %v8082_v1  ;;  %2727 = vmatpush1.bf16.msra.mxu1 %v8084_v2  ;;  %v8088_v5 = vld [vmem:[#allocation5 + $0x334] ss:$24 sps:$4 sm:$0xff]   ;;  %v8090_v6 = vld [vmem:[#allocation5 + $0x30] ss:$24 sps:$4 sm:$0xff]   ;;  %v8092_v8 = vld [vmem:[#allocation5 + $0x64] ss:$24 sps:$4 sm:$0xff]  }
  0xd1   : > { %2768 = vmatpush1.bf16.msra.mxu0 %v8085_v3  ;;  %2728 = vmatprep.subr.bf16.mxu1 %v8086_v4  ;;  %v8091_v7 = vld [vmem:[#allocation5 + $0x330] ss:$24 sps:$4 sm:$0xff]   ;;  %v8094_v9 = vld [vmem:[#allocation5 + $0x364] ss:$24 sps:$4 sm:$0xff]   ;;  %v8096_v10 = vld [vmem:[#allocation5 + $0x60] ss:$24 sps:$4 sm:$0xff]  }
  0xd2   : > { %2769 = vmatprep.subr.bf16.mxu0 %v8088_v5  ;;  %v8097_v11 = vld [vmem:[#allocation5 + $0x360] ss:$24 sps:$4 sm:$0xff]   ;;  %v8098_v12 = vld [vmem:[#allocation5 + $0x94] ss:$24 sps:$4 sm:$0xff]   ;;  %v8102_v14 = vld [vmem:[#allocation5 + $0x90] ss:$24 sps:$4 sm:$0xff]  }
  0xd3   : > { %v8100_v13 = vld [vmem:[#allocation5 + $0x394] ss:$24 sps:$4 sm:$0xff]   ;;  %v8103_v15 = vld [vmem:[#allocation5 + $0x390] ss:$24 sps:$4 sm:$0xff]   ;;  %v8104_v16 = vld [vmem:[#allocation5 + $0xc4] ss:$24 sps:$4 sm:$0xff]  }
  0xd4   : > { %2729 = vmatpush1.bf16.msra.mxu1 %v8090_v6  ;;  %v8106_v17 = vld [vmem:[#allocation5 + $0x3c4] ss:$24 sps:$4 sm:$0xff]   ;;  %v8108_v18 = vld [vmem:[#allocation5 + $0xc0] ss:$24 sps:$4 sm:$0xff]   ;;  %v8110_v20 = vld [vmem:[#allocation5 + $0xf4] ss:$24 sps:$4 sm:$0xff]  }
  0xd5   : > { %2770 = vmatpush1.bf16.msra.mxu0 %v8091_v7  ;;  %2730 = vmatprep.subr.bf16.mxu1 %v8092_v8  ;;  %v8109_v19 = vld [vmem:[#allocation5 + $0x3c0] ss:$24 sps:$4 sm:$0xff]   ;;  %v8112_v21 = vld [vmem:[#allocation5 + $0x3f4] ss:$24 sps:$4 sm:$0xff]   ;;  %v8114_v22 = vld [vmem:[#allocation5 + $0xf0] ss:$24 sps:$4 sm:$0xff]  }
  0xd6   : > { %2771 = vmatprep.subr.bf16.mxu0 %v8094_v9  ;;  %v8115_v23 = vld [vmem:[#allocation5 + $0x3f0] ss:$24 sps:$4 sm:$0xff]   ;;  %v8116_v24 = vld [vmem:[#allocation5 + $0x124] ss:$24 sps:$4 sm:$0xff]   ;;  %v8120_v26 = vld [vmem:[#allocation5 + $0x120] ss:$24 sps:$4 sm:$0xff]  }
  0xd7   : > { %v8118_v25 = vld [vmem:[#allocation5 + $0x424] ss:$24 sps:$4 sm:$0xff]   ;;  %v8121_v27 = vld [vmem:[#allocation5 + $0x420] ss:$24 sps:$4 sm:$0xff]   ;;  %v8122_v28 = vld [vmem:[#allocation5 + $0x154] ss:$24 sps:$4 sm:$0xff]  }
  0xd8   : > { %2731 = vmatpush1.bf16.msra.mxu1 %v8096_v10  ;;  %v8124_v29 = vld [vmem:[#allocation5 + $0x454] ss:$24 sps:$4 sm:$0xff]   ;;  %v8126_v30 = vld [vmem:[#allocation5 + $0x150] ss:$24 sps:$4 sm:$0xff]   ;;  %v8128_v32 = vld [vmem:[#allocation5 + $0x184] ss:$24 sps:$4 sm:$0xff]  }
  0xd9   : > { %2772 = vmatpush1.bf16.msra.mxu0 %v8097_v11  ;;  %2732 = vmatprep.subr.bf16.mxu1 %v8098_v12  ;;  %v8127_v31 = vld [vmem:[#allocation5 + $0x450] ss:$24 sps:$4 sm:$0xff]   ;;  %v8130_v33 = vld [vmem:[#allocation5 + $0x484] ss:$24 sps:$4 sm:$0xff]   ;;  %v8132_v34 = vld [vmem:[#allocation5 + $0x180] ss:$24 sps:$4 sm:$0xff]  }
  0xda   : > { %2773 = vmatprep.subr.bf16.mxu0 %v8100_v13  ;;  %v8133_v35 = vld [vmem:[#allocation5 + $0x480] ss:$24 sps:$4 sm:$0xff]   ;;  %v8134_v36 = vld [vmem:[#allocation5 + $0x1b4] ss:$24 sps:$4 sm:$0xff]   ;;  %v8138_v38 = vld [vmem:[#allocation5 + $0x1b0] ss:$24 sps:$4 sm:$0xff]  }
  0xdb   : > { %v8136_v37 = vld [vmem:[#allocation5 + $0x4b4] ss:$24 sps:$4 sm:$0xff]   ;;  %v8139_v39 = vld [vmem:[#allocation5 + $0x4b0] ss:$24 sps:$4 sm:$0xff]   ;;  %v8140_v40 = vld [vmem:[#allocation5 + $0x1e4] ss:$24 sps:$4 sm:$0xff]  }
  0xdc   : > { %2733 = vmatpush1.bf16.msra.mxu1 %v8102_v14  ;;  %v8142_v41 = vld [vmem:[#allocation5 + $0x4e4] ss:$24 sps:$4 sm:$0xff]   ;;  %v8144_v42 = vld [vmem:[#allocation5 + $0x1e0] ss:$24 sps:$4 sm:$0xff]   ;;  %v8146_v44 = vld [vmem:[#allocation5 + $0x214] ss:$24 sps:$4 sm:$0xff]  }
  0xdd   : > { %2774 = vmatpush1.bf16.msra.mxu0 %v8103_v15  ;;  %2734 = vmatprep.subr.bf16.mxu1 %v8104_v16  ;;  %v8145_v43 = vld [vmem:[#allocation5 + $0x4e0] ss:$24 sps:$4 sm:$0xff]   ;;  %v8148_v45 = vld [vmem:[#allocation5 + $0x514] ss:$24 sps:$4 sm:$0xff]   ;;  %v8150_v47 = vld [vmem:[#allocation5 + $0x210] ss:$24 sps:$4 sm:$0xff]  }
  0xde   : > { %2775 = vmatprep.subr.bf16.mxu0 %v8106_v17  ;;  %v1244_v46 = vld [vmem:[%s9990_s15 + $0x8] sm:$0xff]  ;;  %v1246_v49 = vld [vmem:[%s9990_s15 + $0x18] sm:$0xff]  ;;  %v1243_v4 = vld [vmem:[%s9990_s15] sm:$0xff]  ;;  %s375_s8 = scalar_lea.vmem [#allocation14], %s7969_s9  ;;  %s7970_s21 = smul.u32 768, %s9750_s30 }
  0xdf   : > { %v10009_v48 = vpack.c.bf16 %v1244_v46, %v1244_v46  ;;  %v8151_v50 = vld [vmem:[#allocation5 + $0x510] ss:$24 sps:$4 sm:$0xff]   ;;  %v8152_v51 = vld [vmem:[#allocation5 + $0x244] ss:$24 sps:$4 sm:$0xff]   ;;  %v10012_v52 = vpack.c.bf16 %v1246_v49, %v1246_v49  ;;  %v8156_v54 = vld [vmem:[#allocation5 + $0x240] ss:$24 sps:$4 sm:$0xff]   ;;  %v10018_v8 = vpack.c.bf16 %v1243_v4, %v1243_v4 }
  0xe0   : > { %2735 = vmatpush1.bf16.msra.mxu1 %v8108_v18  ;;  %v8154_v53 = vld [vmem:[#allocation5 + $0x544] ss:$24 sps:$4 sm:$0xff]   ;;  %v8157_v55 = vld [vmem:[#allocation5 + $0x540] ss:$24 sps:$4 sm:$0xff]   ;;  %v8158_v56 = vld [vmem:[#allocation5 + $0x274] ss:$24 sps:$4 sm:$0xff]   ;;  %s10175_s19 = scalar_lea.hbm %s10226_s7, %s7970_s21 }
  0xe1   : > { %2776 = vmatpush1.bf16.msra.mxu0 %v8109_v19  ;;  %2736 = vmatprep.subr.bf16.mxu1 %v8110_v20  ;;  %v8160_v57 = vld [vmem:[#allocation5 + $0x574] ss:$24 sps:$4 sm:$0xff]   ;;  %v8162_v58 = vld [vmem:[#allocation5 + $0x270] ss:$24 sps:$4 sm:$0xff]   ;;  %v8164_v60 = vld [vmem:[#allocation5 + $0x2a4] ss:$24 sps:$4 sm:$0xff]  }
  0xe2   : > { %2777 = vmatprep.subr.bf16.mxu0 %v8112_v21  ;;  %2758 = vmatprep.mubr.bf16.mxu1 %v10009_v48  ;;  %v8163_v59 = vld [vmem:[#allocation5 + $0x570] ss:$24 sps:$4 sm:$0xff]   ;;  %v8166_v61 = vld [vmem:[#allocation5 + $0x5a4] ss:$24 sps:$4 sm:$0xff]   ;;  %v8168_v62 = vld [vmem:[#allocation5 + $0x2a0] ss:$24 sps:$4 sm:$0xff]  }
  0xe3   : > { %2799 = vmatprep.mubr.bf16.mxu0 %v10012_v52  ;;  %v8169_v63 = vld [vmem:[#allocation5 + $0x5a0] ss:$24 sps:$4 sm:$0xff]   ;;  %v8170_v0 = vld [vmem:[#allocation5 + $0x2d4] ss:$24 sps:$4 sm:$0xff]   ;;  %v8174_v2 = vld [vmem:[#allocation5 + $0x2d0] ss:$24 sps:$4 sm:$0xff]  }
  0xe4   : > { %2737 = vmatpush1.bf16.msra.mxu1 %v8114_v22  ;;  %v8172_v1 = vld [vmem:[#allocation5 + $0x5d4] ss:$24 sps:$4 sm:$0xff]   ;;  %v8175_v3 = vld [vmem:[#allocation5 + $0x5d0] ss:$24 sps:$4 sm:$0xff]   ;;  %v8178_v5 = vld [vmem:[#allocation5 + $0x604] ss:$24 sps:$4 sm:$0xff]  }
  0xe5   : > { %2778 = vmatpush1.bf16.msra.mxu0 %v8115_v23  ;;  %2738 = vmatprep.subr.bf16.mxu1 %v8116_v24  ;;  %v1245_v6 = vld [vmem:[%s9990_s15 + $0x10] sm:$0xff]  ;;  %s6868_s12 = sshll.u32 %s375_s8, 4  ;;  %s6854_s30 = scalar_lea.sflag [#allocation4], %s9984_s20  ;;  %s10177_s12 = int_to_ptr.vmem [resolvable:$true] %s6868_s12 }
  0xe6   : > { %2779 = vmatprep.subr.bf16.mxu0 %v8118_v25  ;;  %v8181_v7 = vld [vmem:[#allocation5 + $0xc] ss:$24 sps:$4 sm:$0xff]   ;;  %v8176_v9 = vld [vmem:[#allocation5 + $0x600] ss:$24 sps:$4 sm:$0xff]   ;;  %v10020_v11 = vpack.c.bf16 %v1245_v6, %v1245_v6  ;;  %v8187_v13 = vld [vmem:[#allocation5 + $0x3c] ss:$24 sps:$4 sm:$0xff]  }
  0xe7   : > { %v8179_v10 = vld [vmem:[#allocation5 + $0x8] ss:$24 sps:$4 sm:$0xff]   ;;  %v8184_v12 = vld [vmem:[#allocation5 + $0x634] ss:$24 sps:$4 sm:$0xff]   ;;  %v8185_v15 = vld [vmem:[#allocation5 + $0x38] ss:$24 sps:$4 sm:$0xff]  }
  0xe8   : > { %2739 = vmatpush1.bf16.msra.mxu1 %v8120_v26  ;;  %v8182_v14 = vld [vmem:[#allocation5 + $0x630] ss:$24 sps:$4 sm:$0xff]   ;;  %v8190_v16 = vld [vmem:[#allocation5 + $0x664] ss:$24 sps:$4 sm:$0xff]   ;;  %v8188_v18 = vld [vmem:[#allocation5 + $0x660] ss:$24 sps:$4 sm:$0xff]  }
  0xe9   : > { %2780 = vmatpush1.bf16.msra.mxu0 %v8121_v27  ;;  %2740 = vmatprep.subr.bf16.mxu1 %v8122_v28  ;;  %v8193_v17 = vld [vmem:[#allocation5 + $0x6c] ss:$24 sps:$4 sm:$0xff]   ;;  %v8191_v19 = vld [vmem:[#allocation5 + $0x68] ss:$24 sps:$4 sm:$0xff]   ;;  %v8199_v21 = vld [vmem:[#allocation5 + $0x9c] ss:$24 sps:$4 sm:$0xff]  }
  0xea   : > { %2781 = vmatprep.subr.bf16.mxu0 %v8124_v29  ;;  %v8196_v20 = vld [vmem:[#allocation5 + $0x694] ss:$24 sps:$4 sm:$0xff]   ;;  %v8194_v22 = vld [vmem:[#allocation5 + $0x690] ss:$24 sps:$4 sm:$0xff]   ;;  %v8202_v24 = vld [vmem:[#allocation5 + $0x6c4] ss:$24 sps:$4 sm:$0xff]  }
  0xeb   : > { %v8197_v23 = vld [vmem:[#allocation5 + $0x98] ss:$24 sps:$4 sm:$0xff]   ;;  %v8205_v25 = vld [vmem:[#allocation5 + $0xcc] ss:$24 sps:$4 sm:$0xff]   ;;  %v8203_v27 = vld [vmem:[#allocation5 + $0xc8] ss:$24 sps:$4 sm:$0xff]  }
  0xec   : > { %2741 = vmatpush1.bf16.msra.mxu1 %v8126_v30  ;;  %v8200_v26 = vld [vmem:[#allocation5 + $0x6c0] ss:$24 sps:$4 sm:$0xff]   ;;  %v8208_v28 = vld [vmem:[#allocation5 + $0x6f4] ss:$24 sps:$4 sm:$0xff]   ;;  %v8206_v30 = vld [vmem:[#allocation5 + $0x6f0] ss:$24 sps:$4 sm:$0xff]  }
  0xed   : > { %2782 = vmatpush1.bf16.msra.mxu0 %v8127_v31  ;;  %2742 = vmatprep.subr.bf16.mxu1 %v8128_v32  ;;  %v8211_v29 = vld [vmem:[#allocation5 + $0xfc] ss:$24 sps:$4 sm:$0xff]   ;;  %v8209_v31 = vld [vmem:[#allocation5 + $0xf8] ss:$24 sps:$4 sm:$0xff]   ;;  %s9599_s16 = scalar_lea.vmem %s10177_s12, 768  ;;  %p10247_p9 = scmp.ne.s32.totalorder %s10237_s23, 0 }
  0xee   : > { %2783 = vmatprep.subr.bf16.mxu0 %v8130_v33  ;;  %v8214_v32 = vld [vmem:[#allocation5 + $0x724] ss:$24 sps:$4 sm:$0xff]   ;;  %v8232_v46 = vld [vmem:[#allocation5 + $0x7b4] ss:$24 sps:$4 sm:$0xff]   ;;  %v8230_v49 = vld [vmem:[#allocation5 + $0x7b0] ss:$24 sps:$4 sm:$0xff]   ;;  %p9600_p5 = scmp.ne.s32.totalorder %s10177_s12, %s9599_s16 }
  0xef   : > { %v8217_v33 = vld [vmem:[#allocation5 + $0x12c] ss:$24 sps:$4 sm:$0xff]   ;;  %v8260_v6 = vld [vmem:[#allocation5 + $0x8a0] ss:$24 sps:$4 sm:$0xff]   ;;  %s9688_s13 = smov [#allocation14]  }
  0xf0   : > { %2743 = vmatpush1.bf16.msra.mxu1 %v8132_v34  ;;  %v1248_v34 = vld [vmem:[%s9990_s15 + $0x28] sm:$0xff]  ;;  %p9601_p12 = pnand %p9600_p5, %p10247_p9  ;;  %s9603_s29 = sshll.u32 %s9688_s13, 4  ;;  %s9604_s29 = int_to_ptr.vmem [resolvable:$false] %s9603_s29 }
  0xf1   : > { %2784 = vmatpush1.bf16.msra.mxu0 %v8133_v35  ;;  %2744 = vmatprep.subr.bf16.mxu1 %v8134_v36  ;;  %v10026_v35 = vpack.c.bf16 %v1248_v34, %v1248_v34  ;;  %v8212_v36 = vld [vmem:[#allocation5 + $0x720] ss:$24 sps:$4 sm:$0xff]   ;;  %v8262_v4 = vld [vmem:[#allocation5 + $0x8a4] ss:$24 sps:$4 sm:$0xff]   ;;  %s9605_s17 = scalar_lea.vmem %s9604_s29, 1536  ;;  %p9606_p1 = scmp.lt.s32.totalorder %s10177_s12, %s9604_s29 }
  0xf2   : > { %2785 = vmatprep.subr.bf16.mxu0 %v8136_v37  ;;  %v8215_v37 = vld [vmem:[#allocation5 + $0x128] ss:$24 sps:$4 sm:$0xff]   ;;  %p9602_p13 = pneg %p9601_p12  ;;  %p9607_p3 = scmp.lt.s32.totalorder %s9605_s17, %s9599_s16 }
  0xf3   : > { %v8296_v34 = vld [vmem:[#allocation5 + $0x3c8] ss:$24 sps:$4 sm:$0xff]  }
  0xf4   : > { %2745 = vmatpush1.bf16.msra.mxu1 %v8138_v38  ;;  %v8220_v38 = vld [vmem:[#allocation5 + $0x754] ss:$24 sps:$4 sm:$0xff]   ;;  %p9608_p2 = por %p9607_p3, %p9606_p1 }
  0xf5   : > { %2786 = vmatpush1.bf16.msra.mxu0 %v8139_v39  ;;  %2746 = vmatprep.subr.bf16.mxu1 %v8140_v40  ;;  %v8223_v39 = vld [vmem:[#allocation5 + $0x15c] ss:$24 sps:$4 sm:$0xff]   ;;  %v8218_v40 = vld [vmem:[#allocation5 + $0x750] ss:$24 sps:$4 sm:$0xff]  }
  0xf6   : > { %2787 = vmatprep.subr.bf16.mxu0 %v8142_v41  ;;  %v8221_v41 = vld [vmem:[#allocation5 + $0x158] ss:$24 sps:$4 sm:$0xff]   ;;  %p9609_p0 = pnand %p9608_p2, %p9602_p13 }
  0xf8   : > { %2747 = vmatpush1.bf16.msra.mxu1 %v8144_v42  ;;  %v8226_v42 = vld [vmem:[#allocation5 + $0x784] ss:$24 sps:$4 sm:$0xff]  }
  0xf9   : > { %2788 = vmatpush1.bf16.msra.mxu0 %v8145_v43  ;;  %2748 = vmatprep.subr.bf16.mxu1 %v8146_v44  ;;  %v8229_v43 = vld [vmem:[#allocation5 + $0x18c] ss:$24 sps:$4 sm:$0xff]   ;;  %v8224_v44 = vld [vmem:[#allocation5 + $0x780] ss:$24 sps:$4 sm:$0xff]  }
  0xfa   : > { %2789 = vmatprep.subr.bf16.mxu0 %v8148_v45  ;;  %v8227_v45 = vld [vmem:[#allocation5 + $0x188] ss:$24 sps:$4 sm:$0xff]  }
  0xfc   : > { %2749 = vmatpush1.bf16.msra.mxu1 %v8150_v47  ;;  %v8235_v47 = vld [vmem:[#allocation5 + $0x1bc] ss:$24 sps:$4 sm:$0xff]  }
  0xfd   : > { %2790 = vmatpush1.bf16.msra.mxu0 %v8151_v50  ;;  %2750 = vmatprep.subr.bf16.mxu1 %v8152_v51  ;;  %v8233_v50 = vld [vmem:[#allocation5 + $0x1b8] ss:$24 sps:$4 sm:$0xff]   ;;  %v8238_v51 = vld [vmem:[#allocation5 + $0x7e4] ss:$24 sps:$4 sm:$0xff]  }
  0xfe   : > { %2791 = vmatprep.subr.bf16.mxu0 %v8154_v53  ;;  %v8241_v53 = vld [vmem:[#allocation5 + $0x1ec] ss:$24 sps:$4 sm:$0xff]  }
 0x100   : > { %2751 = vmatpush1.bf16.msra.mxu1 %v8156_v54  ;;  %v8236_v54 = vld [vmem:[#allocation5 + $0x7e0] ss:$24 sps:$4 sm:$0xff]  }
 0x101   : > { %2792 = vmatpush1.bf16.msra.mxu0 %v8157_v55  ;;  %2752 = vmatprep.subr.bf16.mxu1 %v8158_v56  ;;  %v8239_v55 = vld [vmem:[#allocation5 + $0x1e8] ss:$24 sps:$4 sm:$0xff]   ;;  %v8244_v56 = vld [vmem:[#allocation5 + $0x814] ss:$24 sps:$4 sm:$0xff]  }
 0x102   : > { %2793 = vmatprep.subr.bf16.mxu0 %v8160_v57  ;;  %v8247_v57 = vld [vmem:[#allocation5 + $0x21c] ss:$24 sps:$4 sm:$0xff]  }
 0x104   : > { %2753 = vmatpush1.bf16.msra.mxu1 %v8162_v58  ;;  %v8242_v58 = vld [vmem:[#allocation5 + $0x810] ss:$24 sps:$4 sm:$0xff]  }
 0x105   : > { %2794 = vmatpush1.bf16.msra.mxu0 %v8163_v59  ;;  %2754 = vmatprep.subr.bf16.mxu1 %v8164_v60  ;;  %v8245_v59 = vld [vmem:[#allocation5 + $0x218] ss:$24 sps:$4 sm:$0xff]   ;;  %v8250_v60 = vld [vmem:[#allocation5 + $0x844] ss:$24 sps:$4 sm:$0xff]  }
 0x106   : > { %2795 = vmatprep.subr.bf16.mxu0 %v8166_v61  ;;  %v8253_v61 = vld [vmem:[#allocation5 + $0x24c] ss:$24 sps:$4 sm:$0xff]  }
 0x108   : > { %2755 = vmatpush1.bf16.msra.mxu1 %v8168_v62  ;;  %v8248_v62 = vld [vmem:[#allocation5 + $0x840] ss:$24 sps:$4 sm:$0xff]  }
 0x109   : > { %2796 = vmatpush1.bf16.msra.mxu0 %v8169_v63  ;;  %2756 = vmatprep.subr.bf16.mxu1 %v8170_v0  ;;  %v8251_v63 = vld [vmem:[#allocation5 + $0x248] ss:$24 sps:$4 sm:$0xff]   ;;  %v8256_v0 = vld [vmem:[#allocation5 + $0x874] ss:$24 sps:$4 sm:$0xff]  }
 0x10a   : > { %2797 = vmatprep.subr.bf16.mxu0 %v8172_v1  ;;  %v8259_v1 = vld [vmem:[#allocation5 + $0x27c] ss:$24 sps:$4 sm:$0xff]  }
 0x10c   : > { %2757 = vmatpush1.bf16.msra.mxu1 %v8174_v2  ;;  %v8254_v2 = vld [vmem:[#allocation5 + $0x870] ss:$24 sps:$4 sm:$0xff]  }
 0x10d   : > { %2798 = vmatpush1.bf16.msra.mxu0 %v8175_v3  ;;  %2849 = vmatprep.subr.bf16.mxu1 %v8181_v7  ;;  %v8257_v3 = vld [vmem:[#allocation5 + $0x278] ss:$24 sps:$4 sm:$0xff]   ;;  %v8263_v7 = vld [vmem:[#allocation5 + $0x2a8] ss:$24 sps:$4 sm:$0xff]  }
 0x10e   : > { %2808 = vmatprep.subr.bf16.mxu0 %v8178_v5  ;;  %v8265_v5 = vld [vmem:[#allocation5 + $0x2ac] ss:$24 sps:$4 sm:$0xff]  }
 0x10f   : > { %2759 = vmatmul.mubr.bf16.vlgmr.msra.gmra.mrb[0].mxu1 %v10018_v8 }
 0x110   : > { %2800 = vmatmul.mubr.bf16.vlgmr.msra.gmra.mrb[0].mxu0 %v10020_v11  ;;  %2850 = vmatpush1.bf16.msra.mxu1 %v8179_v10  ;;  %v8271_v10 = vld [vmem:[#allocation5 + $0x2dc] ss:$24 sps:$4 sm:$0xff]  }
 0x111   : > { %2809 = vmatpush1.bf16.msra.mxu0 %v8176_v9  ;;  %2851 = vmatprep.subr.bf16.mxu1 %v8187_v13  ;;  %v8268_v9 = vld [vmem:[#allocation5 + $0x8d4] ss:$24 sps:$4 sm:$0xff]   ;;  %v8269_v13 = vld [vmem:[#allocation5 + $0x2d8] ss:$24 sps:$4 sm:$0xff]  }
 0x112   : > { %2810 = vmatprep.subr.bf16.mxu0 %v8184_v12  ;;  %2881 = vmatprep.mubr.bf16.mxu1 %v10009_v48  ;;  %v8266_v12 = vld [vmem:[#allocation5 + $0x8d0] ss:$24 sps:$4 sm:$0xff]  }
 0x113   : > { %2840 = vmatprep.mubr.bf16.mxu0 %v10026_v35 }
 0x114   : > { %2852 = vmatpush1.bf16.msra.mxu1 %v8185_v15  ;;  %v8274_v15 = vld [vmem:[#allocation5 + $0x30c] ss:$24 sps:$4 sm:$0xff]  }
 0x115   : > { %2811 = vmatpush1.bf16.msra.mxu0 %v8182_v14  ;;  %2853 = vmatprep.subr.bf16.mxu1 %v8193_v17  ;;  %v1247_v14 = vld [vmem:[%s9990_s15 + $0x20] sm:$0xff] }
 0x116   : > { %2812 = vmatprep.subr.bf16.mxu0 %v8190_v16  ;;  %v8277_v16 = vld [vmem:[#allocation5 + $0x14] ss:$24 sps:$4 sm:$0xff]   ;;  %v10030_v17 = vpack.c.bf16 %v1247_v14, %v1247_v14  ;;  %v8356_v14 = vld [vmem:[#allocation5 + $0x5a8] ss:$24 sps:$4 sm:$0xff]  }
 0x118   : > { %2854 = vmatpush1.bf16.msra.mxu1 %v8191_v19  ;;  %v8275_v19 = vld [vmem:[#allocation5 + $0x10] ss:$24 sps:$4 sm:$0xff]  }
 0x119   : > { %2813 = vmatpush1.bf16.msra.mxu0 %v8188_v18  ;;  %2855 = vmatprep.subr.bf16.mxu1 %v8199_v21  ;;  %v8272_v18 = vld [vmem:[#allocation5 + $0x308] ss:$24 sps:$4 sm:$0xff]   ;;  %v8283_v21 = vld [vmem:[#allocation5 + $0x44] ss:$24 sps:$4 sm:$0xff]  }
 0x11a   : > { %2814 = vmatprep.subr.bf16.mxu0 %v8196_v20  ;;  %v8280_v20 = vld [vmem:[#allocation5 + $0x33c] ss:$24 sps:$4 sm:$0xff]  }
 0x11c   : > { %2856 = vmatpush1.bf16.msra.mxu1 %v8197_v23  ;;  %v8281_v23 = vld [vmem:[#allocation5 + $0x40] ss:$24 sps:$4 sm:$0xff]  }
 0x11d   : > { %2815 = vmatpush1.bf16.msra.mxu0 %v8194_v22  ;;  %2857 = vmatprep.subr.bf16.mxu1 %v8205_v25  ;;  %v8278_v22 = vld [vmem:[#allocation5 + $0x338] ss:$24 sps:$4 sm:$0xff]   ;;  %v8289_v25 = vld [vmem:[#allocation5 + $0x74] ss:$24 sps:$4 sm:$0xff]  }
 0x11e   : > { %2816 = vmatprep.subr.bf16.mxu0 %v8202_v24  ;;  %v8286_v24 = vld [vmem:[#allocation5 + $0x36c] ss:$24 sps:$4 sm:$0xff]  }
 0x120   : > { %2858 = vmatpush1.bf16.msra.mxu1 %v8203_v27  ;;  %v8287_v27 = vld [vmem:[#allocation5 + $0x70] ss:$24 sps:$4 sm:$0xff]  }
 0x121   : > { %2817 = vmatpush1.bf16.msra.mxu0 %v8200_v26  ;;  %2859 = vmatprep.subr.bf16.mxu1 %v8211_v29  ;;  %v8284_v26 = vld [vmem:[#allocation5 + $0x368] ss:$24 sps:$4 sm:$0xff]   ;;  %v8295_v29 = vld [vmem:[#allocation5 + $0xa4] ss:$24 sps:$4 sm:$0xff]  }
 0x122   : > { %2818 = vmatprep.subr.bf16.mxu0 %v8208_v28  ;;  %v8292_v28 = vld [vmem:[#allocation5 + $0x39c] ss:$24 sps:$4 sm:$0xff]  }
 0x124   : > { %2860 = vmatpush1.bf16.msra.mxu1 %v8209_v31  ;;  %v8293_v31 = vld [vmem:[#allocation5 + $0xa0] ss:$24 sps:$4 sm:$0xff]  }
 0x125   : > { %2819 = vmatpush1.bf16.msra.mxu0 %v8206_v30  ;;  %2861 = vmatprep.subr.bf16.mxu1 %v8217_v33  ;;  %v8290_v30 = vld [vmem:[#allocation5 + $0x398] ss:$24 sps:$4 sm:$0xff]   ;;  %v8301_v33 = vld [vmem:[#allocation5 + $0xd4] ss:$24 sps:$4 sm:$0xff]  }
 0x126   : > { %2820 = vmatprep.subr.bf16.mxu0 %v8214_v32  ;;  %v8298_v32 = vld [vmem:[#allocation5 + $0x3cc] ss:$24 sps:$4 sm:$0xff]  }
 0x128   : > { %2862 = vmatpush1.bf16.msra.mxu1 %v8215_v37  ;;  %v8307_v37 = vld [vmem:[#allocation5 + $0x104] ss:$24 sps:$4 sm:$0xff]  }
 0x129   : > { %2821 = vmatpush1.bf16.msra.mxu0 %v8212_v36  ;;  %2863 = vmatprep.subr.bf16.mxu1 %v8223_v39  ;;  %v8304_v36 = vld [vmem:[#allocation5 + $0x3fc] ss:$24 sps:$4 sm:$0xff]   ;;  %v8305_v39 = vld [vmem:[#allocation5 + $0x100] ss:$24 sps:$4 sm:$0xff]  }
 0x12a   : > { %2822 = vmatprep.subr.bf16.mxu0 %v8220_v38  ;;  %v8302_v38 = vld [vmem:[#allocation5 + $0x3f8] ss:$24 sps:$4 sm:$0xff]  }
 0x12c   : > { %2864 = vmatpush1.bf16.msra.mxu1 %v8221_v41  ;;  %v8313_v41 = vld [vmem:[#allocation5 + $0x134] ss:$24 sps:$4 sm:$0xff]  }
 0x12d   : > { %2823 = vmatpush1.bf16.msra.mxu0 %v8218_v40  ;;  %2865 = vmatprep.subr.bf16.mxu1 %v8229_v43  ;;  %v8310_v40 = vld [vmem:[#allocation5 + $0x42c] ss:$24 sps:$4 sm:$0xff]   ;;  %v8311_v43 = vld [vmem:[#allocation5 + $0x130] ss:$24 sps:$4 sm:$0xff]  }
 0x12e   : > { %2824 = vmatprep.subr.bf16.mxu0 %v8226_v42  ;;  %v8308_v42 = vld [vmem:[#allocation5 + $0x428] ss:$24 sps:$4 sm:$0xff]  }
 0x130   : > { %2866 = vmatpush1.bf16.msra.mxu1 %v8227_v45  ;;  %v8319_v45 = vld [vmem:[#allocation5 + $0x164] ss:$24 sps:$4 sm:$0xff]  }
 0x131   : > { %2825 = vmatpush1.bf16.msra.mxu0 %v8224_v44  ;;  %2867 = vmatprep.subr.bf16.mxu1 %v8235_v47  ;;  %v8316_v44 = vld [vmem:[#allocation5 + $0x45c] ss:$24 sps:$4 sm:$0xff]   ;;  %v8317_v47 = vld [vmem:[#allocation5 + $0x160] ss:$24 sps:$4 sm:$0xff]  }
 0x132   : > { %2826 = vmatprep.subr.bf16.mxu0 %v8232_v46  ;;  %v8314_v46 = vld [vmem:[#allocation5 + $0x458] ss:$24 sps:$4 sm:$0xff]  }
 0x134   : > { %2868 = vmatpush1.bf16.msra.mxu1 %v8233_v50  ;;  %v8325_v50 = vld [vmem:[#allocation5 + $0x194] ss:$24 sps:$4 sm:$0xff]  }
 0x135   : > { %2827 = vmatpush1.bf16.msra.mxu0 %v8230_v49  ;;  %2869 = vmatprep.subr.bf16.mxu1 %v8241_v53  ;;  %v8322_v49 = vld [vmem:[#allocation5 + $0x48c] ss:$24 sps:$4 sm:$0xff]   ;;  %v8323_v53 = vld [vmem:[#allocation5 + $0x190] ss:$24 sps:$4 sm:$0xff]  }
 0x136   : > { %2828 = vmatprep.subr.bf16.mxu0 %v8238_v51  ;;  %v8320_v51 = vld [vmem:[#allocation5 + $0x488] ss:$24 sps:$4 sm:$0xff]  }
 0x138   : > { %2870 = vmatpush1.bf16.msra.mxu1 %v8239_v55  ;;  %v8331_v55 = vld [vmem:[#allocation5 + $0x1c4] ss:$24 sps:$4 sm:$0xff]  }
 0x139   : > { %2829 = vmatpush1.bf16.msra.mxu0 %v8236_v54  ;;  %2871 = vmatprep.subr.bf16.mxu1 %v8247_v57  ;;  %v8328_v54 = vld [vmem:[#allocation5 + $0x4bc] ss:$24 sps:$4 sm:$0xff]   ;;  %v8329_v57 = vld [vmem:[#allocation5 + $0x1c0] ss:$24 sps:$4 sm:$0xff]  }
 0x13a   : > { %2830 = vmatprep.subr.bf16.mxu0 %v8244_v56  ;;  %v8326_v56 = vld [vmem:[#allocation5 + $0x4b8] ss:$24 sps:$4 sm:$0xff]  }
 0x13c   : > { %2872 = vmatpush1.bf16.msra.mxu1 %v8245_v59  ;;  %v8337_v59 = vld [vmem:[#allocation5 + $0x1f4] ss:$24 sps:$4 sm:$0xff]  }
 0x13d   : > { %2831 = vmatpush1.bf16.msra.mxu0 %v8242_v58  ;;  %2873 = vmatprep.subr.bf16.mxu1 %v8253_v61  ;;  %v8334_v58 = vld [vmem:[#allocation5 + $0x4ec] ss:$24 sps:$4 sm:$0xff]   ;;  %v8335_v61 = vld [vmem:[#allocation5 + $0x1f0] ss:$24 sps:$4 sm:$0xff]  }
 0x13e   : > { %2832 = vmatprep.subr.bf16.mxu0 %v8250_v60  ;;  %v8332_v60 = vld [vmem:[#allocation5 + $0x4e8] ss:$24 sps:$4 sm:$0xff]  }
 0x140   : > { %2874 = vmatpush1.bf16.msra.mxu1 %v8251_v63  ;;  %v8343_v63 = vld [vmem:[#allocation5 + $0x224] ss:$24 sps:$4 sm:$0xff]  }
 0x141   : > { %2833 = vmatpush1.bf16.msra.mxu0 %v8248_v62  ;;  %2875 = vmatprep.subr.bf16.mxu1 %v8259_v1  ;;  %v8340_v62 = vld [vmem:[#allocation5 + $0x51c] ss:$24 sps:$4 sm:$0xff]   ;;  %v8341_v1 = vld [vmem:[#allocation5 + $0x220] ss:$24 sps:$4 sm:$0xff]  }
 0x142   : > { %2834 = vmatprep.subr.bf16.mxu0 %v8256_v0  ;;  %v8338_v0 = vld [vmem:[#allocation5 + $0x518] ss:$24 sps:$4 sm:$0xff]  }
 0x144   : > { %2876 = vmatpush1.bf16.msra.mxu1 %v8257_v3  ;;  %v8349_v3 = vld [vmem:[#allocation5 + $0x254] ss:$24 sps:$4 sm:$0xff]  }
 0x145   : > { %2835 = vmatpush1.bf16.msra.mxu0 %v8254_v2  ;;  %2877 = vmatprep.subr.bf16.mxu1 %v8265_v5  ;;  %v8346_v2 = vld [vmem:[#allocation5 + $0x54c] ss:$24 sps:$4 sm:$0xff]   ;;  %v8347_v5 = vld [vmem:[#allocation5 + $0x250] ss:$24 sps:$4 sm:$0xff]  }
 0x146   : > { %2836 = vmatprep.subr.bf16.mxu0 %v8262_v4  ;;  %v8344_v4 = vld [vmem:[#allocation5 + $0x548] ss:$24 sps:$4 sm:$0xff]  }
 0x148   : > { %2878 = vmatpush1.bf16.msra.mxu1 %v8263_v7  ;;  %v8355_v7 = vld [vmem:[#allocation5 + $0x284] ss:$24 sps:$4 sm:$0xff]  }
 0x149   : > { %2837 = vmatpush1.bf16.msra.mxu0 %v8260_v6  ;;  %2879 = vmatprep.subr.bf16.mxu1 %v8271_v10  ;;  %v8352_v6 = vld [vmem:[#allocation5 + $0x57c] ss:$24 sps:$4 sm:$0xff]   ;;  %v8353_v10 = vld [vmem:[#allocation5 + $0x280] ss:$24 sps:$4 sm:$0xff]  }
 0x14a   : > { %2838 = vmatprep.subr.bf16.mxu0 %v8268_v9  ;;  %v8350_v9 = vld [vmem:[#allocation5 + $0x578] ss:$24 sps:$4 sm:$0xff]  }
 0x14c   : > { %2880 = vmatpush1.bf16.msra.mxu1 %v8269_v13  ;;  %v8361_v13 = vld [vmem:[#allocation5 + $0x2b4] ss:$24 sps:$4 sm:$0xff]  }
 0x14d   : > { %2839 = vmatpush1.bf16.msra.mxu0 %v8266_v12  ;;  %2890 = vmatprep.subr.bf16.mxu1 %v8274_v15  ;;  %v8358_v12 = vld [vmem:[#allocation5 + $0x5ac] ss:$24 sps:$4 sm:$0xff]   ;;  %v8359_v15 = vld [vmem:[#allocation5 + $0x2b0] ss:$24 sps:$4 sm:$0xff]  }
 0x14e   : > { %2972 = vmatprep.subr.bf16.mxu0 %v8277_v16  ;;  %v8364_v16 = vld [vmem:[#allocation5 + $0x5dc] ss:$24 sps:$4 sm:$0xff]  }
 0x14f   : > { %2882 = vmatmul.mubr.bf16.vlgmr.msra.gmra.mrb[4].mxu1 %v10018_v8 }
 0x150   : > { %2841 = vmatmul.mubr.bf16.vlgmr.msra.gmra.mrb[0].mxu0 %v10030_v17  ;;  %2891 = vmatpush1.bf16.msra.mxu1 %v8272_v18  ;;  %v8367_v18 = vld [vmem:[#allocation5 + $0x2e4] ss:$24 sps:$4 sm:$0xff]  }
 0x151   : > { %2973 = vmatpush1.bf16.msra.mxu0 %v8275_v19  ;;  %2892 = vmatprep.subr.bf16.mxu1 %v8280_v20  ;;  %v8362_v19 = vld [vmem:[#allocation5 + $0x5d8] ss:$24 sps:$4 sm:$0xff]  }
 0x152   : > { %2974 = vmatprep.subr.bf16.mxu0 %v8283_v21  ;;  %2922 = vmatprep.mubr.bf16.mxu1 %v10012_v52  ;;  %v8365_v20 = vld [vmem:[#allocation5 + $0x2e0] ss:$24 sps:$4 sm:$0xff]   ;;  %v8370_v21 = vld [vmem:[#allocation5 + $0x60c] ss:$24 sps:$4 sm:$0xff]  }
 0x153   : > { %3004 = vmatprep.mubr.bf16.mxu0 %v10009_v48  ;;  %v8299_v48 = vld [vmem:[#allocation5 + $0xd0] ss:$24 sps:$4 sm:$0xff]  }
 0x154   : > { %2893 = vmatpush1.bf16.msra.mxu1 %v8278_v22  ;;  %v8373_v22 = vld [vmem:[#allocation5 + $0x314] ss:$24 sps:$4 sm:$0xff]  }
 0x155   : > { %2975 = vmatpush1.bf16.msra.mxu0 %v8281_v23  ;;  %2894 = vmatprep.subr.bf16.mxu1 %v8286_v24  ;;  %v8368_v23 = vld [vmem:[#allocation5 + $0x608] ss:$24 sps:$4 sm:$0xff]  }
 0x156   : > { %2976 = vmatprep.subr.bf16.mxu0 %v8289_v25  ;;  %v8371_v24 = vld [vmem:[#allocation5 + $0x310] ss:$24 sps:$4 sm:$0xff]   ;;  %v8376_v25 = vld [vmem:[#allocation5 + $0x63c] ss:$24 sps:$4 sm:$0xff]  }
 0x158   : > { %2895 = vmatpush1.bf16.msra.mxu1 %v8284_v26  ;;  %v8379_v26 = vld [vmem:[#allocation5 + $0x344] ss:$24 sps:$4 sm:$0xff]  }
 0x159   : > { %2977 = vmatpush1.bf16.msra.mxu0 %v8287_v27  ;;  %2896 = vmatprep.subr.bf16.mxu1 %v8292_v28  ;;  %v8374_v27 = vld [vmem:[#allocation5 + $0x638] ss:$24 sps:$4 sm:$0xff]  }
 0x15a   : > { %2978 = vmatprep.subr.bf16.mxu0 %v8295_v29  ;;  %v8377_v28 = vld [vmem:[#allocation5 + $0x340] ss:$24 sps:$4 sm:$0xff]   ;;  %v8382_v29 = vld [vmem:[#allocation5 + $0x66c] ss:$24 sps:$4 sm:$0xff]  }
 0x15c   : > { %2897 = vmatpush1.bf16.msra.mxu1 %v8290_v30  ;;  %v8385_v30 = vld [vmem:[#allocation5 + $0x374] ss:$24 sps:$4 sm:$0xff]  }
 0x15d   : > { %2979 = vmatpush1.bf16.msra.mxu0 %v8293_v31  ;;  %2898 = vmatprep.subr.bf16.mxu1 %v8298_v32  ;;  %v8380_v31 = vld [vmem:[#allocation5 + $0x668] ss:$24 sps:$4 sm:$0xff]  }
 0x15e   : > { %2980 = vmatprep.subr.bf16.mxu0 %v8301_v33  ;;  %v8383_v32 = vld [vmem:[#allocation5 + $0x370] ss:$24 sps:$4 sm:$0xff]   ;;  %v8388_v33 = vld [vmem:[#allocation5 + $0x69c] ss:$24 sps:$4 sm:$0xff]  }
 0x160   : > { %2899 = vmatpush1.bf16.msra.mxu1 %v8296_v34  ;;  %v8386_v34 = vld [vmem:[#allocation5 + $0x698] ss:$24 sps:$4 sm:$0xff]  }
 0x161   : > { %2981 = vmatpush1.bf16.msra.mxu0 %v8299_v48  ;;  %2900 = vmatprep.subr.bf16.mxu1 %v8304_v36  ;;  %v8389_v48 = vld [vmem:[#allocation5 + $0x3a0] ss:$24 sps:$4 sm:$0xff]   ;;  %v8394_v36 = vld [vmem:[#allocation5 + $0x6cc] ss:$24 sps:$4 sm:$0xff]  }
 0x162   : > { %2982 = vmatprep.subr.bf16.mxu0 %v8307_v37  ;;  %v8397_v37 = vld [vmem:[#allocation5 + $0x3d4] ss:$24 sps:$4 sm:$0xff]  }
 0x164   : > { %2901 = vmatpush1.bf16.msra.mxu1 %v8302_v38  ;;  %v8392_v38 = vld [vmem:[#allocation5 + $0x6c8] ss:$24 sps:$4 sm:$0xff]  }
 0x165   : > { %2983 = vmatpush1.bf16.msra.mxu0 %v8305_v39  ;;  %2902 = vmatprep.subr.bf16.mxu1 %v8310_v40  ;;  %v8400_v39 = vld [vmem:[#allocation5 + $0x6fc] ss:$24 sps:$4 sm:$0xff]  }
 0x166   : > { %2984 = vmatprep.subr.bf16.mxu0 %v8313_v41  ;;  %v8403_v40 = vld [vmem:[#allocation5 + $0x404] ss:$24 sps:$4 sm:$0xff]   ;;  %v8398_v41 = vld [vmem:[#allocation5 + $0x6f8] ss:$24 sps:$4 sm:$0xff]  }
 0x168   : > { %2903 = vmatpush1.bf16.msra.mxu1 %v8308_v42  ;;  %v8401_v42 = vld [vmem:[#allocation5 + $0x400] ss:$24 sps:$4 sm:$0xff]  }
 0x169   : > { %2985 = vmatpush1.bf16.msra.mxu0 %v8311_v43  ;;  %2904 = vmatprep.subr.bf16.mxu1 %v8316_v44  ;;  %v8406_v43 = vld [vmem:[#allocation5 + $0x72c] ss:$24 sps:$4 sm:$0xff]  }
 0x16a   : > { %2986 = vmatprep.subr.bf16.mxu0 %v8319_v45  ;;  %v8409_v44 = vld [vmem:[#allocation5 + $0x434] ss:$24 sps:$4 sm:$0xff]   ;;  %v8404_v45 = vld [vmem:[#allocation5 + $0x728] ss:$24 sps:$4 sm:$0xff]  }
 0x16c   : > { %2905 = vmatpush1.bf16.msra.mxu1 %v8314_v46  ;;  %v8407_v46 = vld [vmem:[#allocation5 + $0x430] ss:$24 sps:$4 sm:$0xff]  }
 0x16d   : > { %2987 = vmatpush1.bf16.msra.mxu0 %v8317_v47  ;;  %2906 = vmatprep.subr.bf16.mxu1 %v8322_v49  ;;  %v8412_v47 = vld [vmem:[#allocation5 + $0x75c] ss:$24 sps:$4 sm:$0xff]  }
 0x16e   : > { %2988 = vmatprep.subr.bf16.mxu0 %v8325_v50  ;;  %v8415_v49 = vld [vmem:[#allocation5 + $0x464] ss:$24 sps:$4 sm:$0xff]   ;;  %v8410_v50 = vld [vmem:[#allocation5 + $0x758] ss:$24 sps:$4 sm:$0xff]  }
 0x170   : > { %2907 = vmatpush1.bf16.msra.mxu1 %v8320_v51  ;;  %v8413_v51 = vld [vmem:[#allocation5 + $0x460] ss:$24 sps:$4 sm:$0xff]  }
 0x171   : > { %2989 = vmatpush1.bf16.msra.mxu0 %v8323_v53  ;;  %2908 = vmatprep.subr.bf16.mxu1 %v8328_v54  ;;  %v8418_v53 = vld [vmem:[#allocation5 + $0x78c] ss:$24 sps:$4 sm:$0xff]  }
 0x172   : > { %2990 = vmatprep.subr.bf16.mxu0 %v8331_v55  ;;  %v8421_v54 = vld [vmem:[#allocation5 + $0x494] ss:$24 sps:$4 sm:$0xff]   ;;  %v8416_v55 = vld [vmem:[#allocation5 + $0x788] ss:$24 sps:$4 sm:$0xff]  }
 0x174   : > { %2909 = vmatpush1.bf16.msra.mxu1 %v8326_v56  ;;  %v8419_v56 = vld [vmem:[#allocation5 + $0x490] ss:$24 sps:$4 sm:$0xff]  }
 0x175   : > { %2991 = vmatpush1.bf16.msra.mxu0 %v8329_v57  ;;  %2910 = vmatprep.subr.bf16.mxu1 %v8334_v58  ;;  %v8424_v57 = vld [vmem:[#allocation5 + $0x7bc] ss:$24 sps:$4 sm:$0xff]  }
 0x176   : > { %2992 = vmatprep.subr.bf16.mxu0 %v8337_v59  ;;  %v8427_v58 = vld [vmem:[#allocation5 + $0x4c4] ss:$24 sps:$4 sm:$0xff]   ;;  %v8422_v59 = vld [vmem:[#allocation5 + $0x7b8] ss:$24 sps:$4 sm:$0xff]  }
 0x178   : > { %2911 = vmatpush1.bf16.msra.mxu1 %v8332_v60  ;;  %v8425_v60 = vld [vmem:[#allocation5 + $0x4c0] ss:$24 sps:$4 sm:$0xff]  }
 0x179   : > { %2993 = vmatpush1.bf16.msra.mxu0 %v8335_v61  ;;  %2912 = vmatprep.subr.bf16.mxu1 %v8340_v62  ;;  %v8430_v61 = vld [vmem:[#allocation5 + $0x7ec] ss:$24 sps:$4 sm:$0xff]  }
 0x17a   : > { %2994 = vmatprep.subr.bf16.mxu0 %v8343_v63  ;;  %v8433_v62 = vld [vmem:[#allocation5 + $0x4f4] ss:$24 sps:$4 sm:$0xff]   ;;  %v8428_v63 = vld [vmem:[#allocation5 + $0x7e8] ss:$24 sps:$4 sm:$0xff]  }
 0x17c   : > { %2913 = vmatpush1.bf16.msra.mxu1 %v8338_v0  ;;  %v8431_v0 = vld [vmem:[#allocation5 + $0x4f0] ss:$24 sps:$4 sm:$0xff]  }
 0x17d   : > { %2995 = vmatpush1.bf16.msra.mxu0 %v8341_v1  ;;  %2914 = vmatprep.subr.bf16.mxu1 %v8346_v2  ;;  %v8436_v1 = vld [vmem:[#allocation5 + $0x81c] ss:$24 sps:$4 sm:$0xff]  }
 0x17e   : > { %2996 = vmatprep.subr.bf16.mxu0 %v8349_v3  ;;  %v8439_v2 = vld [vmem:[#allocation5 + $0x524] ss:$24 sps:$4 sm:$0xff]   ;;  %v8434_v3 = vld [vmem:[#allocation5 + $0x818] ss:$24 sps:$4 sm:$0xff]  }
 0x180   : > { %2915 = vmatpush1.bf16.msra.mxu1 %v8344_v4  ;;  %v8437_v4 = vld [vmem:[#allocation5 + $0x520] ss:$24 sps:$4 sm:$0xff]  }
 0x181   : > { %2997 = vmatpush1.bf16.msra.mxu0 %v8347_v5  ;;  %2916 = vmatprep.subr.bf16.mxu1 %v8352_v6  ;;  %v8442_v5 = vld [vmem:[#allocation5 + $0x84c] ss:$24 sps:$4 sm:$0xff]  }
 0x182   : > { %2998 = vmatprep.subr.bf16.mxu0 %v8355_v7  ;;  %v8445_v6 = vld [vmem:[#allocation5 + $0x554] ss:$24 sps:$4 sm:$0xff]   ;;  %v8440_v7 = vld [vmem:[#allocation5 + $0x848] ss:$24 sps:$4 sm:$0xff]  }
 0x184   : > { %2917 = vmatpush1.bf16.msra.mxu1 %v8350_v9  ;;  %v8443_v9 = vld [vmem:[#allocation5 + $0x550] ss:$24 sps:$4 sm:$0xff]  }
 0x185   : > { %2999 = vmatpush1.bf16.msra.mxu0 %v8353_v10  ;;  %2918 = vmatprep.subr.bf16.mxu1 %v8358_v12  ;;  %v8448_v10 = vld [vmem:[#allocation5 + $0x87c] ss:$24 sps:$4 sm:$0xff]  }
 0x186   : > { %3000 = vmatprep.subr.bf16.mxu0 %v8361_v13  ;;  %v8451_v12 = vld [vmem:[#allocation5 + $0x584] ss:$24 sps:$4 sm:$0xff]   ;;  %v8446_v13 = vld [vmem:[#allocation5 + $0x878] ss:$24 sps:$4 sm:$0xff]  }
 0x188   : > { %2919 = vmatpush1.bf16.msra.mxu1 %v8356_v14  ;;  %v8449_v14 = vld [vmem:[#allocation5 + $0x580] ss:$24 sps:$4 sm:$0xff]  }
 0x189   : > { %3001 = vmatpush1.bf16.msra.mxu0 %v8359_v15  ;;  %2920 = vmatprep.subr.bf16.mxu1 %v8364_v16  ;;  %v8454_v15 = vld [vmem:[#allocation5 + $0x8ac] ss:$24 sps:$4 sm:$0xff]  }
 0x18a   : > { %3002 = vmatprep.subr.bf16.mxu0 %v8367_v18  ;;  %v8457_v16 = vld [vmem:[#allocation5 + $0x5b4] ss:$24 sps:$4 sm:$0xff]   ;;  %v8452_v18 = vld [vmem:[#allocation5 + $0x8a8] ss:$24 sps:$4 sm:$0xff]  }
 0x18c   : > { %2921 = vmatpush1.bf16.msra.mxu1 %v8362_v19  ;;  %v8455_v19 = vld [vmem:[#allocation5 + $0x5b0] ss:$24 sps:$4 sm:$0xff]  }
 0x18d   : > { %3003 = vmatpush1.bf16.msra.mxu0 %v8365_v20  ;;  %2931 = vmatprep.subr.bf16.mxu1 %v8370_v21  ;;  %v8460_v20 = vld [vmem:[#allocation5 + $0x8dc] ss:$24 sps:$4 sm:$0xff]  }
 0x18e   : > { %3013 = vmatprep.subr.bf16.mxu0 %v8373_v22  ;;  %v8463_v21 = vld [vmem:[#allocation5 + $0x5e4] ss:$24 sps:$4 sm:$0xff]   ;;  %v8458_v22 = vld [vmem:[#allocation5 + $0x8d8] ss:$24 sps:$4 sm:$0xff]  }
 0x18f   : > { %2923 = vmatmul.mubr.bf16.vlgmr.msra.gmra.mrb[4].mxu1 %v10020_v11 }
 0x190   : > { %3005 = vmatmul.mubr.bf16.vlgmr.msra.gmra.mrb[4].mxu0 %v10018_v8  ;;  %2932 = vmatpush1.bf16.msra.mxu1 %v8368_v23  ;;  %v8391_v8 = vld [vmem:[#allocation5 + $0x3a4] ss:$24 sps:$4 sm:$0xff]   ;;  %v8461_v23 = vld [vmem:[#allocation5 + $0x5e0] ss:$24 sps:$4 sm:$0xff]  }
 0x191   : > { %3014 = vmatpush1.bf16.msra.mxu0 %v8371_v24  ;;  %2933 = vmatprep.subr.bf16.mxu1 %v8376_v25  ;;  %v8466_v24 = vld [vmem:[#allocation5 + $0x614] ss:$24 sps:$4 sm:$0xff]  }
 0x192   : > { %3015 = vmatprep.subr.bf16.mxu0 %v8379_v26  ;;  %2963 = vmatprep.mubr.bf16.mxu1 %v10026_v35  ;;  %v8502_v25 = vld [vmem:[#allocation8 + $0x4] ss:$24 sps:$4 sm:$0xff]  }
 0x193   : > { %3045 = vmatprep.mubr.bf16.mxu0 %v10012_v52  ;;  %v8395_v52 = vld [vmem:[#allocation5 + $0x3d0] ss:$24 sps:$4 sm:$0xff]  }
 0x194   : > { %2934 = vmatpush1.bf16.msra.mxu1 %v8374_v27  ;;  %v8464_v26 = vld [vmem:[#allocation5 + $0x610] ss:$24 sps:$4 sm:$0xff]  }
 0x195   : > { %3016 = vmatpush1.bf16.msra.mxu0 %v8377_v28  ;;  %2935 = vmatprep.subr.bf16.mxu1 %v8382_v29  ;;  %v8500_v27 = vld [vmem:[#allocation8] ss:$24 sps:$4 sm:$0xff]   ;;  %v8508_v29 = vld [vmem:[#allocation8 + $0x34] ss:$24 sps:$4 sm:$0xff]  }
 0x196   : > { %3017 = vmatprep.subr.bf16.mxu0 %v8385_v30  ;;  %v8469_v28 = vld [vmem:[#allocation5 + $0x644] ss:$24 sps:$4 sm:$0xff]   ;;  %v8467_v30 = vld [vmem:[#allocation5 + $0x640] ss:$24 sps:$4 sm:$0xff]  }
 0x198   : > { %2936 = vmatpush1.bf16.msra.mxu1 %v8380_v31  ;;  %v8506_v31 = vld [vmem:[#allocation8 + $0x30] ss:$24 sps:$4 sm:$0xff]  }
 0x199   : > { %3018 = vmatpush1.bf16.msra.mxu0 %v8383_v32  ;;  %2937 = vmatprep.subr.bf16.mxu1 %v8388_v33  ;;  %v8472_v32 = vld [vmem:[#allocation5 + $0x674] ss:$24 sps:$4 sm:$0xff]  }
 0x19a   : > { %3019 = vmatprep.subr.bf16.mxu0 %v8391_v8  ;;  %v8514_v33 = vld [vmem:[#allocation8 + $0x64] ss:$24 sps:$4 sm:$0xff]  }
 0x19b   : > { %v8470_v8 = vld [vmem:[#allocation5 + $0x670] ss:$24 sps:$4 sm:$0xff]  }
 0x19c   : > { %2938 = vmatpush1.bf16.msra.mxu1 %v8386_v34  ;;  %v8475_v34 = vld [vmem:[#allocation5 + $0x6a4] ss:$24 sps:$4 sm:$0xff]  }
 0x19d   : > { %3020 = vmatpush1.bf16.msra.mxu0 %v8389_v48  ;;  %2939 = vmatprep.subr.bf16.mxu1 %v8394_v36  ;;  %v8512_v48 = vld [vmem:[#allocation8 + $0x60] ss:$24 sps:$4 sm:$0xff]   ;;  %v8520_v36 = vld [vmem:[#allocation8 + $0x94] ss:$24 sps:$4 sm:$0xff]  }
 0x19e   : > { %3021 = vmatprep.subr.bf16.mxu0 %v8397_v37  ;;  %v8478_v37 = vld [vmem:[#allocation5 + $0x6d4] ss:$24 sps:$4 sm:$0xff]  }
 0x1a0   : > { %2940 = vmatpush1.bf16.msra.mxu1 %v8392_v38  ;;  %v8518_v38 = vld [vmem:[#allocation8 + $0x90] ss:$24 sps:$4 sm:$0xff]  }
 0x1a1   : > { %3022 = vmatpush1.bf16.msra.mxu0 %v8395_v52  ;;  %2941 = vmatprep.subr.bf16.mxu1 %v8400_v39  ;;  %v8526_v52 = vld [vmem:[#allocation8 + $0xc4] ss:$24 sps:$4 sm:$0xff]  }
 0x1a2   : > { %3023 = vmatprep.subr.bf16.mxu0 %v8403_v40  ;;  %v8476_v39 = vld [vmem:[#allocation5 + $0x6d0] ss:$24 sps:$4 sm:$0xff]   ;;  %v8481_v40 = vld [vmem:[#allocation5 + $0x704] ss:$24 sps:$4 sm:$0xff]  }
 0x1a4   : > { %2942 = vmatpush1.bf16.msra.mxu1 %v8398_v41  ;;  %v8532_v41 = vld [vmem:[#allocation8 + $0xf4] ss:$24 sps:$4 sm:$0xff]  }
 0x1a5   : > { %3024 = vmatpush1.bf16.msra.mxu0 %v8401_v42  ;;  %2943 = vmatprep.subr.bf16.mxu1 %v8406_v43  ;;  %v8479_v42 = vld [vmem:[#allocation5 + $0x700] ss:$24 sps:$4 sm:$0xff]   ;;  %v8484_v43 = vld [vmem:[#allocation5 + $0x734] ss:$24 sps:$4 sm:$0xff]  }
 0x1a6   : > { %3025 = vmatprep.subr.bf16.mxu0 %v8409_v44  ;;  %v8530_v44 = vld [vmem:[#allocation8 + $0xf0] ss:$24 sps:$4 sm:$0xff]  }
 0x1a8   : > { %2944 = vmatpush1.bf16.msra.mxu1 %v8404_v45  ;;  %v8538_v45 = vld [vmem:[#allocation8 + $0x124] ss:$24 sps:$4 sm:$0xff]  }
 0x1a9   : > { %3026 = vmatpush1.bf16.msra.mxu0 %v8407_v46  ;;  %2945 = vmatprep.subr.bf16.mxu1 %v8412_v47 }
 0x1aa   : > { %3027 = vmatprep.subr.bf16.mxu0 %v8415_v49 }
 0x1ac   : > { %2946 = vmatpush1.bf16.msra.mxu1 %v8410_v50  ;;  %v8482_v50 = vld [vmem:[#allocation5 + $0x730] ss:$24 sps:$4 sm:$0xff]  }
 0x1ad   : > { %3028 = vmatpush1.bf16.msra.mxu0 %v8413_v51  ;;  %2947 = vmatprep.subr.bf16.mxu1 %v8418_v53  ;;  %v8536_v51 = vld [vmem:[#allocation8 + $0x120] ss:$24 sps:$4 sm:$0xff]  }
 0x1ae   : > { %3029 = vmatprep.subr.bf16.mxu0 %v8421_v54  ;;  %v8487_v54 = vld [vmem:[#allocation5 + $0x764] ss:$24 sps:$4 sm:$0xff]  }
 0x1b0   : > { %2948 = vmatpush1.bf16.msra.mxu1 %v8416_v55  ;;  %v8544_v55 = vld [vmem:[#allocation8 + $0x154] ss:$24 sps:$4 sm:$0xff]  }
 0x1b1   : > { %3030 = vmatpush1.bf16.msra.mxu0 %v8419_v56  ;;  %2949 = vmatprep.subr.bf16.mxu1 %v8424_v57  ;;  %v8485_v56 = vld [vmem:[#allocation5 + $0x760] ss:$24 sps:$4 sm:$0xff]   ;;  %v8490_v57 = vld [vmem:[#allocation5 + $0x794] ss:$24 sps:$4 sm:$0xff]  }
 0x1b2   : > { %3031 = vmatprep.subr.bf16.mxu0 %v8427_v58  ;;  %v8542_v58 = vld [vmem:[#allocation8 + $0x150] ss:$24 sps:$4 sm:$0xff]  }
 0x1b4   : > { %2950 = vmatpush1.bf16.msra.mxu1 %v8422_v59  ;;  %v8550_v59 = vld [vmem:[#allocation8 + $0x184] ss:$24 sps:$4 sm:$0xff]  }
 0x1b5   : > { %3032 = vmatpush1.bf16.msra.mxu0 %v8425_v60  ;;  %2951 = vmatprep.subr.bf16.mxu1 %v8430_v61  ;;  %v8488_v60 = vld [vmem:[#allocation5 + $0x790] ss:$24 sps:$4 sm:$0xff]   ;;  %v8493_v61 = vld [vmem:[#allocation5 + $0x7c4] ss:$24 sps:$4 sm:$0xff]  }
 0x1b6   : > { %3033 = vmatprep.subr.bf16.mxu0 %v8433_v62  ;;  %v8548_v62 = vld [vmem:[#allocation8 + $0x180] ss:$24 sps:$4 sm:$0xff]  }
 0x1b8   : > { %2952 = vmatpush1.bf16.msra.mxu1 %v8428_v63  ;;  %v8556_v63 = vld [vmem:[#allocation8 + $0x1b4] ss:$24 sps:$4 sm:$0xff]  }
 0x1b9   : > { %3034 = vmatpush1.bf16.msra.mxu0 %v8431_v0  ;;  %2953 = vmatprep.subr.bf16.mxu1 %v8436_v1  ;;  %v8491_v0 = vld [vmem:[#allocation5 + $0x7c0] ss:$24 sps:$4 sm:$0xff]   ;;  %v8496_v1 = vld [vmem:[#allocation5 + $0x7f4] ss:$24 sps:$4 sm:$0xff]  }
 0x1ba   : > { %3035 = vmatprep.subr.bf16.mxu0 %v8439_v2  ;;  %v8554_v2 = vld [vmem:[#allocation8 + $0x1b0] ss:$24 sps:$4 sm:$0xff]  }
 0x1bc   : > { %2954 = vmatpush1.bf16.msra.mxu1 %v8434_v3  ;;  %v8562_v3 = vld [vmem:[#allocation8 + $0x1e4] ss:$24 sps:$4 sm:$0xff]  }
 0x1bd   : > { %3036 = vmatpush1.bf16.msra.mxu0 %v8437_v4  ;;  %2955 = vmatprep.subr.bf16.mxu1 %v8442_v5  ;;  %v8494_v4 = vld [vmem:[#allocation5 + $0x7f0] ss:$24 sps:$4 sm:$0xff]  }
 0x1be   : > { %3037 = vmatprep.subr.bf16.mxu0 %v8445_v6  ;;  %v8560_v5 = vld [vmem:[#allocation8 + $0x1e0] ss:$24 sps:$4 sm:$0xff]  }
 0x1bf   : > { %v8499_v6 = vld [vmem:[#allocation5 + $0x824] ss:$24 sps:$4 sm:$0xff]  }
 0x1c0   : > { %2956 = vmatpush1.bf16.msra.mxu1 %v8440_v7  ;;  %v8568_v7 = vld [vmem:[#allocation8 + $0x214] ss:$24 sps:$4 sm:$0xff]  }
 0x1c1   : > { %3038 = vmatpush1.bf16.msra.mxu0 %v8443_v9  ;;  %2957 = vmatprep.subr.bf16.mxu1 %v8448_v10  ;;  %v8497_v9 = vld [vmem:[#allocation5 + $0x820] ss:$24 sps:$4 sm:$0xff]  }
 0x1c2   : > { %3039 = vmatprep.subr.bf16.mxu0 %v8451_v12  ;;  %v8566_v10 = vld [vmem:[#allocation8 + $0x210] ss:$24 sps:$4 sm:$0xff]  }
 0x1c3   : > { %v8505_v12 = vld [vmem:[#allocation5 + $0x854] ss:$24 sps:$4 sm:$0xff]  }
 0x1c4   : > { %2958 = vmatpush1.bf16.msra.mxu1 %v8446_v13  ;;  %v8574_v13 = vld [vmem:[#allocation8 + $0x244] ss:$24 sps:$4 sm:$0xff]  }
 0x1c5   : > { %3040 = vmatpush1.bf16.msra.mxu0 %v8449_v14  ;;  %2959 = vmatprep.subr.bf16.mxu1 %v8454_v15  ;;  %v8503_v14 = vld [vmem:[#allocation5 + $0x850] ss:$24 sps:$4 sm:$0xff]  }
 0x1c6   : > { %3041 = vmatprep.subr.bf16.mxu0 %v8457_v16  ;;  %v8572_v15 = vld [vmem:[#allocation8 + $0x240] ss:$24 sps:$4 sm:$0xff]  }
 0x1c7   : > { %v8511_v16 = vld [vmem:[#allocation5 + $0x884] ss:$24 sps:$4 sm:$0xff]  }
 0x1c8   : > { %2960 = vmatpush1.bf16.msra.mxu1 %v8452_v18  ;;  %v8580_v18 = vld [vmem:[#allocation8 + $0x274] ss:$24 sps:$4 sm:$0xff]  }
 0x1c9   : > { %3042 = vmatpush1.bf16.msra.mxu0 %v8455_v19  ;;  %2961 = vmatprep.subr.bf16.mxu1 %v8460_v20  ;;  %v8509_v19 = vld [vmem:[#allocation5 + $0x880] ss:$24 sps:$4 sm:$0xff]  }
 0x1ca   : > { %3043 = vmatprep.subr.bf16.mxu0 %v8463_v21  ;;  %v8578_v20 = vld [vmem:[#allocation8 + $0x270] ss:$24 sps:$4 sm:$0xff]  }
 0x1cb   : > { %v8517_v21 = vld [vmem:[#allocation5 + $0x8b4] ss:$24 sps:$4 sm:$0xff]  }
 0x1cc   : > { %2962 = vmatpush1.bf16.msra.mxu1 %v8458_v22  ;;  %v8586_v22 = vld [vmem:[#allocation8 + $0x2a4] ss:$24 sps:$4 sm:$0xff]  }
 0x1cd   : > { %3044 = vmatpush1.bf16.msra.mxu0 %v8461_v23  ;;  %4602 = vmatprep.subr.bf16.mxu1 %v8502_v25  ;;  %v8515_v23 = vld [vmem:[#allocation5 + $0x8b0] ss:$24 sps:$4 sm:$0xff]   ;;  %v8523_v25 = vld [vmem:[#allocation5 + $0x8e4] ss:$24 sps:$4 sm:$0xff]  }
 0x1ce   : > { %3054 = vmatprep.subr.bf16.mxu0 %v8466_v24  ;;  %v8584_v24 = vld [vmem:[#allocation8 + $0x2a0] ss:$24 sps:$4 sm:$0xff]  }
 0x1cf   : > { %2964 = vmatmul.mubr.bf16.vlgmr.msra.gmra.mrb[4].mxu1 %v10030_v17 }
 0x1d0   : > { %3046 = vmatmul.mubr.bf16.vlgmr.msra.gmra.mrb[4].mxu0 %v10020_v11  ;;  %4603 = vmatpush1.bf16.msra.mxu1 %v8500_v27  ;;  %v8473_v11 = vld [vmem:[#allocation5 + $0x6a0] ss:$24 sps:$4 sm:$0xff]  }
 0x1d1   : > { %3055 = vmatpush1.bf16.msra.mxu0 %v8464_v26  ;;  %4604 = vmatprep.subr.bf16.mxu1 %v8508_v29  ;;  %v8592_v26 = vld [vmem:[#allocation8 + $0x2d4] ss:$24 sps:$4 sm:$0xff]  }
 0x1d2   : > { %3056 = vmatprep.subr.bf16.mxu0 %v8469_v28  ;;  %3086 = vmatprep.mubr.bf16.mxu0 %v10026_v35  ;;  %v8524_v35 = vld [vmem:[#allocation8 + $0xc0] ss:$24 sps:$4 sm:$0xff]   ;;  %v8590_v28 = vld [vmem:[#allocation8 + $0x2d0] ss:$24 sps:$4 sm:$0xff]   ;;  %v8529_v29 = vld [vmem:[#allocation8 + $0xc] ss:$24 sps:$4 sm:$0xff]  }
 0x1d3   : > { %v8521_v27 = vld [vmem:[#allocation5 + $0x8e0] ss:$24 sps:$4 sm:$0xff]  }
 0x1d4   : > { %4605 = vmatpush1.bf16.msra.mxu1 %v8506_v31  ;;  %v8527_v31 = vld [vmem:[#allocation8 + $0x8] ss:$24 sps:$4 sm:$0xff]  }
 0x1d5   : > { %3057 = vmatpush1.bf16.msra.mxu0 %v8467_v30  ;;  %4606 = vmatprep.subr.bf16.mxu1 %v8514_v33  ;;  %v8610_v30 = vld [vmem:[#allocation8 + $0x304] ss:$24 sps:$4 sm:$0xff]   ;;  %v8533_v33 = vld [vmem:[#allocation8 + $0x38] ss:$24 sps:$4 sm:$0xff]  }
 0x1d6   : > { %3058 = vmatprep.subr.bf16.mxu0 %v8472_v32  ;;  %v8535_v32 = vld [vmem:[#allocation8 + $0x3c] ss:$24 sps:$4 sm:$0xff]  }
 0x1d8   : > { %4607 = vmatpush1.bf16.msra.mxu1 %v8512_v48  ;;  %v8539_v48 = vld [vmem:[#allocation8 + $0x68] ss:$24 sps:$4 sm:$0xff]  }
 0x1d9   : > { %3059 = vmatpush1.bf16.msra.mxu0 %v8470_v8  ;;  %4608 = vmatprep.subr.bf16.mxu1 %v8520_v36  ;;  %v8541_v8 = vld [vmem:[#allocation8 + $0x6c] ss:$24 sps:$4 sm:$0xff]   ;;  %v8547_v36 = vld [vmem:[#allocation8 + $0x9c] ss:$24 sps:$4 sm:$0xff]  }
 0x1da   : > { %3060 = vmatprep.subr.bf16.mxu0 %v8475_v34  ;;  %v1256_v34 = vlaneseq }
 0x1dc   : > { %4609 = vmatpush1.bf16.msra.mxu1 %v8518_v38  ;;  %v8553_v38 = vld [vmem:[#allocation8 + $0xcc] ss:$24 sps:$4 sm:$0xff]  }
 0x1dd   : > { %3061 = vmatpush1.bf16.msra.mxu0 %v8473_v11  ;;  %4610 = vmatprep.subr.bf16.mxu1 %v8526_v52  ;;  %v10048_v11 = vshrl.u32 %v1256_v34, 7  ;;  %v10050_v52 = vld [vmem:[#allocation7] sm:$0x3f]  ;;  %v8640_v34 = vld [vmem:[#allocation8 + $0x3f4] ss:$24 sps:$4 sm:$0xff]  }
 0x1de   : > { %3062 = vmatprep.subr.bf16.mxu0 %v8478_v37  ;;  %v8545_v37 = vld [vmem:[#allocation8 + $0x98] ss:$24 sps:$4 sm:$0xff]  }
 0x1e0   : > { %4611 = vmatpush1.bf16.msra.mxu1 %v8524_v35  ;;  %v8559_v35 = vld [vmem:[#allocation8 + $0xfc] ss:$24 sps:$4 sm:$0xff]  }
 0x1e1   : > { %3063 = vmatpush1.bf16.msra.mxu0 %v8476_v39  ;;  %4612 = vmatprep.subr.bf16.mxu1 %v8532_v41  ;;  %v10053_v39 = vsub.s32 0, %v10048_v11 }
 0x1e2   : > { %3064 = vmatprep.subr.bf16.mxu0 %v8481_v40  ;;  %v10043_v46 = vpop.f32.mrb[0].mxu1  ;;  %v8551_v40 = vld [vmem:[#allocation8 + $0xc8] ss:$24 sps:$4 sm:$0xff]  }
 0x1e3   : > { %v10045_v47 = vpop.f32.mrb[1].mxu1  ;;  %v1259_v41 = vrot.slane %v10050_v52, %v10053_v39 }
 0x1e4   : > { %v2764_v49 = vpop.f32.mrb[2].mxu1  ;;  %4613 = vmatpush1.bf16.msra.mxu1 %v8530_v44 }
 0x1e5   : > { %3065 = vmatpush1.bf16.msra.mxu0 %v8479_v42  ;;  %v2765_v53 = vpop.f32.mrb[3].mxu1  ;;  %4614 = vmatprep.subr.bf16.mxu1 %v8538_v45  ;;  %v2761_v44 = vadd.f32 %v10043_v46, %v1259_v41  ;;  %v8565_v45 = vld [vmem:[#allocation8 + $0x12c] ss:$24 sps:$4 sm:$0xff]   ;;  %v8644_v41 = vld [vmem:[#allocation8 + $0x420] ss:$24 sps:$4 sm:$0xff]  }
 0x1e6   : > { %3066 = vmatprep.subr.bf16.mxu0 %v8484_v43  ;;  %v8557_v43 = vld [vmem:[#allocation8 + $0xf8] ss:$24 sps:$4 sm:$0xff]   ;;  %v8577_v46 = vld [vmem:[#allocation8 + $0x18c] ss:$24 sps:$4 sm:$0xff]  }
 0x1e8   : > { %4615 = vmatpush1.bf16.msra.mxu1 %v8536_v51 }
 0x1e9   : > { %3067 = vmatpush1.bf16.msra.mxu0 %v8482_v50  ;;  %4616 = vmatprep.subr.bf16.mxu1 %v8544_v55 }
 0x1ea   : > { %3068 = vmatprep.subr.bf16.mxu0 %v8487_v54  ;;  %v8563_v54 = vld [vmem:[#allocation8 + $0x128] ss:$24 sps:$4 sm:$0xff]  }
 0x1ec   : > { %4617 = vmatpush1.bf16.msra.mxu1 %v8542_v58 }
 0x1ed   : > { %3069 = vmatpush1.bf16.msra.mxu0 %v8485_v56  ;;  %4618 = vmatprep.subr.bf16.mxu1 %v8550_v59  ;;  %v8571_v59 = vld [vmem:[#allocation8 + $0x15c] ss:$24 sps:$4 sm:$0xff]  }
 0x1ee   : > { %3070 = vmatprep.subr.bf16.mxu0 %v8490_v57 }
 0x1f0   : > { %4619 = vmatpush1.bf16.msra.mxu1 %v8548_v62  ;;  %v8575_v62 = vld [vmem:[#allocation8 + $0x188] ss:$24 sps:$4 sm:$0xff]  }
 0x1f1   : > { %3071 = vmatpush1.bf16.msra.mxu0 %v8488_v60  ;;  %4620 = vmatprep.subr.bf16.mxu1 %v8556_v63  ;;  %v8581_v63 = vld [vmem:[#allocation8 + $0x1b8] ss:$24 sps:$4 sm:$0xff]  }
 0x1f2   : > { %3072 = vmatprep.subr.bf16.mxu0 %v8493_v61  ;;  %v8569_v61 = vld [vmem:[#allocation8 + $0x158] ss:$24 sps:$4 sm:$0xff]  }
 0x1f4   : > { %4621 = vmatpush1.bf16.msra.mxu1 %v8554_v2 }
 0x1f5   : > { %3073 = vmatpush1.bf16.msra.mxu0 %v8491_v0  ;;  %4622 = vmatprep.subr.bf16.mxu1 %v8562_v3 }
 0x1f6   : > { %3074 = vmatprep.subr.bf16.mxu0 %v8496_v1  ;;  %v8589_v1 = vld [vmem:[#allocation8 + $0x1ec] ss:$24 sps:$4 sm:$0xff]  }
 0x1f8   : > { %4623 = vmatpush1.bf16.msra.mxu1 %v8560_v5  ;;  %v8587_v5 = vld [vmem:[#allocation8 + $0x1e8] ss:$24 sps:$4 sm:$0xff]  }
 0x1f9   : > { %3075 = vmatpush1.bf16.msra.mxu0 %v8494_v4  ;;  %4624 = vmatprep.subr.bf16.mxu1 %v8568_v7 }
 0x1fa   : > { %3076 = vmatprep.subr.bf16.mxu0 %v8499_v6 }
 0x1fc   : > { %4625 = vmatpush1.bf16.msra.mxu1 %v8566_v10 }
 0x1fd   : > { %3077 = vmatpush1.bf16.msra.mxu0 %v8497_v9  ;;  %4626 = vmatprep.subr.bf16.mxu1 %v8574_v13  ;;  %v8595_v9 = vld [vmem:[#allocation8 + $0x21c] ss:$24 sps:$4 sm:$0xff]  }
 0x1fe   : > { %3078 = vmatprep.subr.bf16.mxu0 %v8505_v12  ;;  %v8593_v12 = vld [vmem:[#allocation8 + $0x218] ss:$24 sps:$4 sm:$0xff]  }
 0x200   : > { %4627 = vmatpush1.bf16.msra.mxu1 %v8572_v15 }
 0x201   : > { %3079 = vmatpush1.bf16.msra.mxu0 %v8503_v14  ;;  %4628 = vmatprep.subr.bf16.mxu1 %v8580_v18  ;;  %v8598_v14 = vld [vmem:[#allocation8 + $0x24c] ss:$24 sps:$4 sm:$0xff]  }
 0x202   : > { %3080 = vmatprep.subr.bf16.mxu0 %v8511_v16  ;;  %v8608_v16 = vld [vmem:[#allocation8 + $0x300] ss:$24 sps:$4 sm:$0xff]  }
 0x204   : > { %4629 = vmatpush1.bf16.msra.mxu1 %v8578_v20  ;;  %v8596_v20 = vld [vmem:[#allocation8 + $0x248] ss:$24 sps:$4 sm:$0xff]  }
 0x205   : > { %3081 = vmatpush1.bf16.msra.mxu0 %v8509_v19  ;;  %4630 = vmatprep.subr.bf16.mxu1 %v8586_v22  ;;  %v8616_v19 = vld [vmem:[#allocation8 + $0x334] ss:$24 sps:$4 sm:$0xff]   ;;  %v8614_v22 = vld [vmem:[#allocation8 + $0x330] ss:$24 sps:$4 sm:$0xff]  }
 0x206   : > { %3082 = vmatprep.subr.bf16.mxu0 %v8517_v21  ;;  %v8601_v21 = vld [vmem:[#allocation8 + $0x27c] ss:$24 sps:$4 sm:$0xff]  }
 0x208   : > { %4631 = vmatpush1.bf16.msra.mxu1 %v8584_v24  ;;  %v8599_v24 = vld [vmem:[#allocation8 + $0x278] ss:$24 sps:$4 sm:$0xff]  }
 0x209   : > { %3083 = vmatpush1.bf16.msra.mxu0 %v8515_v23  ;;  %4632 = vmatprep.subr.bf16.mxu1 %v8592_v26  ;;  %v8622_v23 = vld [vmem:[#allocation8 + $0x364] ss:$24 sps:$4 sm:$0xff]   ;;  %v8620_v26 = vld [vmem:[#allocation8 + $0x360] ss:$24 sps:$4 sm:$0xff]  }
 0x20a   : > { %3084 = vmatprep.subr.bf16.mxu0 %v8523_v25  ;;  %v8604_v25 = vld [vmem:[#allocation8 + $0x2ac] ss:$24 sps:$4 sm:$0xff]  }
 0x20c   : > { %4633 = vmatpush1.bf16.msra.mxu1 %v8590_v28  ;;  %v8602_v28 = vld [vmem:[#allocation8 + $0x2a8] ss:$24 sps:$4 sm:$0xff]  }
 0x20d   : > { %3085 = vmatpush1.bf16.msra.mxu0 %v8521_v27  ;;  %4643 = vmatprep.subr.bf16.mxu1 %v8610_v30  ;;  %v8628_v27 = vld [vmem:[#allocation8 + $0x394] ss:$24 sps:$4 sm:$0xff]   ;;  %v8626_v30 = vld [vmem:[#allocation8 + $0x390] ss:$24 sps:$4 sm:$0xff]  }
 0x20e   : > { %4725 = vmatprep.subr.bf16.mxu0 %v8529_v29  ;;  %v8607_v29 = vld [vmem:[#allocation8 + $0x2dc] ss:$24 sps:$4 sm:$0xff]  }
 0x210   : > { %3087 = vmatmul.mubr.bf16.vlgmr.msra.gmra.mrb[4].mxu0 %v10030_v17  ;;  %v10056_v17 = vsub.s32 1, %v10048_v11 }
 0x211   : > { %4726 = vmatpush1.bf16.msra.mxu0 %v8527_v31  ;;  %v8634_v31 = vld [vmem:[#allocation8 + $0x3c4] ss:$24 sps:$4 sm:$0xff]  }
 0x212   : > { %4727 = vmatprep.subr.bf16.mxu0 %v8535_v32  ;;  %v1263_v42 = vrot.slane %v10050_v52, %v10056_v17  ;;  %v8605_v32 = vld [vmem:[#allocation8 + $0x2d8] ss:$24 sps:$4 sm:$0xff]  }
 0x214   : > { %v2763_v49 = vadd.f32 %v10045_v47, %v1263_v42  ;;  %v8583_v47 = vld [vmem:[#allocation8 + $0x1bc] ss:$24 sps:$4 sm:$0xff]  }
 0x215   : > { %4728 = vmatpush1.bf16.msra.mxu0 %v8533_v33  ;;  %v8613_v33 = vld [vmem:[#allocation8 + $0x30c] ss:$24 sps:$4 sm:$0xff]  }
 0x216   : > { %4729 = vmatprep.subr.bf16.mxu0 %v8541_v8  ;;  %v8632_v8 = vld [vmem:[#allocation8 + $0x3c0] ss:$24 sps:$4 sm:$0xff]   ;;  %v8652_v42 = vld [vmem:[#allocation8 + $0x454] ss:$24 sps:$4 sm:$0xff]  }
 0x219   : > { %4730 = vmatpush1.bf16.msra.mxu0 %v8539_v48  ;;  %v8611_v48 = vld [vmem:[#allocation8 + $0x308] ss:$24 sps:$4 sm:$0xff]  }
 0x21a   : > { %4731 = vmatprep.subr.bf16.mxu0 %v8547_v36  ;;  %v8619_v36 = vld [vmem:[#allocation8 + $0x33c] ss:$24 sps:$4 sm:$0xff]  }
 0x21d   : > { %4732 = vmatpush1.bf16.msra.mxu0 %v8545_v37  ;;  %v8638_v37 = vld [vmem:[#allocation8 + $0x3f0] ss:$24 sps:$4 sm:$0xff]  }
 0x21e   : > { %4733 = vmatprep.subr.bf16.mxu0 %v8553_v38  ;;  %v8646_v38 = vld [vmem:[#allocation8 + $0x424] ss:$24 sps:$4 sm:$0xff]  }
 0x221   : > { %4734 = vmatpush1.bf16.msra.mxu0 %v8551_v40  ;;  %v8617_v40 = vld [vmem:[#allocation8 + $0x338] ss:$24 sps:$4 sm:$0xff]  }
 0x222   : > { %4735 = vmatprep.subr.bf16.mxu0 %v8559_v35  ;;  %v8625_v35 = vld [vmem:[#allocation8 + $0x36c] ss:$24 sps:$4 sm:$0xff]  }
 0x223   : > { %v2842_v50 = vpop.f32.mrb[0].mxu0 }
 0x224   : > { %v7880_v51 = vadd.f32 %v2842_v50, %v2761_v44  ;;  %v2844_v53 = vpop.f32.mrb[1].mxu0  ;;  %v8631_v44 = vld [vmem:[#allocation8 + $0x39c] ss:$24 sps:$4 sm:$0xff]   ;;  %v8629_v50 = vld [vmem:[#allocation8 + $0x398] ss:$24 sps:$4 sm:$0xff]  }
 0x225   : > { %v7882_v55 = vadd.f32 %v2844_v53, %v2763_v49  ;;  %v2846_v56 = vpop.f32.mrb[2].mxu0  ;;  %4736 = vmatpush1.bf16.msra.mxu0 %v8557_v43  ;;  %v8623_v43 = vld [vmem:[#allocation8 + $0x368] ss:$24 sps:$4 sm:$0xff]   ;;  %v8658_v49 = vld [vmem:[#allocation8 + $0x484] ss:$24 sps:$4 sm:$0xff]  }
 0x226   : > { %v3095_v57 = vmul.f32 0.851, %v7880_v51  ;;  %v2847_v58 = vpop.f32.mrb[3].mxu0  ;;  %4737 = vmatprep.subr.bf16.mxu0 %v8565_v45  ;;  %v8650_v45 = vld [vmem:[#allocation8 + $0x450] ss:$24 sps:$4 sm:$0xff]  }
 0x227   : > { %v3096_v60 = vmul.f32 0.851, %v7882_v55  ;;  %v8656_v53 = vld [vmem:[#allocation8 + $0x480] ss:$24 sps:$4 sm:$0xff]   ;;  %v8643_v56 = vld [vmem:[#allocation8 + $0x3fc] ss:$24 sps:$4 sm:$0xff]  }
 0x228   : > { %9376 = vtanh.f32 %v3095_v57  ;;  %v8662_v57 = vld [vmem:[#allocation8 + $0x4b0] ss:$24 sps:$4 sm:$0xff]   ;;  %v8670_v58 = vld [vmem:[#allocation8 + $0x4e4] ss:$24 sps:$4 sm:$0xff]  }
 0x229   : > { %9378 = vtanh.f32 %v3096_v60  ;;  %4738 = vmatpush1.bf16.msra.mxu0 %v8563_v54  ;;  %v8664_v54 = vld [vmem:[#allocation8 + $0x4b4] ss:$24 sps:$4 sm:$0xff]  }
 0x22a   : > { %4739 = vmatprep.subr.bf16.mxu0 %v8571_v59  ;;  %v8641_v59 = vld [vmem:[#allocation8 + $0x3f8] ss:$24 sps:$4 sm:$0xff]   ;;  %v8649_v60 = vld [vmem:[#allocation8 + $0x42c] ss:$24 sps:$4 sm:$0xff]  }
 0x22d   : > { %4740 = vmatpush1.bf16.msra.mxu0 %v8569_v61  ;;  %v8668_v61 = vld [vmem:[#allocation8 + $0x4e0] ss:$24 sps:$4 sm:$0xff]  }
 0x22e   : > { %4741 = vmatprep.subr.bf16.mxu0 %v8577_v46  ;;  %v8676_v46 = vld [vmem:[#allocation8 + $0x514] ss:$24 sps:$4 sm:$0xff]  }
 0x231   : > { %4742 = vmatpush1.bf16.msra.mxu0 %v8575_v62  ;;  %v8647_v62 = vld [vmem:[#allocation8 + $0x428] ss:$24 sps:$4 sm:$0xff]  }
 0x232   : > { %v9377_v0 = vpop.eup %9376  ;;  %4743 = vmatprep.subr.bf16.mxu0 %v8583_v47  ;;  %v8655_v47 = vld [vmem:[#allocation8 + $0x45c] ss:$24 sps:$4 sm:$0xff]  }
 0x233   : > { %v9379_v2 = vpop.eup %9378  ;;  %v3107_v3 = vadd.f32 1.0, %v9377_v0  ;;  %v8682_v0 = vld [vmem:[#allocation8 + $0x544] ss:$24 sps:$4 sm:$0xff]  }
 0x234   : > { %v3108_v4 = vadd.f32 1.0, %v9379_v2  ;;  %v8661_v2 = vld [vmem:[#allocation8 + $0x48c] ss:$24 sps:$4 sm:$0xff]  }
 0x235   : > { %v3113_v6 = vmul.f32 0.5, %v3107_v3  ;;  %4744 = vmatpush1.bf16.msra.mxu0 %v8581_v63  ;;  %v8674_v63 = vld [vmem:[#allocation8 + $0x510] ss:$24 sps:$4 sm:$0xff]   ;;  %v8680_v3 = vld [vmem:[#allocation8 + $0x540] ss:$24 sps:$4 sm:$0xff]  }
 0x236   : > { %v3114_v7 = vmul.f32 0.5, %v3108_v4  ;;  %4745 = vmatprep.subr.bf16.mxu0 %v8589_v1  ;;  %v8653_v1 = vld [vmem:[#allocation8 + $0x458] ss:$24 sps:$4 sm:$0xff]   ;;  %v8688_v4 = vld [vmem:[#allocation8 + $0x574] ss:$24 sps:$4 sm:$0xff]  }
 0x237   : > { %v3119_v10 = vmul.f32 %v7880_v51, %v3113_v6  ;;  %v8637_v51 = vld [vmem:[#allocation8 + $0x3cc] ss:$24 sps:$4 sm:$0xff]   ;;  %v8667_v6 = vld [vmem:[#allocation8 + $0x4bc] ss:$24 sps:$4 sm:$0xff]  }
 0x238   : > { %v3120_v13 = vmul.f32 %v7882_v55, %v3114_v7  ;;  %v8635_v55 = vld [vmem:[#allocation8 + $0x3c8] ss:$24 sps:$4 sm:$0xff]  }
 0x239   : > { %4746 = vmatpush1.bf16.msra.mxu0 %v8587_v5  ;;  %v10066_v18 = vpack.c.bf16 %v3119_v10, %v3119_v10  ;;  %v8659_v5 = vld [vmem:[#allocation8 + $0x488] ss:$24 sps:$4 sm:$0xff]   ;;  %v8665_v10 = vld [vmem:[#allocation8 + $0x4b8] ss:$24 sps:$4 sm:$0xff]  }
 0x23a   : > { %v10064_v15 = vpack.c.bf16 %v3120_v13, %v3120_v13  ;;  %4747 = vmatprep.subr.bf16.mxu0 %v8595_v9  ;;  %v8686_v7 = vld [vmem:[#allocation8 + $0x570] ss:$24 sps:$4 sm:$0xff]   ;;  %v8694_v9 = vld [vmem:[#allocation8 + $0x5a4] ss:$24 sps:$4 sm:$0xff]   ;;  %v8692_v13 = vld [vmem:[#allocation8 + $0x5a0] ss:$24 sps:$4 sm:$0xff]  }
 0x23c   : > { %4634 = vmatprep.mubr.bf16.mxu1 %v10064_v15  ;;  %4757 = vmatprep.mubr.bf16.mxu0 %v10064_v15 }
 0x23d   : > { %4635 = vmatmul.mubr.bf16.vlgmr.msra.gmra.mrb[8].mxu1 %v10066_v18  ;;  %4748 = vmatpush1.bf16.msra.mxu0 %v8593_v12  ;;  %v8673_v12 = vld [vmem:[#allocation8 + $0x4ec] ss:$24 sps:$4 sm:$0xff]  }
 0x23e   : > { %4749 = vmatprep.subr.bf16.mxu0 %v8598_v14  ;;  %4644 = vmatpush1.bf16.msra.mxu1 %v8608_v16  ;;  %v8700_v14 = vld [vmem:[#allocation8 + $0x5d4] ss:$24 sps:$4 sm:$0xff]   ;;  %v8671_v16 = vld [vmem:[#allocation8 + $0x4e8] ss:$24 sps:$4 sm:$0xff]  }
 0x23f   : > { %4645 = vmatprep.subr.bf16.mxu1 %v8616_v19  ;;  %v8679_v19 = vld [vmem:[#allocation8 + $0x51c] ss:$24 sps:$4 sm:$0xff]  }
 0x241   : > { %4750 = vmatpush1.bf16.msra.mxu0 %v8596_v20  ;;  %v8698_v20 = vld [vmem:[#allocation8 + $0x5d0] ss:$24 sps:$4 sm:$0xff]  }
 0x242   : > { %4751 = vmatprep.subr.bf16.mxu0 %v8601_v21  ;;  %4646 = vmatpush1.bf16.msra.mxu1 %v8614_v22  ;;  %v8706_v21 = vld [vmem:[#allocation8 + $0x604] ss:$24 sps:$4 sm:$0xff]   ;;  %v8677_v22 = vld [vmem:[#allocation8 + $0x518] ss:$24 sps:$4 sm:$0xff]  }
 0x243   : > { %4647 = vmatprep.subr.bf16.mxu1 %v8622_v23  ;;  %v8685_v23 = vld [vmem:[#allocation8 + $0x54c] ss:$24 sps:$4 sm:$0xff]  }
 0x245   : > { %4752 = vmatpush1.bf16.msra.mxu0 %v8599_v24  ;;  %v8683_v24 = vld [vmem:[#allocation8 + $0x548] ss:$24 sps:$4 sm:$0xff]  }
 0x246   : > { %4753 = vmatprep.subr.bf16.mxu0 %v8604_v25  ;;  %4648 = vmatpush1.bf16.msra.mxu1 %v8620_v26  ;;  %v8691_v25 = vld [vmem:[#allocation8 + $0x57c] ss:$24 sps:$4 sm:$0xff]   ;;  %v8689_v26 = vld [vmem:[#allocation8 + $0x578] ss:$24 sps:$4 sm:$0xff]  }
 0x247   : > { %4649 = vmatprep.subr.bf16.mxu1 %v8628_v27  ;;  %v8697_v27 = vld [vmem:[#allocation8 + $0x5ac] ss:$24 sps:$4 sm:$0xff]  }
 0x249   : > { %4754 = vmatpush1.bf16.msra.mxu0 %v8602_v28  ;;  %v8695_v28 = vld [vmem:[#allocation8 + $0x5a8] ss:$24 sps:$4 sm:$0xff]  }
 0x24a   : > { %4755 = vmatprep.subr.bf16.mxu0 %v8607_v29  ;;  %4650 = vmatpush1.bf16.msra.mxu1 %v8626_v30  ;;  %v8703_v29 = vld [vmem:[#allocation8 + $0x5dc] ss:$24 sps:$4 sm:$0xff]   ;;  %v8701_v30 = vld [vmem:[#allocation8 + $0x5d8] ss:$24 sps:$4 sm:$0xff]  }
 0x24b   : > { %4651 = vmatprep.subr.bf16.mxu1 %v8634_v31  ;;  %v8709_v31 = vld [vmem:[#allocation8 + $0x60c] ss:$24 sps:$4 sm:$0xff]  }
 0x24d   : > { %4756 = vmatpush1.bf16.msra.mxu0 %v8605_v32  ;;  %v10073_v32 = vsub.s32 2, %v10048_v11 }
 0x24e   : > { %4766 = vmatprep.subr.bf16.mxu0 %v8613_v33  ;;  %4652 = vmatpush1.bf16.msra.mxu1 %v8632_v8  ;;  %v10076_v33 = vsub.s32 3, %v10048_v11 }
 0x24f   : > { %4653 = vmatprep.subr.bf16.mxu1 %v8640_v34  ;;  %v1267_v8 = vrot.slane %v10050_v52, %v10073_v32 }
 0x250   : > { %4758 = vmatmul.mubr.bf16.vlgmr.msra.gmra.mrb[8].mxu0 %v10066_v18  ;;  %v1271_v34 = vrot.slane %v10050_v52, %v10076_v33  ;;  %v8704_v52 = vld [vmem:[#allocation8 + $0x600] ss:$24 sps:$4 sm:$0xff]  }
 0x251   : > { %4767 = vmatpush1.bf16.msra.mxu0 %v8611_v48 }
 0x252   : > { %4768 = vmatprep.subr.bf16.mxu0 %v8619_v36  ;;  %4654 = vmatpush1.bf16.msra.mxu1 %v8638_v37 }
 0x253   : > { %4655 = vmatprep.subr.bf16.mxu1 %v8646_v38 }
 0x255   : > { %4769 = vmatpush1.bf16.msra.mxu0 %v8617_v40 }
 0x256   : > { %4770 = vmatprep.subr.bf16.mxu0 %v8625_v35  ;;  %4656 = vmatpush1.bf16.msra.mxu1 %v8644_v41 }
 0x257   : > { %4657 = vmatprep.subr.bf16.mxu1 %v8652_v42 }
 0x259   : > { %4771 = vmatpush1.bf16.msra.mxu0 %v8623_v43 }
 0x25a   : > { %4772 = vmatprep.subr.bf16.mxu0 %v8631_v44  ;;  %4658 = vmatpush1.bf16.msra.mxu1 %v8650_v45 }
 0x25b   : > { %4659 = vmatprep.subr.bf16.mxu1 %v8658_v49 }
 0x25d   : > { %4773 = vmatpush1.bf16.msra.mxu0 %v8629_v50 }
 0x25e   : > { %4774 = vmatprep.subr.bf16.mxu0 %v8637_v51  ;;  %4660 = vmatpush1.bf16.msra.mxu1 %v8656_v53 }
 0x25f   : > { %4661 = vmatprep.subr.bf16.mxu1 %v8664_v54 }
 0x261   : > { %4775 = vmatpush1.bf16.msra.mxu0 %v8635_v55 }
 0x262   : > { %4776 = vmatprep.subr.bf16.mxu0 %v8643_v56  ;;  %4662 = vmatpush1.bf16.msra.mxu1 %v8662_v57  ;;  %v8707_v56 = vld [vmem:[#allocation8 + $0x608] ss:$24 sps:$4 sm:$0xff]  }
 0x263   : > { %4663 = vmatprep.subr.bf16.mxu1 %v8670_v58  ;;  %v8712_v58 = vld [vmem:[#allocation8 + $0x634] ss:$24 sps:$4 sm:$0xff]  }
 0x265   : > { %4777 = vmatpush1.bf16.msra.mxu0 %v8641_v59  ;;  %v8715_v59 = vld [vmem:[#allocation8 + $0x63c] ss:$24 sps:$4 sm:$0xff]  }
 0x266   : > { %4778 = vmatprep.subr.bf16.mxu0 %v8649_v60  ;;  %4664 = vmatpush1.bf16.msra.mxu1 %v8668_v61  ;;  %v8710_v60 = vld [vmem:[#allocation8 + $0x630] ss:$24 sps:$4 sm:$0xff]  }
 0x267   : > { %4665 = vmatprep.subr.bf16.mxu1 %v8676_v46  ;;  %v8713_v61 = vld [vmem:[#allocation8 + $0x638] ss:$24 sps:$4 sm:$0xff]   ;;  %v8718_v46 = vld [vmem:[#allocation8 + $0x664] ss:$24 sps:$4 sm:$0xff]  }
 0x269   : > { %4779 = vmatpush1.bf16.msra.mxu0 %v8647_v62  ;;  %v8721_v62 = vld [vmem:[#allocation8 + $0x66c] ss:$24 sps:$4 sm:$0xff]  }
 0x26a   : > { %4780 = vmatprep.subr.bf16.mxu0 %v8655_v47  ;;  %4666 = vmatpush1.bf16.msra.mxu1 %v8674_v63  ;;  %v8716_v47 = vld [vmem:[#allocation8 + $0x660] ss:$24 sps:$4 sm:$0xff]  }
 0x26b   : > { %4667 = vmatprep.subr.bf16.mxu1 %v8682_v0  ;;  %v8719_v63 = vld [vmem:[#allocation8 + $0x668] ss:$24 sps:$4 sm:$0xff]   ;;  %v8724_v0 = vld [vmem:[#allocation8 + $0x694] ss:$24 sps:$4 sm:$0xff]  }
 0x26d   : > { %4781 = vmatpush1.bf16.msra.mxu0 %v8653_v1  ;;  %v8727_v1 = vld [vmem:[#allocation8 + $0x69c] ss:$24 sps:$4 sm:$0xff]  }
 0x26e   : > { %4782 = vmatprep.subr.bf16.mxu0 %v8661_v2  ;;  %4668 = vmatpush1.bf16.msra.mxu1 %v8680_v3  ;;  %v8722_v2 = vld [vmem:[#allocation8 + $0x690] ss:$24 sps:$4 sm:$0xff]  }
 0x26f   : > { %4669 = vmatprep.subr.bf16.mxu1 %v8688_v4  ;;  %v8725_v3 = vld [vmem:[#allocation8 + $0x698] ss:$24 sps:$4 sm:$0xff]   ;;  %v8730_v4 = vld [vmem:[#allocation8 + $0x6c4] ss:$24 sps:$4 sm:$0xff]  }
 0x271   : > { %4783 = vmatpush1.bf16.msra.mxu0 %v8659_v5  ;;  %v8733_v5 = vld [vmem:[#allocation8 + $0x6cc] ss:$24 sps:$4 sm:$0xff]  }
 0x272   : > { %4784 = vmatprep.subr.bf16.mxu0 %v8667_v6  ;;  %4670 = vmatpush1.bf16.msra.mxu1 %v8686_v7  ;;  %v8728_v6 = vld [vmem:[#allocation8 + $0x6c0] ss:$24 sps:$4 sm:$0xff]  }
 0x273   : > { %4671 = vmatprep.subr.bf16.mxu1 %v8694_v9  ;;  %v8731_v7 = vld [vmem:[#allocation8 + $0x6c8] ss:$24 sps:$4 sm:$0xff]   ;;  %v8736_v9 = vld [vmem:[#allocation8 + $0x6f4] ss:$24 sps:$4 sm:$0xff]  }
 0x275   : > { %4785 = vmatpush1.bf16.msra.mxu0 %v8665_v10  ;;  %v8739_v10 = vld [vmem:[#allocation8 + $0x6fc] ss:$24 sps:$4 sm:$0xff]  }
 0x276   : > { %4786 = vmatprep.subr.bf16.mxu0 %v8673_v12  ;;  %4672 = vmatpush1.bf16.msra.mxu1 %v8692_v13  ;;  %v8734_v12 = vld [vmem:[#allocation8 + $0x6f0] ss:$24 sps:$4 sm:$0xff]  }
 0x277   : > { %4673 = vmatprep.subr.bf16.mxu1 %v8700_v14  ;;  %v8737_v13 = vld [vmem:[#allocation8 + $0x6f8] ss:$24 sps:$4 sm:$0xff]   ;;  %v8742_v14 = vld [vmem:[#allocation8 + $0x724] ss:$24 sps:$4 sm:$0xff]  }
 0x279   : > { %4787 = vmatpush1.bf16.msra.mxu0 %v8671_v16  ;;  %v8745_v16 = vld [vmem:[#allocation8 + $0x72c] ss:$24 sps:$4 sm:$0xff]  }
 0x27a   : > { %4788 = vmatprep.subr.bf16.mxu0 %v8679_v19  ;;  %4674 = vmatpush1.bf16.msra.mxu1 %v8698_v20  ;;  %v8740_v19 = vld [vmem:[#allocation8 + $0x720] ss:$24 sps:$4 sm:$0xff]  }
 0x27b   : > { %4684 = vmatprep.subr.bf16.mxu1 %v8706_v21  ;;  %v8743_v20 = vld [vmem:[#allocation8 + $0x728] ss:$24 sps:$4 sm:$0xff]   ;;  %v8748_v21 = vld [vmem:[#allocation8 + $0x754] ss:$24 sps:$4 sm:$0xff]  }
 0x27d   : > { %4789 = vmatpush1.bf16.msra.mxu0 %v8677_v22  ;;  %v8751_v22 = vld [vmem:[#allocation8 + $0x75c] ss:$24 sps:$4 sm:$0xff]  }
 0x27e   : > { %4790 = vmatprep.subr.bf16.mxu0 %v8685_v23  ;;  %v8746_v23 = vld [vmem:[#allocation8 + $0x750] ss:$24 sps:$4 sm:$0xff]  }
 0x281   : > { %4791 = vmatpush1.bf16.msra.mxu0 %v8683_v24  ;;  %v8749_v24 = vld [vmem:[#allocation8 + $0x758] ss:$24 sps:$4 sm:$0xff]  }
 0x282   : > { %4792 = vmatprep.subr.bf16.mxu0 %v8691_v25  ;;  %v8754_v25 = vld [vmem:[#allocation8 + $0x784] ss:$24 sps:$4 sm:$0xff]  }
 0x285   : > { %4793 = vmatpush1.bf16.msra.mxu0 %v8689_v26  ;;  %v8757_v26 = vld [vmem:[#allocation8 + $0x78c] ss:$24 sps:$4 sm:$0xff]  }
 0x286   : > { %4794 = vmatprep.subr.bf16.mxu0 %v8697_v27  ;;  %v8752_v27 = vld [vmem:[#allocation8 + $0x780] ss:$24 sps:$4 sm:$0xff]  }
 0x289   : > { %4795 = vmatpush1.bf16.msra.mxu0 %v8695_v28  ;;  %v8755_v28 = vld [vmem:[#allocation8 + $0x788] ss:$24 sps:$4 sm:$0xff]  }
 0x28a   : > { %4796 = vmatprep.subr.bf16.mxu0 %v8703_v29  ;;  %v8760_v29 = vld [vmem:[#allocation8 + $0x7b4] ss:$24 sps:$4 sm:$0xff]  }
 0x28d   : > { %4797 = vmatpush1.bf16.msra.mxu0 %v8701_v30  ;;  %v8763_v30 = vld [vmem:[#allocation8 + $0x7bc] ss:$24 sps:$4 sm:$0xff]  }
 0x28e   : > { %4807 = vmatprep.subr.bf16.mxu0 %v8709_v31  ;;  %v10091_v31 = vsub.s32 4, %v10048_v11 }
 0x2a2   : > { %v2965_v48 = vpop.f32.mrb[4].mxu1 }
 0x2a3   : > { %v7883_v36 = vadd.f32 %v2965_v48, %v1267_v8  ;;  %v2967_v37 = vpop.f32.mrb[5].mxu1  ;;  %v10094_v8 = vsub.s32 5, %v10048_v11  ;;  %v8761_v48 = vld [vmem:[#allocation8 + $0x7b8] ss:$24 sps:$4 sm:$0xff]   ;;  %v8772_v11 = vld [vmem:[#allocation8 + $0x814] ss:$24 sps:$4 sm:$0xff]  }
 0x2a4   : > { %v7884_v38 = vadd.f32 %v2967_v37, %v1271_v34  ;;  %v2969_v40 = vpop.f32.mrb[6].mxu1  ;;  %v8758_v34 = vld [vmem:[#allocation8 + $0x7b0] ss:$24 sps:$4 sm:$0xff]   ;;  %v8769_v37 = vld [vmem:[#allocation8 + $0x7ec] ss:$24 sps:$4 sm:$0xff]  }
 0x2a5   : > { %v3097_v35 = vmul.f32 0.851, %v7883_v36  ;;  %v2970_v41 = vpop.f32.mrb[7].mxu1 }
 0x2a6   : > { %v3098_v42 = vmul.f32 0.851, %v7884_v38  ;;  %v8764_v41 = vld [vmem:[#allocation8 + $0x7e0] ss:$24 sps:$4 sm:$0xff]  }
 0x2a7   : > { %9380 = vtanh.f32 %v3097_v35 }
 0x2a8   : > { %9382 = vtanh.f32 %v3098_v42  ;;  %v8767_v42 = vld [vmem:[#allocation8 + $0x7e8] ss:$24 sps:$4 sm:$0xff]  }
 0x2b1   : > { %v9381_v43 = vpop.eup %9380 }
 0x2b2   : > { %v9383_v44 = vpop.eup %9382  ;;  %v3109_v45 = vadd.f32 1.0, %v9381_v43 }
 0x2b3   : > { %v3110_v49 = vadd.f32 1.0, %v9383_v44  ;;  %v8775_v44 = vld [vmem:[#allocation8 + $0x81c] ss:$24 sps:$4 sm:$0xff]  }
 0x2b4   : > { %v3115_v50 = vmul.f32 0.5, %v3109_v45 }
 0x2b5   : > { %v3116_v51 = vmul.f32 0.5, %v3110_v49 }
 0x2b6   : > { %v3121_v53 = vmul.f32 %v7883_v36, %v3115_v50  ;;  %v8766_v36 = vld [vmem:[#allocation8 + $0x7e4] ss:$24 sps:$4 sm:$0xff]  }
 0x2b7   : > { %v3122_v54 = vmul.f32 %v7884_v38, %v3116_v51  ;;  %v9400_v38 = vld [vmem:[#allocation7] sm:$0x3f] }
 0x2b8   : > { %v10084_v57 = vpack.c.bf16 %v3121_v53, %v3121_v53  ;;  %v1275_v40 = vrot.slane %v9400_v38, %v10091_v31  ;;  %v1279_v35 = vrot.slane %v9400_v38, %v10094_v8  ;;  %v8770_v53 = vld [vmem:[#allocation8 + $0x810] ss:$24 sps:$4 sm:$0xff]   ;;  %v8815_v38 = vld [vmem:[#allocation8 + $0x100] ss:$24 sps:$4 sm:$0xff]  }
 0x2b9   : > { %v10082_v55 = vpack.c.bf16 %v3122_v54, %v3122_v54 }
 0x2bb   : > { %4675 = vmatprep.mubr.bf16.mxu1 %v10082_v55  ;;  %4798 = vmatprep.mubr.bf16.mxu0 %v10082_v55 }
 0x2bc   : > { %4676 = vmatmul.mubr.bf16.vlgmr.msra.gmra.mrb[8].mxu1 %v10084_v57  ;;  %4799 = vmatmul.mubr.bf16.vlgmr.msra.gmra.mrb[8].mxu0 %v10084_v57 }
 0x2bd   : > { %4685 = vmatpush1.bf16.msra.mxu1 %v8704_v52  ;;  %4808 = vmatpush1.bf16.msra.mxu0 %v8707_v56  ;;  %v8773_v56 = vld [vmem:[#allocation8 + $0x818] ss:$24 sps:$4 sm:$0xff]  }
 0x2be   : > { %4686 = vmatprep.subr.bf16.mxu1 %v8712_v58  ;;  %4809 = vmatprep.subr.bf16.mxu0 %v8715_v59  ;;  %v8778_v59 = vld [vmem:[#allocation8 + $0x844] ss:$24 sps:$4 sm:$0xff]  }
 0x2c1   : > { %4687 = vmatpush1.bf16.msra.mxu1 %v8710_v60  ;;  %4810 = vmatpush1.bf16.msra.mxu0 %v8713_v61  ;;  %v8781_v60 = vld [vmem:[#allocation8 + $0x84c] ss:$24 sps:$4 sm:$0xff]   ;;  %v8776_v61 = vld [vmem:[#allocation8 + $0x840] ss:$24 sps:$4 sm:$0xff]  }
 0x2c2   : > { %4688 = vmatprep.subr.bf16.mxu1 %v8718_v46  ;;  %4811 = vmatprep.subr.bf16.mxu0 %v8721_v62  ;;  %v8779_v46 = vld [vmem:[#allocation8 + $0x848] ss:$24 sps:$4 sm:$0xff]   ;;  %v8784_v62 = vld [vmem:[#allocation8 + $0x874] ss:$24 sps:$4 sm:$0xff]  }
 0x2c5   : > { %4689 = vmatpush1.bf16.msra.mxu1 %v8716_v47  ;;  %4812 = vmatpush1.bf16.msra.mxu0 %v8719_v63  ;;  %v8787_v47 = vld [vmem:[#allocation8 + $0x87c] ss:$24 sps:$4 sm:$0xff]   ;;  %v8782_v63 = vld [vmem:[#allocation8 + $0x870] ss:$24 sps:$4 sm:$0xff]  }
 0x2c6   : > { %4690 = vmatprep.subr.bf16.mxu1 %v8724_v0  ;;  %4813 = vmatprep.subr.bf16.mxu0 %v8727_v1  ;;  %v8785_v0 = vld [vmem:[#allocation8 + $0x878] ss:$24 sps:$4 sm:$0xff]   ;;  %v8790_v1 = vld [vmem:[#allocation8 + $0x8a4] ss:$24 sps:$4 sm:$0xff]  }
 0x2c9   : > { %4691 = vmatpush1.bf16.msra.mxu1 %v8722_v2  ;;  %4814 = vmatpush1.bf16.msra.mxu0 %v8725_v3  ;;  %v8793_v2 = vld [vmem:[#allocation8 + $0x8ac] ss:$24 sps:$4 sm:$0xff]  }
 0x2ca   : > { %4692 = vmatprep.subr.bf16.mxu1 %v8730_v4  ;;  %4815 = vmatprep.subr.bf16.mxu0 %v8733_v5  ;;  %v8788_v4 = vld [vmem:[#allocation8 + $0x8a0] ss:$24 sps:$4 sm:$0xff]  }
 0x2cb   : > { %v8791_v5 = vld [vmem:[#allocation8 + $0x8a8] ss:$24 sps:$4 sm:$0xff]  }
 0x2cd   : > { %4693 = vmatpush1.bf16.msra.mxu1 %v8728_v6  ;;  %4816 = vmatpush1.bf16.msra.mxu0 %v8731_v7 }
 0x2ce   : > { %4694 = vmatprep.subr.bf16.mxu1 %v8736_v9  ;;  %4817 = vmatprep.subr.bf16.mxu0 %v8739_v10  ;;  %v8796_v9 = vld [vmem:[#allocation8 + $0x8d4] ss:$24 sps:$4 sm:$0xff]  }
 0x2cf   : > { %v8799_v10 = vld [vmem:[#allocation8 + $0x8dc] ss:$24 sps:$4 sm:$0xff]  }
 0x2d1   : > { %4695 = vmatpush1.bf16.msra.mxu1 %v8734_v12  ;;  %4818 = vmatpush1.bf16.msra.mxu0 %v8737_v13 }
 0x2d2   : > { %4696 = vmatprep.subr.bf16.mxu1 %v8742_v14  ;;  %4819 = vmatprep.subr.bf16.mxu0 %v8745_v16  ;;  %v8794_v16 = vld [vmem:[#allocation8 + $0x8d0] ss:$24 sps:$4 sm:$0xff]  }
 0x2d5   : > { %4697 = vmatpush1.bf16.msra.mxu1 %v8740_v19  ;;  %4820 = vmatpush1.bf16.msra.mxu0 %v8743_v20  ;;  %v8797_v19 = vld [vmem:[#allocation8 + $0x8d8] ss:$24 sps:$4 sm:$0xff]  }
 0x2d6   : > { %4698 = vmatprep.subr.bf16.mxu1 %v8748_v21  ;;  %4821 = vmatprep.subr.bf16.mxu0 %v8751_v22  ;;  %v8802_v21 = vld [vmem:[#allocation8 + $0x14] ss:$24 sps:$4 sm:$0xff]  }
 0x2d9   : > { %4699 = vmatpush1.bf16.msra.mxu1 %v8746_v23  ;;  %4822 = vmatpush1.bf16.msra.mxu0 %v8749_v24  ;;  %v8800_v24 = vld [vmem:[#allocation8 + $0x10] ss:$24 sps:$4 sm:$0xff]  }
 0x2da   : > { %4700 = vmatprep.subr.bf16.mxu1 %v8754_v25  ;;  %4823 = vmatprep.subr.bf16.mxu0 %v8757_v26  ;;  %v8805_v26 = vld [vmem:[#allocation8 + $0x44] ss:$24 sps:$4 sm:$0xff]  }
 0x2dd   : > { %4701 = vmatpush1.bf16.msra.mxu1 %v8752_v27  ;;  %4824 = vmatpush1.bf16.msra.mxu0 %v8755_v28  ;;  %v8803_v27 = vld [vmem:[#allocation8 + $0x40] ss:$24 sps:$4 sm:$0xff]   ;;  %v8808_v28 = vld [vmem:[#allocation8 + $0x74] ss:$24 sps:$4 sm:$0xff]  }
 0x2de   : > { %4702 = vmatprep.subr.bf16.mxu1 %v8760_v29  ;;  %4825 = vmatprep.subr.bf16.mxu0 %v8763_v30  ;;  %v8806_v29 = vld [vmem:[#allocation8 + $0x70] ss:$24 sps:$4 sm:$0xff]   ;;  %v8811_v30 = vld [vmem:[#allocation8 + $0xa4] ss:$24 sps:$4 sm:$0xff]  }
 0x2e1   : > { %4703 = vmatpush1.bf16.msra.mxu1 %v8758_v34  ;;  %4826 = vmatpush1.bf16.msra.mxu0 %v8761_v48  ;;  %v8809_v34 = vld [vmem:[#allocation8 + $0xa0] ss:$24 sps:$4 sm:$0xff]   ;;  %v8814_v48 = vld [vmem:[#allocation8 + $0xd4] ss:$24 sps:$4 sm:$0xff]  }
 0x2e2   : > { %4704 = vmatprep.subr.bf16.mxu1 %v8766_v36  ;;  %4827 = vmatprep.subr.bf16.mxu0 %v8769_v37  ;;  %v8812_v36 = vld [vmem:[#allocation8 + $0xd0] ss:$24 sps:$4 sm:$0xff]   ;;  %v8817_v37 = vld [vmem:[#allocation8 + $0x104] ss:$24 sps:$4 sm:$0xff]  }
 0x2e3   : > { %v3088_v43 = vpop.f32.mrb[4].mxu0 }
 0x2e4   : > { %v7885_v45 = vadd.f32 %v3088_v43, %v1275_v40  ;;  %v3090_v49 = vpop.f32.mrb[5].mxu0  ;;  %v8820_v40 = vld [vmem:[#allocation8 + $0x134] ss:$24 sps:$4 sm:$0xff]   ;;  %v8824_v43 = vld [vmem:[#allocation8 + $0x190] ss:$24 sps:$4 sm:$0xff]  }
 0x2e5   : > { %v7886_v50 = vadd.f32 %v3090_v49, %v1279_v35  ;;  %v3092_v51 = vpop.f32.mrb[6].mxu0  ;;  %4705 = vmatpush1.bf16.msra.mxu1 %v8764_v41  ;;  %4828 = vmatpush1.bf16.msra.mxu0 %v8767_v42  ;;  %v8823_v35 = vld [vmem:[#allocation8 + $0x164] ss:$24 sps:$4 sm:$0xff]   ;;  %v8821_v41 = vld [vmem:[#allocation8 + $0x160] ss:$24 sps:$4 sm:$0xff]  }
 0x2e6   : > { %v3099_v54 = vmul.f32 0.851, %v7885_v45  ;;  %v3093_v52 = vpop.f32.mrb[7].mxu0  ;;  %4706 = vmatprep.subr.bf16.mxu1 %v8772_v11  ;;  %4829 = vmatprep.subr.bf16.mxu0 %v8775_v44  ;;  %v8826_v42 = vld [vmem:[#allocation8 + $0x194] ss:$24 sps:$4 sm:$0xff]  }
 0x2e7   : > { %v3100_v58 = vmul.f32 0.851, %v7886_v50  ;;  %v8829_v11 = vld [vmem:[#allocation8 + $0x1c4] ss:$24 sps:$4 sm:$0xff]   ;;  %v8827_v44 = vld [vmem:[#allocation8 + $0x1c0] ss:$24 sps:$4 sm:$0xff]  }
 0x2e8   : > { %9384 = vtanh.f32 %v3099_v54  ;;  %v8830_v49 = vld [vmem:[#allocation8 + $0x1f0] ss:$24 sps:$4 sm:$0xff]   ;;  %v8833_v51 = vld [vmem:[#allocation8 + $0x220] ss:$24 sps:$4 sm:$0xff]  }
 0x2e9   : > { %9386 = vtanh.f32 %v3100_v58  ;;  %4707 = vmatpush1.bf16.msra.mxu1 %v8770_v53  ;;  %4830 = vmatpush1.bf16.msra.mxu0 %v8773_v56  ;;  %v8838_v53 = vld [vmem:[#allocation8 + $0x254] ss:$24 sps:$4 sm:$0xff]   ;;  %v8932_v52 = vld [vmem:[#allocation11] ss:$24 sps:$4 sm:$0xff]  }
 0x2ea   : > { %4708 = vmatprep.subr.bf16.mxu1 %v8778_v59  ;;  %4831 = vmatprep.subr.bf16.mxu0 %v8781_v60  ;;  %v8934_v54 = vld [vmem:[#allocation11 + $0x4] ss:$24 sps:$4 sm:$0xff]   ;;  %v8940_v59 = vld [vmem:[#allocation11 + $0x34] ss:$24 sps:$4 sm:$0xff]   ;;  %v8938_v60 = vld [vmem:[#allocation11 + $0x30] ss:$24 sps:$4 sm:$0xff]  }
 0x2eb   : > { %v8836_v56 = vld [vmem:[#allocation8 + $0x250] ss:$24 sps:$4 sm:$0xff]   ;;  %v8841_v58 = vld [vmem:[#allocation8 + $0x284] ss:$24 sps:$4 sm:$0xff]  }
 0x2ed   : > { %4709 = vmatpush1.bf16.msra.mxu1 %v8776_v61  ;;  %4832 = vmatpush1.bf16.msra.mxu0 %v8779_v46  ;;  %v8839_v61 = vld [vmem:[#allocation8 + $0x280] ss:$24 sps:$4 sm:$0xff]   ;;  %v8844_v46 = vld [vmem:[#allocation8 + $0x2b4] ss:$24 sps:$4 sm:$0xff]  }
 0x2ee   : > { %4710 = vmatprep.subr.bf16.mxu1 %v8784_v62  ;;  %4833 = vmatprep.subr.bf16.mxu0 %v8787_v47  ;;  %v8946_v62 = vld [vmem:[#allocation11 + $0x64] ss:$24 sps:$4 sm:$0xff]   ;;  %v8944_v47 = vld [vmem:[#allocation11 + $0x60] ss:$24 sps:$4 sm:$0xff]  }
 0x2f1   : > { %4711 = vmatpush1.bf16.msra.mxu1 %v8782_v63  ;;  %4834 = vmatpush1.bf16.msra.mxu0 %v8785_v0  ;;  %v8842_v63 = vld [vmem:[#allocation8 + $0x2b0] ss:$24 sps:$4 sm:$0xff]   ;;  %v8847_v0 = vld [vmem:[#allocation8 + $0x2e4] ss:$24 sps:$4 sm:$0xff]  }
 0x2f2   : > { %v9385_v3 = vpop.eup %9384  ;;  %4712 = vmatprep.subr.bf16.mxu1 %v8790_v1  ;;  %4835 = vmatprep.subr.bf16.mxu0 %v8793_v2  ;;  %v8952_v1 = vld [vmem:[#allocation11 + $0x94] ss:$24 sps:$4 sm:$0xff]   ;;  %v8950_v2 = vld [vmem:[#allocation11 + $0x90] ss:$24 sps:$4 sm:$0xff]  }
 0x2f3   : > { %v9387_v6 = vpop.eup %9386  ;;  %v3111_v7 = vadd.f32 1.0, %v9385_v3  ;;  %v8845_v3 = vld [vmem:[#allocation8 + $0x2e0] ss:$24 sps:$4 sm:$0xff]  }
 0x2f4   : > { %v3112_v12 = vadd.f32 1.0, %v9387_v6  ;;  %v8956_v6 = vld [vmem:[#allocation11 + $0xc0] ss:$24 sps:$4 sm:$0xff]  }
 0x2f5   : > { %v3117_v13 = vmul.f32 0.5, %v3111_v7  ;;  %4713 = vmatpush1.bf16.msra.mxu1 %v8788_v4  ;;  %4836 = vmatpush1.bf16.msra.mxu0 %v8791_v5  ;;  %v8850_v4 = vld [vmem:[#allocation8 + $0x314] ss:$24 sps:$4 sm:$0xff]   ;;  %v8848_v7 = vld [vmem:[#allocation8 + $0x310] ss:$24 sps:$4 sm:$0xff]  }
 0x2f6   : > { %v3118_v14 = vmul.f32 0.5, %v3112_v12  ;;  %4714 = vmatprep.subr.bf16.mxu1 %v8796_v9  ;;  %4837 = vmatprep.subr.bf16.mxu0 %v8799_v10  ;;  %v8958_v5 = vld [vmem:[#allocation11 + $0xc4] ss:$24 sps:$4 sm:$0xff]   ;;  %v8964_v10 = vld [vmem:[#allocation11 + $0xf4] ss:$24 sps:$4 sm:$0xff]  }
 0x2f7   : > { %v3123_v20 = vmul.f32 %v7885_v45, %v3117_v13  ;;  %v8832_v45 = vld [vmem:[#allocation8 + $0x1f4] ss:$24 sps:$4 sm:$0xff]   ;;  %v8853_v9 = vld [vmem:[#allocation8 + $0x344] ss:$24 sps:$4 sm:$0xff]   ;;  %v8851_v13 = vld [vmem:[#allocation8 + $0x340] ss:$24 sps:$4 sm:$0xff]  }
 0x2f8   : > { %v3124_v22 = vmul.f32 %v7886_v50, %v3118_v14  ;;  %v8835_v50 = vld [vmem:[#allocation8 + $0x224] ss:$24 sps:$4 sm:$0xff]   ;;  %v8962_v12 = vld [vmem:[#allocation11 + $0xf0] ss:$24 sps:$4 sm:$0xff]  }
 0x2f9   : > { %4715 = vmatpush1.bf16.msra.mxu1 %v8794_v16  ;;  %4838 = vmatpush1.bf16.msra.mxu0 %v8797_v19  ;;  %v10100_v25 = vpack.c.bf16 %v3123_v20, %v3123_v20  ;;  %v8856_v14 = vld [vmem:[#allocation8 + $0x374] ss:$24 sps:$4 sm:$0xff]   ;;  %v8968_v19 = vld [vmem:[#allocation11 + $0x120] ss:$24 sps:$4 sm:$0xff]  }
 0x2fa   : > { %v10098_v23 = vpack.c.bf16 %v3124_v22, %v3124_v22  ;;  %4848 = vmatprep.subr.bf16.mxu1 %v8802_v21  ;;  %6478 = vmatprep.subr.bf16.mxu0 %v8934_v54  ;;  %v8970_v16 = vld [vmem:[#allocation11 + $0x124] ss:$24 sps:$4 sm:$0xff]   ;;  %v8976_v22 = vld [vmem:[#allocation11 + $0x154] ss:$24 sps:$4 sm:$0xff]  }
 0x2fb   : > { %v8854_v20 = vld [vmem:[#allocation8 + $0x370] ss:$24 sps:$4 sm:$0xff]   ;;  %v8859_v21 = vld [vmem:[#allocation8 + $0x3a4] ss:$24 sps:$4 sm:$0xff]   ;;  %v8880_v54 = vld [vmem:[#allocation8 + $0x4f4] ss:$24 sps:$4 sm:$0xff]  }
 0x2fc   : > { %4716 = vmatprep.mubr.bf16.mxu1 %v10098_v23  ;;  %4839 = vmatprep.mubr.bf16.mxu0 %v10098_v23 }
 0x2fd   : > { %4717 = vmatmul.mubr.bf16.vlgmr.msra.gmra.mrb[8].mxu1 %v10100_v25  ;;  %4840 = vmatmul.mubr.bf16.vlgmr.msra.gmra.mrb[8].mxu0 %v10100_v25 }
 0x2fe   : > { %4849 = vmatpush1.bf16.msra.mxu1 %v8800_v24  ;;  %4880 = vmatprep.mubr.bf16.mxu1 %v10064_v15  ;;  %v8818_v15 = vld [vmem:[#allocation8 + $0x130] ss:$24 sps:$4 sm:$0xff]  }
 0x2ff   : > { %4850 = vmatprep.subr.bf16.mxu1 %v8805_v26  ;;  %6479 = vmatpush1.bf16.msra.mxu0 %v8932_v52  ;;  %v8974_v24 = vld [vmem:[#allocation11 + $0x150] ss:$24 sps:$4 sm:$0xff]   ;;  %v8982_v26 = vld [vmem:[#allocation11 + $0x184] ss:$24 sps:$4 sm:$0xff]  }
 0x300   : > { %6480 = vmatprep.subr.bf16.mxu0 %v8940_v59  ;;  %v9018_v52 = vld [vmem:[#allocation11 + $0x2a4] ss:$24 sps:$4 sm:$0xff]  }
 0x301   : > { %v8883_v59 = vld [vmem:[#allocation8 + $0x524] ss:$24 sps:$4 sm:$0xff]  }
 0x302   : > { %4851 = vmatpush1.bf16.msra.mxu1 %v8803_v27  ;;  %v8980_v27 = vld [vmem:[#allocation11 + $0x180] ss:$24 sps:$4 sm:$0xff]  }
 0x303   : > { %4852 = vmatprep.subr.bf16.mxu1 %v8808_v28  ;;  %6481 = vmatpush1.bf16.msra.mxu0 %v8938_v60  ;;  %v8860_v28 = vld [vmem:[#allocation8 + $0x3d0] ss:$24 sps:$4 sm:$0xff]  }
 0x304   : > { %6482 = vmatprep.subr.bf16.mxu0 %v8946_v62  ;;  %v9024_v60 = vld [vmem:[#allocation11 + $0x2d4] ss:$24 sps:$4 sm:$0xff]  }
 0x305   : > { %v8886_v62 = vld [vmem:[#allocation8 + $0x554] ss:$24 sps:$4 sm:$0xff]  }
 0x306   : > { %4853 = vmatpush1.bf16.msra.mxu1 %v8806_v29  ;;  %v8865_v29 = vld [vmem:[#allocation8 + $0x404] ss:$24 sps:$4 sm:$0xff]  }
 0x307   : > { %4854 = vmatprep.subr.bf16.mxu1 %v8811_v30  ;;  %6483 = vmatpush1.bf16.msra.mxu0 %v8944_v47  ;;  %v8988_v30 = vld [vmem:[#allocation11 + $0x1b4] ss:$24 sps:$4 sm:$0xff]   ;;  %v9030_v47 = vld [vmem:[#allocation11 + $0x304] ss:$24 sps:$4 sm:$0xff]  }
 0x308   : > { %6484 = vmatprep.subr.bf16.mxu0 %v8952_v1  ;;  %v8887_v1 = vld [vmem:[#allocation8 + $0x580] ss:$24 sps:$4 sm:$0xff]  }
 0x30a   : > { %4855 = vmatpush1.bf16.msra.mxu1 %v8809_v34  ;;  %v8986_v34 = vld [vmem:[#allocation11 + $0x1b0] ss:$24 sps:$4 sm:$0xff]  }
 0x30b   : > { %4856 = vmatprep.subr.bf16.mxu1 %v8814_v48  ;;  %6485 = vmatpush1.bf16.msra.mxu0 %v8950_v2  ;;  %v8863_v48 = vld [vmem:[#allocation8 + $0x400] ss:$24 sps:$4 sm:$0xff]   ;;  %v8892_v2 = vld [vmem:[#allocation8 + $0x5b4] ss:$24 sps:$4 sm:$0xff]  }
 0x30c   : > { %6486 = vmatprep.subr.bf16.mxu0 %v8958_v5  ;;  %v8893_v5 = vld [vmem:[#allocation8 + $0x5e0] ss:$24 sps:$4 sm:$0xff]  }
 0x30e   : > { %4857 = vmatpush1.bf16.msra.mxu1 %v8812_v36  ;;  %v8868_v36 = vld [vmem:[#allocation8 + $0x434] ss:$24 sps:$4 sm:$0xff]  }
 0x30f   : > { %4858 = vmatprep.subr.bf16.mxu1 %v8817_v37  ;;  %6487 = vmatpush1.bf16.msra.mxu0 %v8956_v6  ;;  %v8994_v37 = vld [vmem:[#allocation11 + $0x1e4] ss:$24 sps:$4 sm:$0xff]  }
 0x310   : > { %6488 = vmatprep.subr.bf16.mxu0 %v8964_v10  ;;  %v8898_v6 = vld [vmem:[#allocation8 + $0x614] ss:$24 sps:$4 sm:$0xff]   ;;  %v8899_v10 = vld [vmem:[#allocation8 + $0x640] ss:$24 sps:$4 sm:$0xff]  }
 0x312   : > { %4859 = vmatpush1.bf16.msra.mxu1 %v8815_v38  ;;  %v8866_v38 = vld [vmem:[#allocation8 + $0x430] ss:$24 sps:$4 sm:$0xff]  }
 0x313   : > { %4860 = vmatprep.subr.bf16.mxu1 %v8820_v40  ;;  %6489 = vmatpush1.bf16.msra.mxu0 %v8962_v12  ;;  %v8992_v40 = vld [vmem:[#allocation11 + $0x1e0] ss:$24 sps:$4 sm:$0xff]   ;;  %v8904_v12 = vld [vmem:[#allocation8 + $0x674] ss:$24 sps:$4 sm:$0xff]  }
 0x314   : > { %6490 = vmatprep.subr.bf16.mxu0 %v8970_v16  ;;  %v8905_v16 = vld [vmem:[#allocation8 + $0x6a0] ss:$24 sps:$4 sm:$0xff]  }
 0x316   : > { %4861 = vmatpush1.bf16.msra.mxu1 %v8818_v15  ;;  %v8871_v15 = vld [vmem:[#allocation8 + $0x464] ss:$24 sps:$4 sm:$0xff]  }
 0x317   : > { %4862 = vmatprep.subr.bf16.mxu1 %v8823_v35  ;;  %6491 = vmatpush1.bf16.msra.mxu0 %v8968_v19  ;;  %v9000_v35 = vld [vmem:[#allocation11 + $0x214] ss:$24 sps:$4 sm:$0xff]  }
 0x318   : > { %6492 = vmatprep.subr.bf16.mxu0 %v8976_v22  ;;  %v8910_v19 = vld [vmem:[#allocation8 + $0x6d4] ss:$24 sps:$4 sm:$0xff]  }
 0x319   : > { %v8916_v22 = vld [vmem:[#allocation8 + $0x734] ss:$24 sps:$4 sm:$0xff]  }
 0x31a   : > { %4863 = vmatpush1.bf16.msra.mxu1 %v8821_v41  ;;  %v8869_v41 = vld [vmem:[#allocation8 + $0x460] ss:$24 sps:$4 sm:$0xff]  }
 0x31b   : > { %4864 = vmatprep.subr.bf16.mxu1 %v8826_v42  ;;  %6493 = vmatpush1.bf16.msra.mxu0 %v8974_v24  ;;  %v8998_v42 = vld [vmem:[#allocation11 + $0x210] ss:$24 sps:$4 sm:$0xff]   ;;  %v8919_v24 = vld [vmem:[#allocation8 + $0x764] ss:$24 sps:$4 sm:$0xff]  }
 0x31c   : > { %6494 = vmatprep.subr.bf16.mxu0 %v8982_v26  ;;  %v8920_v26 = vld [vmem:[#allocation8 + $0x790] ss:$24 sps:$4 sm:$0xff]  }
 0x31e   : > { %4865 = vmatpush1.bf16.msra.mxu1 %v8824_v43  ;;  %v8874_v43 = vld [vmem:[#allocation8 + $0x494] ss:$24 sps:$4 sm:$0xff]  }
 0x31f   : > { %4866 = vmatprep.subr.bf16.mxu1 %v8829_v11  ;;  %6495 = vmatpush1.bf16.msra.mxu0 %v8980_v27  ;;  %v9006_v11 = vld [vmem:[#allocation11 + $0x244] ss:$24 sps:$4 sm:$0xff]  }
 0x320   : > { %6496 = vmatprep.subr.bf16.mxu0 %v8988_v30  ;;  %v8925_v27 = vld [vmem:[#allocation8 + $0x7c4] ss:$24 sps:$4 sm:$0xff]   ;;  %v8926_v30 = vld [vmem:[#allocation8 + $0x7f0] ss:$24 sps:$4 sm:$0xff]  }
 0x322   : > { %4867 = vmatpush1.bf16.msra.mxu1 %v8827_v44  ;;  %v8872_v44 = vld [vmem:[#allocation8 + $0x490] ss:$24 sps:$4 sm:$0xff]  }
 0x323   : > { %4868 = vmatprep.subr.bf16.mxu1 %v8832_v45  ;;  %6497 = vmatpush1.bf16.msra.mxu0 %v8986_v34  ;;  %v9004_v45 = vld [vmem:[#allocation11 + $0x240] ss:$24 sps:$4 sm:$0xff]  }
 0x324   : > { %6498 = vmatprep.subr.bf16.mxu0 %v8994_v37  ;;  %v8931_v34 = vld [vmem:[#allocation8 + $0x824] ss:$24 sps:$4 sm:$0xff]   ;;  %v8935_v37 = vld [vmem:[#allocation8 + $0x850] ss:$24 sps:$4 sm:$0xff]  }
 0x326   : > { %4869 = vmatpush1.bf16.msra.mxu1 %v8830_v49  ;;  %v8877_v49 = vld [vmem:[#allocation8 + $0x4c4] ss:$24 sps:$4 sm:$0xff]  }
 0x327   : > { %4870 = vmatprep.subr.bf16.mxu1 %v8835_v50  ;;  %6499 = vmatpush1.bf16.msra.mxu0 %v8992_v40  ;;  %v9012_v50 = vld [vmem:[#allocation11 + $0x274] ss:$24 sps:$4 sm:$0xff]  }
 0x328   : > { %6500 = vmatprep.subr.bf16.mxu0 %v9000_v35  ;;  %v8941_v40 = vld [vmem:[#allocation8 + $0x880] ss:$24 sps:$4 sm:$0xff]   ;;  %v8947_v35 = vld [vmem:[#allocation8 + $0x8b0] ss:$24 sps:$4 sm:$0xff]  }
 0x32a   : > { %4871 = vmatpush1.bf16.msra.mxu1 %v8833_v51  ;;  %v8875_v51 = vld [vmem:[#allocation8 + $0x4c0] ss:$24 sps:$4 sm:$0xff]  }
 0x32b   : > { %4872 = vmatprep.subr.bf16.mxu1 %v8838_v53  ;;  %6501 = vmatpush1.bf16.msra.mxu0 %v8998_v42  ;;  %v9010_v53 = vld [vmem:[#allocation11 + $0x270] ss:$24 sps:$4 sm:$0xff]  }
 0x32c   : > { %6502 = vmatprep.subr.bf16.mxu0 %v9006_v11  ;;  %v8953_v42 = vld [vmem:[#allocation8 + $0x8e0] ss:$24 sps:$4 sm:$0xff]   ;;  %v8959_v11 = vld [vmem:[#allocation11 + $0x8] ss:$24 sps:$4 sm:$0xff]  }
 0x32e   : > { %4873 = vmatpush1.bf16.msra.mxu1 %v8836_v56  ;;  %v8878_v56 = vld [vmem:[#allocation8 + $0x4f0] ss:$24 sps:$4 sm:$0xff]  }
 0x32f   : > { %4874 = vmatprep.subr.bf16.mxu1 %v8841_v58  ;;  %6503 = vmatpush1.bf16.msra.mxu0 %v9004_v45  ;;  %v9016_v58 = vld [vmem:[#allocation11 + $0x2a0] ss:$24 sps:$4 sm:$0xff]  }
 0x330   : > { %6504 = vmatprep.subr.bf16.mxu0 %v9012_v50  ;;  %v8965_v45 = vld [vmem:[#allocation11 + $0x38] ss:$24 sps:$4 sm:$0xff]   ;;  %v8971_v50 = vld [vmem:[#allocation11 + $0x68] ss:$24 sps:$4 sm:$0xff]  }
 0x332   : > { %4875 = vmatpush1.bf16.msra.mxu1 %v8839_v61  ;;  %v8881_v61 = vld [vmem:[#allocation8 + $0x520] ss:$24 sps:$4 sm:$0xff]  }
 0x333   : > { %4876 = vmatprep.subr.bf16.mxu1 %v8844_v46  ;;  %6505 = vmatpush1.bf16.msra.mxu0 %v9010_v53  ;;  %v9022_v46 = vld [vmem:[#allocation11 + $0x2d0] ss:$24 sps:$4 sm:$0xff]  }
 0x334   : > { %6506 = vmatprep.subr.bf16.mxu0 %v9018_v52  ;;  %v8977_v53 = vld [vmem:[#allocation11 + $0x98] ss:$24 sps:$4 sm:$0xff]   ;;  %v8983_v52 = vld [vmem:[#allocation11 + $0xc8] ss:$24 sps:$4 sm:$0xff]  }
 0x336   : > { %4877 = vmatpush1.bf16.msra.mxu1 %v8842_v63  ;;  %v8884_v63 = vld [vmem:[#allocation8 + $0x550] ss:$24 sps:$4 sm:$0xff]  }
 0x337   : > { %4878 = vmatprep.subr.bf16.mxu1 %v8847_v0  ;;  %6507 = vmatpush1.bf16.msra.mxu0 %v9016_v58  ;;  %v8889_v0 = vld [vmem:[#allocation8 + $0x584] ss:$24 sps:$4 sm:$0xff]  }
 0x338   : > { %6508 = vmatprep.subr.bf16.mxu0 %v9024_v60  ;;  %v8991_v58 = vld [vmem:[#allocation11 + $0xfc] ss:$24 sps:$4 sm:$0xff]  }
 0x33a   : > { %4879 = vmatpush1.bf16.msra.mxu1 %v8845_v3  ;;  %v8890_v3 = vld [vmem:[#allocation8 + $0x5b0] ss:$24 sps:$4 sm:$0xff]  }
 0x33b   : > { %4889 = vmatprep.subr.bf16.mxu1 %v8850_v4  ;;  %6509 = vmatpush1.bf16.msra.mxu0 %v9022_v46  ;;  %v8895_v4 = vld [vmem:[#allocation8 + $0x5e4] ss:$24 sps:$4 sm:$0xff]   ;;  %v8997_v46 = vld [vmem:[#allocation11 + $0x12c] ss:$24 sps:$4 sm:$0xff]  }
 0x33c   : > { %6519 = vmatprep.subr.bf16.mxu0 %v9030_v47 }
 0x33d   : > { %4881 = vmatmul.mubr.bf16.vlgmr.msra.gmra.mrb[12].mxu1 %v10066_v18  ;;  %v8857_v18 = vld [vmem:[#allocation8 + $0x3a0] ss:$24 sps:$4 sm:$0xff]  }
 0x33e   : > { %4890 = vmatpush1.bf16.msra.mxu1 %v8848_v7  ;;  %4921 = vmatprep.mubr.bf16.mxu1 %v10082_v55  ;;  %v8862_v55 = vld [vmem:[#allocation8 + $0x3d4] ss:$24 sps:$4 sm:$0xff]   ;;  %v8896_v7 = vld [vmem:[#allocation8 + $0x610] ss:$24 sps:$4 sm:$0xff]  }
 0x33f   : > { %4891 = vmatprep.subr.bf16.mxu1 %v8853_v9  ;;  %v8901_v9 = vld [vmem:[#allocation8 + $0x644] ss:$24 sps:$4 sm:$0xff]  }
 0x342   : > { %4892 = vmatpush1.bf16.msra.mxu1 %v8851_v13  ;;  %v8902_v13 = vld [vmem:[#allocation8 + $0x670] ss:$24 sps:$4 sm:$0xff]  }
 0x343   : > { %4893 = vmatprep.subr.bf16.mxu1 %v8856_v14  ;;  %v8907_v14 = vld [vmem:[#allocation8 + $0x6a4] ss:$24 sps:$4 sm:$0xff]  }
 0x346   : > { %4894 = vmatpush1.bf16.msra.mxu1 %v8854_v20  ;;  %v8908_v20 = vld [vmem:[#allocation8 + $0x6d0] ss:$24 sps:$4 sm:$0xff]  }
 0x347   : > { %4895 = vmatprep.subr.bf16.mxu1 %v8859_v21  ;;  %v8913_v21 = vld [vmem:[#allocation8 + $0x704] ss:$24 sps:$4 sm:$0xff]  }
 0x34a   : > { %4896 = vmatpush1.bf16.msra.mxu1 %v8857_v18  ;;  %v8917_v18 = vld [vmem:[#allocation8 + $0x760] ss:$24 sps:$4 sm:$0xff]  }
 0x34b   : > { %4897 = vmatprep.subr.bf16.mxu1 %v8862_v55  ;;  %v8922_v55 = vld [vmem:[#allocation8 + $0x794] ss:$24 sps:$4 sm:$0xff]  }
 0x34e   : > { %4898 = vmatpush1.bf16.msra.mxu1 %v8860_v28  ;;  %v8923_v28 = vld [vmem:[#allocation8 + $0x7c0] ss:$24 sps:$4 sm:$0xff]  }
 0x34f   : > { %4899 = vmatprep.subr.bf16.mxu1 %v8865_v29  ;;  %v8928_v29 = vld [vmem:[#allocation8 + $0x7f4] ss:$24 sps:$4 sm:$0xff]  }
 0x352   : > { %4900 = vmatpush1.bf16.msra.mxu1 %v8863_v48  ;;  %v8929_v48 = vld [vmem:[#allocation8 + $0x820] ss:$24 sps:$4 sm:$0xff]  }
 0x353   : > { %4901 = vmatprep.subr.bf16.mxu1 %v8868_v36  ;;  %v8937_v36 = vld [vmem:[#allocation8 + $0x854] ss:$24 sps:$4 sm:$0xff]  }
 0x356   : > { %4902 = vmatpush1.bf16.msra.mxu1 %v8866_v38  ;;  %v8943_v38 = vld [vmem:[#allocation8 + $0x884] ss:$24 sps:$4 sm:$0xff]  }
 0x357   : > { %4903 = vmatprep.subr.bf16.mxu1 %v8871_v15  ;;  %v8949_v15 = vld [vmem:[#allocation8 + $0x8b4] ss:$24 sps:$4 sm:$0xff]  }
 0x35a   : > { %4904 = vmatpush1.bf16.msra.mxu1 %v8869_v41  ;;  %v8955_v41 = vld [vmem:[#allocation8 + $0x8e4] ss:$24 sps:$4 sm:$0xff]  }
 0x35b   : > { %4905 = vmatprep.subr.bf16.mxu1 %v8874_v43  ;;  %v8961_v43 = vld [vmem:[#allocation11 + $0xc] ss:$24 sps:$4 sm:$0xff]  }
 0x35e   : > { %4906 = vmatpush1.bf16.msra.mxu1 %v8872_v44  ;;  %v8967_v44 = vld [vmem:[#allocation11 + $0x3c] ss:$24 sps:$4 sm:$0xff]  }
 0x35f   : > { %4907 = vmatprep.subr.bf16.mxu1 %v8877_v49  ;;  %v8973_v49 = vld [vmem:[#allocation11 + $0x6c] ss:$24 sps:$4 sm:$0xff]  }
 0x362   : > { %4908 = vmatpush1.bf16.msra.mxu1 %v8875_v51  ;;  %v8979_v51 = vld [vmem:[#allocation11 + $0x9c] ss:$24 sps:$4 sm:$0xff]  }
 0x363   : > { %4909 = vmatprep.subr.bf16.mxu1 %v8880_v54  ;;  %v8985_v54 = vld [vmem:[#allocation11 + $0xcc] ss:$24 sps:$4 sm:$0xff]  }
 0x366   : > { %4910 = vmatpush1.bf16.msra.mxu1 %v8878_v56  ;;  %v10112_v56 = vld [vmem:[#allocation10] sm:$0x3f] }
 0x367   : > { %4911 = vmatprep.subr.bf16.mxu1 %v8883_v59  ;;  %v8989_v59 = vld [vmem:[#allocation11 + $0xf8] ss:$24 sps:$4 sm:$0xff]   ;;  %v3139_v60 = vrot.slane %v10112_v56, %v10056_v17 }
 0x36a   : > { %4912 = vmatpush1.bf16.msra.mxu1 %v8881_v61  ;;  %v3147_v61 = vrot.slane %v10112_v56, %v10076_v33 }
 0x36b   : > { %4913 = vmatprep.subr.bf16.mxu1 %v8886_v62 }
 0x36e   : > { %4914 = vmatpush1.bf16.msra.mxu1 %v8884_v63 }
 0x36f   : > { %4915 = vmatprep.subr.bf16.mxu1 %v8889_v0 }
 0x372   : > { %4916 = vmatpush1.bf16.msra.mxu1 %v8887_v1 }
 0x373   : > { %4917 = vmatprep.subr.bf16.mxu1 %v8892_v2 }
 0x376   : > { %4918 = vmatpush1.bf16.msra.mxu1 %v8890_v3 }
 0x377   : > { %4919 = vmatprep.subr.bf16.mxu1 %v8895_v4 }
 0x37a   : > { %4920 = vmatpush1.bf16.msra.mxu1 %v8893_v5 }
 0x37b   : > { %4930 = vmatprep.subr.bf16.mxu1 %v8898_v6  ;;  %v8995_v6 = vld [vmem:[#allocation11 + $0x128] ss:$24 sps:$4 sm:$0xff]  }
 0x37d   : > { %4922 = vmatmul.mubr.bf16.vlgmr.msra.gmra.mrb[12].mxu1 %v10084_v57  ;;  %v8911_v57 = vld [vmem:[#allocation8 + $0x700] ss:$24 sps:$4 sm:$0xff]  }
 0x37e   : > { %4931 = vmatpush1.bf16.msra.mxu1 %v8896_v7  ;;  %4962 = vmatprep.mubr.bf16.mxu1 %v10098_v23  ;;  %v8914_v23 = vld [vmem:[#allocation8 + $0x730] ss:$24 sps:$4 sm:$0xff]  }
 0x37f   : > { %4932 = vmatprep.subr.bf16.mxu1 %v8901_v9 }
 0x382   : > { %4933 = vmatpush1.bf16.msra.mxu1 %v8899_v10 }
 0x383   : > { %4934 = vmatprep.subr.bf16.mxu1 %v8904_v12  ;;  %v9003_v12 = vld [vmem:[#allocation11 + $0x15c] ss:$24 sps:$4 sm:$0xff]  }
 0x386   : > { %4935 = vmatpush1.bf16.msra.mxu1 %v8902_v13 }
 0x387   : > { %4936 = vmatprep.subr.bf16.mxu1 %v8907_v14 }
 0x38a   : > { %4937 = vmatpush1.bf16.msra.mxu1 %v8905_v16  ;;  %v9001_v16 = vld [vmem:[#allocation11 + $0x158] ss:$24 sps:$4 sm:$0xff]  }
 0x38b   : > { %4938 = vmatprep.subr.bf16.mxu1 %v8910_v19  ;;  %v9009_v19 = vld [vmem:[#allocation11 + $0x18c] ss:$24 sps:$4 sm:$0xff]  }
 0x38e   : > { %4939 = vmatpush1.bf16.msra.mxu1 %v8908_v20  ;;  %v9007_v20 = vld [vmem:[#allocation11 + $0x188] ss:$24 sps:$4 sm:$0xff]  }
 0x38f   : > { %4940 = vmatprep.subr.bf16.mxu1 %v8913_v21  ;;  %v9015_v21 = vld [vmem:[#allocation11 + $0x1bc] ss:$24 sps:$4 sm:$0xff]  }
 0x392   : > { %4941 = vmatpush1.bf16.msra.mxu1 %v8911_v57  ;;  %v9013_v57 = vld [vmem:[#allocation11 + $0x1b8] ss:$24 sps:$4 sm:$0xff]  }
 0x393   : > { %4942 = vmatprep.subr.bf16.mxu1 %v8916_v22 }
 0x396   : > { %4943 = vmatpush1.bf16.msra.mxu1 %v8914_v23  ;;  %v9021_v23 = vld [vmem:[#allocation11 + $0x1ec] ss:$24 sps:$4 sm:$0xff]  }
 0x397   : > { %4944 = vmatprep.subr.bf16.mxu1 %v8919_v24 }
 0x39a   : > { %4945 = vmatpush1.bf16.msra.mxu1 %v8917_v18 }
 0x39b   : > { %4946 = vmatprep.subr.bf16.mxu1 %v8922_v55 }
 0x39e   : > { %4947 = vmatpush1.bf16.msra.mxu1 %v8920_v26 }
 0x39f   : > { %4948 = vmatprep.subr.bf16.mxu1 %v8925_v27 }
 0x3a2   : > { %4949 = vmatpush1.bf16.msra.mxu1 %v8923_v28  ;;  %v9019_v28 = vld [vmem:[#allocation11 + $0x1e8] ss:$24 sps:$4 sm:$0xff]  }
 0x3a3   : > { %4950 = vmatprep.subr.bf16.mxu1 %v8928_v29 }
 0x3a6   : > { %4951 = vmatpush1.bf16.msra.mxu1 %v8926_v30  ;;  %v9027_v30 = vld [vmem:[#allocation11 + $0x21c] ss:$24 sps:$4 sm:$0xff]  }
 0x3a7   : > { %4952 = vmatprep.subr.bf16.mxu1 %v8931_v34 }
 0x3aa   : > { %4953 = vmatpush1.bf16.msra.mxu1 %v8929_v48 }
 0x3ab   : > { %4954 = vmatprep.subr.bf16.mxu1 %v8937_v36 }
 0x3ae   : > { %4955 = vmatpush1.bf16.msra.mxu1 %v8935_v37 }
 0x3af   : > { %4956 = vmatprep.subr.bf16.mxu1 %v8943_v38  ;;  %v9025_v38 = vld [vmem:[#allocation11 + $0x218] ss:$24 sps:$4 sm:$0xff]  }
 0x3b2   : > { %4957 = vmatpush1.bf16.msra.mxu1 %v8941_v40 }
 0x3b3   : > { %4958 = vmatprep.subr.bf16.mxu1 %v8949_v15 }
 0x3b6   : > { %4959 = vmatpush1.bf16.msra.mxu1 %v8947_v35  ;;  %v9028_v35 = vld [vmem:[#allocation11 + $0x300] ss:$24 sps:$4 sm:$0xff]  }
 0x3b7   : > { %4960 = vmatprep.subr.bf16.mxu1 %v8955_v41 }
 0x3ba   : > { %4961 = vmatpush1.bf16.msra.mxu1 %v8953_v42  ;;  %v9033_v42 = vld [vmem:[#allocation11 + $0x24c] ss:$24 sps:$4 sm:$0xff]  }
 0x3bb   : > { %6601 = vmatprep.subr.bf16.mxu1 %v8961_v43  ;;  %v9036_v43 = vld [vmem:[#allocation11 + $0x334] ss:$24 sps:$4 sm:$0xff]  }
 0x3bd   : > { %4963 = vmatmul.mubr.bf16.vlgmr.msra.gmra.mrb[12].mxu1 %v10100_v25  ;;  %v3135_v25 = vrot.slane %v10112_v56, %v10053_v39 }
 0x3be   : > { %6602 = vmatpush1.bf16.msra.mxu1 %v8959_v11 }
 0x3bf   : > { %6603 = vmatprep.subr.bf16.mxu1 %v8967_v44  ;;  %v9031_v44 = vld [vmem:[#allocation11 + $0x248] ss:$24 sps:$4 sm:$0xff]  }
 0x3c2   : > { %6604 = vmatpush1.bf16.msra.mxu1 %v8965_v45  ;;  %v9039_v45 = vld [vmem:[#allocation11 + $0x27c] ss:$24 sps:$4 sm:$0xff]  }
 0x3c3   : > { %6605 = vmatprep.subr.bf16.mxu1 %v8973_v49  ;;  %v9034_v49 = vld [vmem:[#allocation11 + $0x330] ss:$24 sps:$4 sm:$0xff]  }
 0x3c6   : > { %6606 = vmatpush1.bf16.msra.mxu1 %v8971_v50  ;;  %v9042_v50 = vld [vmem:[#allocation11 + $0x364] ss:$24 sps:$4 sm:$0xff]  }
 0x3c7   : > { %6607 = vmatprep.subr.bf16.mxu1 %v8979_v51  ;;  %v9037_v51 = vld [vmem:[#allocation11 + $0x278] ss:$24 sps:$4 sm:$0xff]  }
 0x3ca   : > { %6608 = vmatpush1.bf16.msra.mxu1 %v8977_v53  ;;  %v9045_v53 = vld [vmem:[#allocation11 + $0x2ac] ss:$24 sps:$4 sm:$0xff]  }
 0x3cb   : > { %6609 = vmatprep.subr.bf16.mxu1 %v8985_v54  ;;  %v9040_v54 = vld [vmem:[#allocation11 + $0x360] ss:$24 sps:$4 sm:$0xff]  }
 0x3ce   : > { %6610 = vmatpush1.bf16.msra.mxu1 %v8983_v52  ;;  %v9048_v52 = vld [vmem:[#allocation11 + $0x394] ss:$24 sps:$4 sm:$0xff]  }
 0x3cf   : > { %6611 = vmatprep.subr.bf16.mxu1 %v8991_v58  ;;  %v9043_v58 = vld [vmem:[#allocation11 + $0x2a8] ss:$24 sps:$4 sm:$0xff]  }
 0x3d0   : > { %v4718_v62 = vpop.f32.mrb[8].mxu1  ;;  %v10120_v47 = vpop.f32.mrb[8].mxu0 }
 0x3d1   : > { %v7887_v63 = vadd.f32 %v4718_v62, %v3135_v25  ;;  %v4720_v0 = vpop.f32.mrb[9].mxu1  ;;  %v4843_v1 = vpop.f32.mrb[9].mxu0  ;;  %v9051_v25 = vld [vmem:[#allocation11 + $0x2dc] ss:$24 sps:$4 sm:$0xff]   ;;  %v9052_v62 = vld [vmem:[#allocation11 + $0x3c0] ss:$24 sps:$4 sm:$0xff]  }
 0x3d2   : > { %v7888_v2 = vadd.f32 %v4720_v0, %v3139_v60  ;;  %v7890_v3 = vadd.f32 %v4843_v1, %v3147_v61  ;;  %6612 = vmatpush1.bf16.msra.mxu1 %v8989_v59  ;;  %v4722_v4 = vpop.f32.mrb[10].mxu1  ;;  %v4845_v5 = vpop.f32.mrb[10].mxu0  ;;  %v9046_v59 = vld [vmem:[#allocation11 + $0x390] ss:$24 sps:$4 sm:$0xff]   ;;  %v9054_v60 = vld [vmem:[#allocation11 + $0x3c4] ss:$24 sps:$4 sm:$0xff]  }
 0x3d3   : > { %v4971_v7 = vmul.f32 0.851, %v7887_v63  ;;  %v4723_v9 = vpop.f32.mrb[11].mxu1  ;;  %v4846_v10 = vpop.f32.mrb[11].mxu0  ;;  %6613 = vmatprep.subr.bf16.mxu1 %v8997_v46  ;;  %v9049_v61 = vld [vmem:[#allocation11 + $0x2d8] ss:$24 sps:$4 sm:$0xff]  }
 0x3d4   : > { %v4972_v13 = vmul.f32 0.851, %v7888_v2  ;;  %v4974_v14 = vmul.f32 0.851, %v7890_v3  ;;  %v9057_v46 = vld [vmem:[#allocation11 + $0x30c] ss:$24 sps:$4 sm:$0xff]  }
 0x3d5   : > { %9388 = vtanh.f32 %v4971_v7  ;;  %v9055_v0 = vld [vmem:[#allocation11 + $0x308] ss:$24 sps:$4 sm:$0xff]   ;;  %v9063_v1 = vld [vmem:[#allocation11 + $0x33c] ss:$24 sps:$4 sm:$0xff]   ;;  %v9061_v4 = vld [vmem:[#allocation11 + $0x338] ss:$24 sps:$4 sm:$0xff]  }
 0x3d6   : > { %6614 = vmatpush1.bf16.msra.mxu1 %v8995_v6  ;;  %9390 = vtanh.f32 %v4972_v13  ;;  %v9069_v5 = vld [vmem:[#allocation11 + $0x36c] ss:$24 sps:$4 sm:$0xff]   ;;  %v9064_v6 = vld [vmem:[#allocation11 + $0x420] ss:$24 sps:$4 sm:$0xff]   ;;  %v9075_v10 = vld [vmem:[#allocation11 + $0x39c] ss:$24 sps:$4 sm:$0xff]  }
 0x3d7   : > { %6615 = vmatprep.subr.bf16.mxu1 %v9003_v12  ;;  %9392 = vtanh.f32 %v4974_v14  ;;  %v9072_v7 = vld [vmem:[#allocation11 + $0x454] ss:$24 sps:$4 sm:$0xff]   ;;  %v9067_v9 = vld [vmem:[#allocation11 + $0x368] ss:$24 sps:$4 sm:$0xff]   ;;  %v3143_v12 = vrot.slane %v10112_v56, %v10073_v32  ;;  %v9078_v14 = vld [vmem:[#allocation11 + $0x484] ss:$24 sps:$4 sm:$0xff]  }
 0x3d8   : > { %v9070_v13 = vld [vmem:[#allocation11 + $0x450] ss:$24 sps:$4 sm:$0xff]  }
 0x3da   : > { %6616 = vmatpush1.bf16.msra.mxu1 %v9001_v16  ;;  %v9073_v16 = vld [vmem:[#allocation11 + $0x398] ss:$24 sps:$4 sm:$0xff]  }
 0x3db   : > { %6617 = vmatprep.subr.bf16.mxu1 %v9009_v19  ;;  %v9081_v19 = vld [vmem:[#allocation11 + $0x3cc] ss:$24 sps:$4 sm:$0xff]  }
 0x3de   : > { %6618 = vmatpush1.bf16.msra.mxu1 %v9007_v20  ;;  %v10137_v20 = vadd.f32 %v10120_v47, %v3143_v12  ;;  %v9088_v47 = vld [vmem:[#allocation11 + $0x4e0] ss:$24 sps:$4 sm:$0xff]  }
 0x3df   : > { %v9389_v22 = vpop.eup %9388  ;;  %6619 = vmatprep.subr.bf16.mxu1 %v9015_v21  ;;  %v9076_v21 = vld [vmem:[#allocation11 + $0x480] ss:$24 sps:$4 sm:$0xff]  }
 0x3e0   : > { %v4983_v24 = vadd.f32 1.0, %v9389_v22  ;;  %v9391_v18 = vpop.eup %9390  ;;  %v9079_v22 = vld [vmem:[#allocation11 + $0x3c8] ss:$24 sps:$4 sm:$0xff]  }
 0x3e1   : > { %v9393_v55 = vpop.eup %9392  ;;  %v4984_v27 = vadd.f32 1.0, %v9391_v18  ;;  %v9082_v18 = vld [vmem:[#allocation11 + $0x4b0] ss:$24 sps:$4 sm:$0xff]  }
 0x3e2   : > { %v4989_v26 = vmul.f32 0.5, %v4983_v24  ;;  %6620 = vmatpush1.bf16.msra.mxu1 %v9013_v57  ;;  %v4986_v29 = vadd.f32 1.0, %v9393_v55  ;;  %v9084_v57 = vld [vmem:[#allocation11 + $0x4b4] ss:$24 sps:$4 sm:$0xff]   ;;  %v4973_v24 = vmul.f32 0.851, %v10137_v20 }
 0x3e3   : > { %6621 = vmatprep.subr.bf16.mxu1 %v9021_v23  ;;  %v4990_v34 = vmul.f32 0.5, %v4984_v27  ;;  %v9087_v23 = vld [vmem:[#allocation11 + $0x3fc] ss:$24 sps:$4 sm:$0xff]   ;;  %v9093_v27 = vld [vmem:[#allocation11 + $0x42c] ss:$24 sps:$4 sm:$0xff]  }
 0x3e4   : > { %v4995_v48 = vmul.f32 %v7887_v63, %v4989_v26  ;;  %v4992_v36 = vmul.f32 0.5, %v4986_v29  ;;  %v9060_v63 = vld [vmem:[#allocation11 + $0x3f4] ss:$24 sps:$4 sm:$0xff]   ;;  %v9090_v55 = vld [vmem:[#allocation11 + $0x4e4] ss:$24 sps:$4 sm:$0xff]   ;;  %9394 = vtanh.f32 %v4973_v24 }
 0x3e5   : > { %v4996_v37 = vmul.f32 %v7888_v2, %v4990_v34  ;;  %v9058_v2 = vld [vmem:[#allocation11 + $0x3f0] ss:$24 sps:$4 sm:$0xff]  }
 0x3e6   : > { %6622 = vmatpush1.bf16.msra.mxu1 %v9019_v28  ;;  %v4998_v40 = vmul.f32 %v7890_v3, %v4992_v36  ;;  %v10124_v41 = vpack.c.bf16 %v4995_v48, %v4995_v48  ;;  %v9066_v3 = vld [vmem:[#allocation11 + $0x424] ss:$24 sps:$4 sm:$0xff]   ;;  %v9085_v26 = vld [vmem:[#allocation11 + $0x3f8] ss:$24 sps:$4 sm:$0xff]   ;;  %v9096_v28 = vld [vmem:[#allocation11 + $0x514] ss:$24 sps:$4 sm:$0xff]  }
 0x3e7   : > { %6623 = vmatprep.subr.bf16.mxu1 %v9027_v30  ;;  %v10122_v15 = vpack.c.bf16 %v4996_v37, %v4996_v37  ;;  %v9091_v29 = vld [vmem:[#allocation11 + $0x428] ss:$24 sps:$4 sm:$0xff]   ;;  %v9099_v30 = vld [vmem:[#allocation11 + $0x45c] ss:$24 sps:$4 sm:$0xff]   ;;  %v9097_v36 = vld [vmem:[#allocation11 + $0x458] ss:$24 sps:$4 sm:$0xff]  }
 0x3e8   : > { %v10126_v11 = vpack.c.bf16 %v4998_v40, %v4998_v40  ;;  %v9094_v34 = vld [vmem:[#allocation11 + $0x510] ss:$24 sps:$4 sm:$0xff]   ;;  %v9102_v48 = vld [vmem:[#allocation11 + $0x544] ss:$24 sps:$4 sm:$0xff]   ;;  %v9108_v40 = vld [vmem:[#allocation11 + $0x574] ss:$24 sps:$4 sm:$0xff]  }
 0x3e9   : > { %6510 = vmatprep.mubr.bf16.mxu0 %v10122_v15  ;;  %6633 = vmatprep.mubr.bf16.mxu1 %v10122_v15  ;;  %v9105_v37 = vld [vmem:[#allocation11 + $0x48c] ss:$24 sps:$4 sm:$0xff]   ;;  %v9130_v12 = vld [vmem:[#allocation11 + $0x5a8] ss:$24 sps:$4 sm:$0xff]  }
 0x3ea   : > { %6624 = vmatpush1.bf16.msra.mxu1 %v9025_v38  ;;  %6511 = vmatmul.mubr.bf16.vlgmr.msra.gmra.mrb[12].mxu0 %v10124_v41  ;;  %v9100_v38 = vld [vmem:[#allocation11 + $0x540] ss:$24 sps:$4 sm:$0xff]   ;;  %v9166_v24 = vld [vmem:[#allocation11 + $0x6f0] ss:$24 sps:$4 sm:$0xff]  }
 0x3eb   : > { %6520 = vmatpush1.bf16.msra.mxu0 %v9028_v35  ;;  %6551 = vmatprep.mubr.bf16.mxu0 %v10126_v11 }
 0x3ec   : > { %6625 = vmatprep.subr.bf16.mxu1 %v9033_v42  ;;  %6521 = vmatprep.subr.bf16.mxu0 %v9036_v43  ;;  %v9103_v42 = vld [vmem:[#allocation11 + $0x488] ss:$24 sps:$4 sm:$0xff]   ;;  %v9111_v43 = vld [vmem:[#allocation11 + $0x4bc] ss:$24 sps:$4 sm:$0xff]  }
 0x3ee   : > { %6626 = vmatpush1.bf16.msra.mxu1 %v9031_v44  ;;  %v9395_v35 = vpop.eup %9394  ;;  %v9106_v44 = vld [vmem:[#allocation11 + $0x570] ss:$24 sps:$4 sm:$0xff]  }
 0x3ef   : > { %6627 = vmatprep.subr.bf16.mxu1 %v9039_v45  ;;  %6522 = vmatpush1.bf16.msra.mxu0 %v9034_v49  ;;  %v4985_v45 = vadd.f32 1.0, %v9395_v35  ;;  %v9114_v49 = vld [vmem:[#allocation11 + $0x5a4] ss:$24 sps:$4 sm:$0xff]  }
 0x3f0   : > { %6523 = vmatprep.subr.bf16.mxu0 %v9042_v50  ;;  %v9109_v50 = vld [vmem:[#allocation11 + $0x4b8] ss:$24 sps:$4 sm:$0xff]   ;;  %v9171_v35 = vld [vmem:[#allocation11 + $0x6fc] ss:$24 sps:$4 sm:$0xff]  }
 0x3f2   : > { %6628 = vmatpush1.bf16.msra.mxu1 %v9037_v51  ;;  %v9117_v51 = vld [vmem:[#allocation11 + $0x4ec] ss:$24 sps:$4 sm:$0xff]  }
 0x3f3   : > { %6629 = vmatprep.subr.bf16.mxu1 %v9045_v53  ;;  %6524 = vmatpush1.bf16.msra.mxu0 %v9040_v54  ;;  %v9112_v53 = vld [vmem:[#allocation11 + $0x5a0] ss:$24 sps:$4 sm:$0xff]   ;;  %v4991_v54 = vmul.f32 0.5, %v4985_v45  ;;  %v9177_v45 = vld [vmem:[#allocation11 + $0x72c] ss:$24 sps:$4 sm:$0xff]  }
 0x3f4   : > { %6525 = vmatprep.subr.bf16.mxu0 %v9048_v52  ;;  %v9120_v52 = vld [vmem:[#allocation11 + $0x5d4] ss:$24 sps:$4 sm:$0xff]  }
 0x3f6   : > { %6630 = vmatpush1.bf16.msra.mxu1 %v9043_v58  ;;  %v9115_v58 = vld [vmem:[#allocation11 + $0x4e8] ss:$24 sps:$4 sm:$0xff]  }
 0x3f7   : > { %6631 = vmatprep.subr.bf16.mxu1 %v9051_v25  ;;  %6526 = vmatpush1.bf16.msra.mxu0 %v9046_v59  ;;  %v9123_v25 = vld [vmem:[#allocation11 + $0x51c] ss:$24 sps:$4 sm:$0xff]   ;;  %v9118_v59 = vld [vmem:[#allocation11 + $0x5d0] ss:$24 sps:$4 sm:$0xff]  }
 0x3f8   : > { %6527 = vmatprep.subr.bf16.mxu0 %v9054_v60  ;;  %v4997_v60 = vmul.f32 %v10137_v20, %v4991_v54  ;;  %v9141_v20 = vld [vmem:[#allocation11 + $0x60c] ss:$24 sps:$4 sm:$0xff]   ;;  %v9202_v54 = vld [vmem:[#allocation11 + $0x810] ss:$24 sps:$4 sm:$0xff]  }
 0x3fa   : > { %6632 = vmatpush1.bf16.msra.mxu1 %v9049_v61  ;;  %v9138_v61 = vld [vmem:[#allocation11 + $0x604] ss:$24 sps:$4 sm:$0xff]  }
 0x3fb   : > { %6642 = vmatprep.subr.bf16.mxu1 %v9057_v46  ;;  %6528 = vmatpush1.bf16.msra.mxu0 %v9052_v62  ;;  %v9121_v46 = vld [vmem:[#allocation11 + $0x518] ss:$24 sps:$4 sm:$0xff]   ;;  %v9126_v62 = vld [vmem:[#allocation11 + $0x54c] ss:$24 sps:$4 sm:$0xff]  }
 0x3fc   : > { %6529 = vmatprep.subr.bf16.mxu0 %v9060_v63  ;;  %v9136_v63 = vld [vmem:[#allocation11 + $0x600] ss:$24 sps:$4 sm:$0xff]  }
 0x3fd   : > { %6634 = vmatmul.mubr.bf16.vlgmr.msra.gmra.mrb[16].mxu1 %v10124_v41 }
 0x3fe   : > { %6643 = vmatpush1.bf16.msra.mxu1 %v9055_v0  ;;  %6674 = vmatprep.mubr.bf16.mxu1 %v10126_v11  ;;  %v10141_v0 = vpack.c.bf16 %v4997_v60, %v4997_v60  ;;  %v9216_v60 = vld [vmem:[#allocation11 + $0x874] ss:$24 sps:$4 sm:$0xff]  }
 0x3ff   : > { %6644 = vmatprep.subr.bf16.mxu1 %v9063_v1  ;;  %6530 = vmatpush1.bf16.msra.mxu0 %v9058_v2  ;;  %v9144_v1 = vld [vmem:[#allocation11 + $0x634] ss:$24 sps:$4 sm:$0xff]   ;;  %v9124_v2 = vld [vmem:[#allocation11 + $0x548] ss:$24 sps:$4 sm:$0xff]  }
 0x400   : > { %6531 = vmatprep.subr.bf16.mxu0 %v9066_v3  ;;  %v9129_v3 = vld [vmem:[#allocation11 + $0x57c] ss:$24 sps:$4 sm:$0xff]  }
 0x402   : > { %6645 = vmatpush1.bf16.msra.mxu1 %v9061_v4  ;;  %v9142_v4 = vld [vmem:[#allocation11 + $0x630] ss:$24 sps:$4 sm:$0xff]  }
 0x403   : > { %6646 = vmatprep.subr.bf16.mxu1 %v9069_v5  ;;  %6532 = vmatpush1.bf16.msra.mxu0 %v9064_v6  ;;  %v9150_v5 = vld [vmem:[#allocation11 + $0x664] ss:$24 sps:$4 sm:$0xff]   ;;  %v9127_v6 = vld [vmem:[#allocation11 + $0x578] ss:$24 sps:$4 sm:$0xff]  }
 0x404   : > { %6533 = vmatprep.subr.bf16.mxu0 %v9072_v7  ;;  %v9132_v7 = vld [vmem:[#allocation11 + $0x5ac] ss:$24 sps:$4 sm:$0xff]  }
 0x406   : > { %6647 = vmatpush1.bf16.msra.mxu1 %v9067_v9  ;;  %v9148_v9 = vld [vmem:[#allocation11 + $0x660] ss:$24 sps:$4 sm:$0xff]  }
 0x407   : > { %6648 = vmatprep.subr.bf16.mxu1 %v9075_v10  ;;  %6534 = vmatpush1.bf16.msra.mxu0 %v9070_v13  ;;  %v9156_v10 = vld [vmem:[#allocation11 + $0x694] ss:$24 sps:$4 sm:$0xff]  }
 0x408   : > { %6535 = vmatprep.subr.bf16.mxu0 %v9078_v14  ;;  %v9135_v13 = vld [vmem:[#allocation11 + $0x5dc] ss:$24 sps:$4 sm:$0xff]   ;;  %v9154_v14 = vld [vmem:[#allocation11 + $0x690] ss:$24 sps:$4 sm:$0xff]  }
 0x40a   : > { %6649 = vmatpush1.bf16.msra.mxu1 %v9073_v16  ;;  %v9162_v16 = vld [vmem:[#allocation11 + $0x6c4] ss:$24 sps:$4 sm:$0xff]  }
 0x40b   : > { %6650 = vmatprep.subr.bf16.mxu1 %v9081_v19  ;;  %6536 = vmatpush1.bf16.msra.mxu0 %v9076_v21  ;;  %v9133_v19 = vld [vmem:[#allocation11 + $0x5d8] ss:$24 sps:$4 sm:$0xff]  }
 0x40c   : > { %6537 = vmatprep.subr.bf16.mxu0 %v9084_v57  ;;  %v9160_v21 = vld [vmem:[#allocation11 + $0x6c0] ss:$24 sps:$4 sm:$0xff]   ;;  %v9168_v57 = vld [vmem:[#allocation11 + $0x6f4] ss:$24 sps:$4 sm:$0xff]  }
 0x40e   : > { %6651 = vmatpush1.bf16.msra.mxu1 %v9079_v22  ;;  %v9139_v22 = vld [vmem:[#allocation11 + $0x608] ss:$24 sps:$4 sm:$0xff]  }
 0x40f   : > { %6652 = vmatprep.subr.bf16.mxu1 %v9087_v23  ;;  %6538 = vmatpush1.bf16.msra.mxu0 %v9082_v18  ;;  %v9147_v23 = vld [vmem:[#allocation11 + $0x63c] ss:$24 sps:$4 sm:$0xff]  }
 0x410   : > { %6539 = vmatprep.subr.bf16.mxu0 %v9090_v55  ;;  %v9174_v18 = vld [vmem:[#allocation11 + $0x724] ss:$24 sps:$4 sm:$0xff]   ;;  %v9145_v55 = vld [vmem:[#allocation11 + $0x638] ss:$24 sps:$4 sm:$0xff]  }
 0x412   : > { %6653 = vmatpush1.bf16.msra.mxu1 %v9085_v26  ;;  %v9153_v26 = vld [vmem:[#allocation11 + $0x66c] ss:$24 sps:$4 sm:$0xff]  }
 0x413   : > { %6654 = vmatprep.subr.bf16.mxu1 %v9093_v27  ;;  %6540 = vmatpush1.bf16.msra.mxu0 %v9088_v47  ;;  %v9172_v27 = vld [vmem:[#allocation11 + $0x720] ss:$24 sps:$4 sm:$0xff]   ;;  %v9180_v47 = vld [vmem:[#allocation11 + $0x754] ss:$24 sps:$4 sm:$0xff]  }
 0x414   : > { %6541 = vmatprep.subr.bf16.mxu0 %v9096_v28  ;;  %v9151_v28 = vld [vmem:[#allocation11 + $0x668] ss:$24 sps:$4 sm:$0xff]  }
 0x416   : > { %6655 = vmatpush1.bf16.msra.mxu1 %v9091_v29  ;;  %v9159_v29 = vld [vmem:[#allocation11 + $0x69c] ss:$24 sps:$4 sm:$0xff]  }
 0x417   : > { %6656 = vmatprep.subr.bf16.mxu1 %v9099_v30  ;;  %6542 = vmatpush1.bf16.msra.mxu0 %v9094_v34  ;;  %v9178_v30 = vld [vmem:[#allocation11 + $0x750] ss:$24 sps:$4 sm:$0xff]   ;;  %v9186_v34 = vld [vmem:[#allocation11 + $0x784] ss:$24 sps:$4 sm:$0xff]  }
 0x418   : > { %6543 = vmatprep.subr.bf16.mxu0 %v9102_v48  ;;  %v9157_v48 = vld [vmem:[#allocation11 + $0x698] ss:$24 sps:$4 sm:$0xff]  }
 0x41a   : > { %6657 = vmatpush1.bf16.msra.mxu1 %v9097_v36  ;;  %v9165_v36 = vld [vmem:[#allocation11 + $0x6cc] ss:$24 sps:$4 sm:$0xff]  }
 0x41b   : > { %6658 = vmatprep.subr.bf16.mxu1 %v9105_v37  ;;  %6544 = vmatpush1.bf16.msra.mxu0 %v9100_v38  ;;  %v9184_v37 = vld [vmem:[#allocation11 + $0x780] ss:$24 sps:$4 sm:$0xff]   ;;  %v9192_v38 = vld [vmem:[#allocation11 + $0x7b4] ss:$24 sps:$4 sm:$0xff]  }
 0x41c   : > { %6545 = vmatprep.subr.bf16.mxu0 %v9108_v40  ;;  %v9163_v40 = vld [vmem:[#allocation11 + $0x6c8] ss:$24 sps:$4 sm:$0xff]  }
 0x41e   : > { %6659 = vmatpush1.bf16.msra.mxu1 %v9103_v42  ;;  %v9190_v42 = vld [vmem:[#allocation11 + $0x7b0] ss:$24 sps:$4 sm:$0xff]  }
 0x41f   : > { %6660 = vmatprep.subr.bf16.mxu1 %v9111_v43  ;;  %6546 = vmatpush1.bf16.msra.mxu0 %v9106_v44  ;;  %v9198_v43 = vld [vmem:[#allocation11 + $0x7e4] ss:$24 sps:$4 sm:$0xff]   ;;  %v9169_v44 = vld [vmem:[#allocation11 + $0x6f8] ss:$24 sps:$4 sm:$0xff]  }
 0x420   : > { %6547 = vmatprep.subr.bf16.mxu0 %v9114_v49  ;;  %v9196_v49 = vld [vmem:[#allocation11 + $0x7e0] ss:$24 sps:$4 sm:$0xff]  }
 0x422   : > { %6661 = vmatpush1.bf16.msra.mxu1 %v9109_v50  ;;  %v9204_v50 = vld [vmem:[#allocation11 + $0x814] ss:$24 sps:$4 sm:$0xff]  }
 0x423   : > { %6662 = vmatprep.subr.bf16.mxu1 %v9117_v51  ;;  %6548 = vmatpush1.bf16.msra.mxu0 %v9112_v53  ;;  %v9175_v51 = vld [vmem:[#allocation11 + $0x728] ss:$24 sps:$4 sm:$0xff]   ;;  %v9183_v53 = vld [vmem:[#allocation11 + $0x75c] ss:$24 sps:$4 sm:$0xff]  }
 0x424   : > { %6549 = vmatprep.subr.bf16.mxu0 %v9120_v52  ;;  %v9210_v52 = vld [vmem:[#allocation11 + $0x844] ss:$24 sps:$4 sm:$0xff]  }
 0x426   : > { %6663 = vmatpush1.bf16.msra.mxu1 %v9115_v58  ;;  %v9181_v58 = vld [vmem:[#allocation11 + $0x758] ss:$24 sps:$4 sm:$0xff]  }
 0x427   : > { %6664 = vmatprep.subr.bf16.mxu1 %v9123_v25  ;;  %6550 = vmatpush1.bf16.msra.mxu0 %v9118_v59  ;;  %v9189_v25 = vld [vmem:[#allocation11 + $0x78c] ss:$24 sps:$4 sm:$0xff]   ;;  %v9208_v59 = vld [vmem:[#allocation11 + $0x840] ss:$24 sps:$4 sm:$0xff]  }
 0x428   : > { %6560 = vmatprep.subr.bf16.mxu0 %v9138_v61  ;;  %v9187_v61 = vld [vmem:[#allocation11 + $0x788] ss:$24 sps:$4 sm:$0xff]  }
 0x42a   : > { %6665 = vmatpush1.bf16.msra.mxu1 %v9121_v46  ;;  %6552 = vmatmul.mubr.bf16.vlgmr.msra.gmra.mrb[12].mxu0 %v10141_v0  ;;  %v9195_v46 = vld [vmem:[#allocation11 + $0x7bc] ss:$24 sps:$4 sm:$0xff]  }
 0x42b   : > { %6666 = vmatprep.subr.bf16.mxu1 %v9126_v62  ;;  %6561 = vmatpush1.bf16.msra.mxu0 %v9136_v63  ;;  %v9214_v62 = vld [vmem:[#allocation11 + $0x870] ss:$24 sps:$4 sm:$0xff]   ;;  %v9222_v63 = vld [vmem:[#allocation11 + $0x8a4] ss:$24 sps:$4 sm:$0xff]  }
 0x42c   : > { %6562 = vmatprep.subr.bf16.mxu0 %v9144_v1  ;;  %v9193_v1 = vld [vmem:[#allocation11 + $0x7b8] ss:$24 sps:$4 sm:$0xff]  }
 0x42e   : > { %6667 = vmatpush1.bf16.msra.mxu1 %v9124_v2  ;;  %v9201_v2 = vld [vmem:[#allocation11 + $0x7ec] ss:$24 sps:$4 sm:$0xff]  }
 0x42f   : > { %6668 = vmatprep.subr.bf16.mxu1 %v9129_v3  ;;  %6563 = vmatpush1.bf16.msra.mxu0 %v9142_v4  ;;  %v9220_v3 = vld [vmem:[#allocation11 + $0x8a0] ss:$24 sps:$4 sm:$0xff]   ;;  %v9228_v4 = vld [vmem:[#allocation11 + $0x8d4] ss:$24 sps:$4 sm:$0xff]  }
 0x430   : > { %6564 = vmatprep.subr.bf16.mxu0 %v9150_v5  ;;  %v9199_v5 = vld [vmem:[#allocation11 + $0x7e8] ss:$24 sps:$4 sm:$0xff]  }
 0x432   : > { %6669 = vmatpush1.bf16.msra.mxu1 %v9127_v6  ;;  %v9207_v6 = vld [vmem:[#allocation11 + $0x81c] ss:$24 sps:$4 sm:$0xff]  }
 0x433   : > { %6670 = vmatprep.subr.bf16.mxu1 %v9132_v7  ;;  %6565 = vmatpush1.bf16.msra.mxu0 %v9148_v9  ;;  %v9226_v7 = vld [vmem:[#allocation11 + $0x8d0] ss:$24 sps:$4 sm:$0xff]   ;;  %v9234_v9 = vld [vmem:[#allocation11 + $0x14] ss:$24 sps:$4 sm:$0xff]  }
 0x434   : > { %6566 = vmatprep.subr.bf16.mxu0 %v9156_v10  ;;  %v9205_v10 = vld [vmem:[#allocation11 + $0x818] ss:$24 sps:$4 sm:$0xff]  }
 0x436   : > { %6671 = vmatpush1.bf16.msra.mxu1 %v9130_v12  ;;  %v9213_v12 = vld [vmem:[#allocation11 + $0x84c] ss:$24 sps:$4 sm:$0xff]  }
 0x437   : > { %6672 = vmatprep.subr.bf16.mxu1 %v9135_v13  ;;  %6567 = vmatpush1.bf16.msra.mxu0 %v9154_v14  ;;  %v9211_v13 = vld [vmem:[#allocation11 + $0x848] ss:$24 sps:$4 sm:$0xff]   ;;  %v9219_v14 = vld [vmem:[#allocation11 + $0x87c] ss:$24 sps:$4 sm:$0xff]  }
 0x438   : > { %6568 = vmatprep.subr.bf16.mxu0 %v9162_v16  ;;  %v9217_v16 = vld [vmem:[#allocation11 + $0x878] ss:$24 sps:$4 sm:$0xff]  }
 0x43a   : > { %6673 = vmatpush1.bf16.msra.mxu1 %v9133_v19  ;;  %v9225_v19 = vld [vmem:[#allocation11 + $0x8ac] ss:$24 sps:$4 sm:$0xff]  }
 0x43b   : > { %6683 = vmatprep.subr.bf16.mxu1 %v9141_v20  ;;  %6569 = vmatpush1.bf16.msra.mxu0 %v9160_v21  ;;  %v9223_v20 = vld [vmem:[#allocation11 + $0x8a8] ss:$24 sps:$4 sm:$0xff]   ;;  %v9231_v21 = vld [vmem:[#allocation11 + $0x8dc] ss:$24 sps:$4 sm:$0xff]  }
 0x43c   : > { %6570 = vmatprep.subr.bf16.mxu0 %v9168_v57  ;;  %v9229_v57 = vld [vmem:[#allocation11 + $0x8d8] ss:$24 sps:$4 sm:$0xff]  }
 0x43d   : > { %6675 = vmatmul.mubr.bf16.vlgmr.msra.gmra.mrb[16].mxu1 %v10141_v0 }
 0x43e   : > { %6684 = vmatpush1.bf16.msra.mxu1 %v9139_v22  ;;  %v3151_v22 = vrot.slane %v10112_v56, %v10091_v31 }
 0x43f   : > { %6685 = vmatprep.subr.bf16.mxu1 %v9147_v23  ;;  %6571 = vmatpush1.bf16.msra.mxu0 %v9166_v24  ;;  %v3155_v23 = vrot.slane %v10112_v56, %v10094_v8  ;;  %v9232_v56 = vld [vmem:[#allocation11 + $0x10] ss:$24 sps:$4 sm:$0xff]  }
 0x440   : > { %6572 = vmatprep.subr.bf16.mxu0 %v9174_v18 }
 0x442   : > { %6686 = vmatpush1.bf16.msra.mxu1 %v9145_v55 }
 0x443   : > { %6687 = vmatprep.subr.bf16.mxu1 %v9153_v26  ;;  %6573 = vmatpush1.bf16.msra.mxu0 %v9172_v27 }
 0x444   : > { %6574 = vmatprep.subr.bf16.mxu0 %v9180_v47 }
 0x446   : > { %6688 = vmatpush1.bf16.msra.mxu1 %v9151_v28 }
 0x447   : > { %6689 = vmatprep.subr.bf16.mxu1 %v9159_v29  ;;  %6575 = vmatpush1.bf16.msra.mxu0 %v9178_v30 }
 0x448   : > { %6576 = vmatprep.subr.bf16.mxu0 %v9186_v34 }
 0x44a   : > { %6690 = vmatpush1.bf16.msra.mxu1 %v9157_v48 }
 0x44b   : > { %6691 = vmatprep.subr.bf16.mxu1 %v9165_v36  ;;  %6577 = vmatpush1.bf16.msra.mxu0 %v9184_v37 }
 0x44c   : > { %6578 = vmatprep.subr.bf16.mxu0 %v9192_v38 }
 0x44e   : > { %6692 = vmatpush1.bf16.msra.mxu1 %v9163_v40 }
 0x44f   : > { %6693 = vmatprep.subr.bf16.mxu1 %v9171_v35  ;;  %6579 = vmatpush1.bf16.msra.mxu0 %v9190_v42 }
 0x450   : > { %6580 = vmatprep.subr.bf16.mxu0 %v9198_v43 }
 0x452   : > { %6694 = vmatpush1.bf16.msra.mxu1 %v9169_v44  ;;  %v9237_v44 = vld [vmem:[#allocation11 + $0x44] ss:$24 sps:$4 sm:$0xff]  }
 0x453   : > { %6695 = vmatprep.subr.bf16.mxu1 %v9177_v45  ;;  %6581 = vmatpush1.bf16.msra.mxu0 %v9196_v49  ;;  %v9235_v45 = vld [vmem:[#allocation11 + $0x40] ss:$24 sps:$4 sm:$0xff]   ;;  %v9240_v49 = vld [vmem:[#allocation11 + $0x74] ss:$24 sps:$4 sm:$0xff]  }
 0x454   : > { %6582 = vmatprep.subr.bf16.mxu0 %v9204_v50  ;;  %v9238_v50 = vld [vmem:[#allocation11 + $0x70] ss:$24 sps:$4 sm:$0xff]  }
 0x456   : > { %6696 = vmatpush1.bf16.msra.mxu1 %v9175_v51  ;;  %v9243_v51 = vld [vmem:[#allocation11 + $0xa4] ss:$24 sps:$4 sm:$0xff]  }
 0x457   : > { %6697 = vmatprep.subr.bf16.mxu1 %v9183_v53  ;;  %6583 = vmatpush1.bf16.msra.mxu0 %v9202_v54  ;;  %v9241_v53 = vld [vmem:[#allocation11 + $0xa0] ss:$24 sps:$4 sm:$0xff]   ;;  %v9246_v54 = vld [vmem:[#allocation11 + $0xd4] ss:$24 sps:$4 sm:$0xff]  }
 0x458   : > { %6584 = vmatprep.subr.bf16.mxu0 %v9210_v52  ;;  %v9244_v52 = vld [vmem:[#allocation11 + $0xd0] ss:$24 sps:$4 sm:$0xff]  }
 0x45a   : > { %6698 = vmatpush1.bf16.msra.mxu1 %v9181_v58  ;;  %v9249_v58 = vld [vmem:[#allocation11 + $0x104] ss:$24 sps:$4 sm:$0xff]  }
 0x45b   : > { %6699 = vmatprep.subr.bf16.mxu1 %v9189_v25  ;;  %6585 = vmatpush1.bf16.msra.mxu0 %v9208_v59  ;;  %v9247_v25 = vld [vmem:[#allocation11 + $0x100] ss:$24 sps:$4 sm:$0xff]   ;;  %v9252_v59 = vld [vmem:[#allocation11 + $0x134] ss:$24 sps:$4 sm:$0xff]  }
 0x45c   : > { %6586 = vmatprep.subr.bf16.mxu0 %v9216_v60  ;;  %v9255_v60 = vld [vmem:[#allocation11 + $0x164] ss:$24 sps:$4 sm:$0xff]  }
 0x45e   : > { %6700 = vmatpush1.bf16.msra.mxu1 %v9187_v61  ;;  %v9253_v61 = vld [vmem:[#allocation11 + $0x160] ss:$24 sps:$4 sm:$0xff]  }
 0x45f   : > { %6701 = vmatprep.subr.bf16.mxu1 %v9195_v46  ;;  %6587 = vmatpush1.bf16.msra.mxu0 %v9214_v62  ;;  %v9258_v46 = vld [vmem:[#allocation11 + $0x194] ss:$24 sps:$4 sm:$0xff]   ;;  %v9256_v62 = vld [vmem:[#allocation11 + $0x190] ss:$24 sps:$4 sm:$0xff]  }
 0x460   : > { %6588 = vmatprep.subr.bf16.mxu0 %v9222_v63  ;;  %v9261_v63 = vld [vmem:[#allocation11 + $0x1c4] ss:$24 sps:$4 sm:$0xff]  }
 0x462   : > { %6702 = vmatpush1.bf16.msra.mxu1 %v9193_v1  ;;  %v9259_v1 = vld [vmem:[#allocation11 + $0x1c0] ss:$24 sps:$4 sm:$0xff]  }
 0x463   : > { %6703 = vmatprep.subr.bf16.mxu1 %v9201_v2  ;;  %6589 = vmatpush1.bf16.msra.mxu0 %v9220_v3  ;;  %v9264_v2 = vld [vmem:[#allocation11 + $0x1f4] ss:$24 sps:$4 sm:$0xff]   ;;  %v9262_v3 = vld [vmem:[#allocation11 + $0x1f0] ss:$24 sps:$4 sm:$0xff]  }
 0x464   : > { %6590 = vmatprep.subr.bf16.mxu0 %v9228_v4  ;;  %v9267_v4 = vld [vmem:[#allocation11 + $0x224] ss:$24 sps:$4 sm:$0xff]  }
 0x466   : > { %6704 = vmatpush1.bf16.msra.mxu1 %v9199_v5  ;;  %v9265_v5 = vld [vmem:[#allocation11 + $0x220] ss:$24 sps:$4 sm:$0xff]  }
 0x467   : > { %6705 = vmatprep.subr.bf16.mxu1 %v9207_v6  ;;  %6591 = vmatpush1.bf16.msra.mxu0 %v9226_v7  ;;  %v9270_v6 = vld [vmem:[#allocation11 + $0x254] ss:$24 sps:$4 sm:$0xff]   ;;  %v9268_v7 = vld [vmem:[#allocation11 + $0x250] ss:$24 sps:$4 sm:$0xff]  }
 0x468   : > { %6724 = vmatprep.subr.bf16.mxu0 %v9234_v9  ;;  %v9273_v9 = vld [vmem:[#allocation11 + $0x284] ss:$24 sps:$4 sm:$0xff]  }
 0x46a   : > { %6706 = vmatpush1.bf16.msra.mxu1 %v9205_v10  ;;  %v9271_v10 = vld [vmem:[#allocation11 + $0x280] ss:$24 sps:$4 sm:$0xff]  }
 0x46b   : > { %6707 = vmatprep.subr.bf16.mxu1 %v9213_v12  ;;  %v9276_v12 = vld [vmem:[#allocation11 + $0x2b4] ss:$24 sps:$4 sm:$0xff]  }
 0x46e   : > { %6708 = vmatpush1.bf16.msra.mxu1 %v9211_v13  ;;  %v9274_v13 = vld [vmem:[#allocation11 + $0x2b0] ss:$24 sps:$4 sm:$0xff]  }
 0x46f   : > { %6709 = vmatprep.subr.bf16.mxu1 %v9219_v14  ;;  %v9279_v14 = vld [vmem:[#allocation11 + $0x2e4] ss:$24 sps:$4 sm:$0xff]  }
 0x472   : > { %6710 = vmatpush1.bf16.msra.mxu1 %v9217_v16  ;;  %v9277_v16 = vld [vmem:[#allocation11 + $0x2e0] ss:$24 sps:$4 sm:$0xff]  }
 0x473   : > { %6711 = vmatprep.subr.bf16.mxu1 %v9225_v19  ;;  %v9282_v19 = vld [vmem:[#allocation11 + $0x314] ss:$24 sps:$4 sm:$0xff]  }
 0x476   : > { %6712 = vmatpush1.bf16.msra.mxu1 %v9223_v20  ;;  %v9280_v20 = vld [vmem:[#allocation11 + $0x310] ss:$24 sps:$4 sm:$0xff]  }
 0x477   : > { %6713 = vmatprep.subr.bf16.mxu1 %v9231_v21  ;;  %v9285_v21 = vld [vmem:[#allocation11 + $0x344] ss:$24 sps:$4 sm:$0xff]  }
 0x47a   : > { %6714 = vmatpush1.bf16.msra.mxu1 %v9229_v57  ;;  %v9283_v57 = vld [vmem:[#allocation11 + $0x340] ss:$24 sps:$4 sm:$0xff]  }
 0x490   : > { %v4964_v24 = vpop.f32.mrb[12].mxu1 }
 0x491   : > { %v7891_v18 = vadd.f32 %v4964_v24, %v3151_v22  ;;  %v4966_v55 = vpop.f32.mrb[13].mxu1  ;;  %v9288_v22 = vld [vmem:[#allocation11 + $0x374] ss:$24 sps:$4 sm:$0xff]   ;;  %v9291_v24 = vld [vmem:[#allocation11 + $0x3a4] ss:$24 sps:$4 sm:$0xff]  }
 0x492   : > { %v7892_v26 = vadd.f32 %v4966_v55, %v3155_v23  ;;  %v4968_v27 = vpop.f32.mrb[14].mxu1  ;;  %v9286_v23 = vld [vmem:[#allocation11 + $0x370] ss:$24 sps:$4 sm:$0xff]   ;;  %v9294_v55 = vld [vmem:[#allocation11 + $0x3d4] ss:$24 sps:$4 sm:$0xff]  }
 0x493   : > { %v4975_v47 = vmul.f32 0.851, %v7891_v18  ;;  %v4969_v28 = vpop.f32.mrb[15].mxu1  ;;  %v9297_v27 = vld [vmem:[#allocation11 + $0x404] ss:$24 sps:$4 sm:$0xff]  }
 0x494   : > { %v4976_v29 = vmul.f32 0.851, %v7892_v26  ;;  %v9303_v28 = vld [vmem:[#allocation11 + $0x464] ss:$24 sps:$4 sm:$0xff]  }
 0x495   : > { %9396 = vtanh.f32 %v4975_v47  ;;  %v9300_v47 = vld [vmem:[#allocation11 + $0x434] ss:$24 sps:$4 sm:$0xff]  }
 0x496   : > { %9398 = vtanh.f32 %v4976_v29  ;;  %v9301_v29 = vld [vmem:[#allocation11 + $0x460] ss:$24 sps:$4 sm:$0xff]  }
 0x49f   : > { %v9397_v30 = vpop.eup %9396 }
 0x4a0   : > { %v9399_v34 = vpop.eup %9398  ;;  %v4987_v48 = vadd.f32 1.0, %v9397_v30  ;;  %v9306_v30 = vld [vmem:[#allocation11 + $0x494] ss:$24 sps:$4 sm:$0xff]  }
 0x4a1   : > { %v4988_v36 = vadd.f32 1.0, %v9399_v34  ;;  %v9304_v34 = vld [vmem:[#allocation11 + $0x490] ss:$24 sps:$4 sm:$0xff]  }
 0x4a2   : > { %v4993_v37 = vmul.f32 0.5, %v4987_v48  ;;  %v9309_v48 = vld [vmem:[#allocation11 + $0x4c4] ss:$24 sps:$4 sm:$0xff]  }
 0x4a3   : > { %v4994_v38 = vmul.f32 0.5, %v4988_v36  ;;  %v9307_v36 = vld [vmem:[#allocation11 + $0x4c0] ss:$24 sps:$4 sm:$0xff]  }
 0x4a4   : > { %v4999_v40 = vmul.f32 %v7891_v18, %v4993_v37  ;;  %v9289_v18 = vld [vmem:[#allocation11 + $0x3a0] ss:$24 sps:$4 sm:$0xff]   ;;  %v9312_v37 = vld [vmem:[#allocation11 + $0x4f4] ss:$24 sps:$4 sm:$0xff]  }
 0x4a5   : > { %v5000_v35 = vmul.f32 %v7892_v26, %v4994_v38  ;;  %v9292_v26 = vld [vmem:[#allocation11 + $0x3d0] ss:$24 sps:$4 sm:$0xff]  }
 0x4a6   : > { %v10151_v43 = vpack.c.bf16 %v4999_v40, %v4999_v40  ;;  %v9310_v38 = vld [vmem:[#allocation11 + $0x4f0] ss:$24 sps:$4 sm:$0xff]   ;;  %v9315_v40 = vld [vmem:[#allocation11 + $0x524] ss:$24 sps:$4 sm:$0xff]  }
 0x4a7   : > { %v10149_v42 = vpack.c.bf16 %v5000_v35, %v5000_v35  ;;  %v9313_v35 = vld [vmem:[#allocation11 + $0x520] ss:$24 sps:$4 sm:$0xff]  }
 0x4a9   : > { %6592 = vmatprep.mubr.bf16.mxu0 %v10149_v42  ;;  %6715 = vmatprep.mubr.bf16.mxu1 %v10149_v42 }
 0x4aa   : > { %6593 = vmatmul.mubr.bf16.vlgmr.msra.gmra.mrb[12].mxu0 %v10151_v43  ;;  %6716 = vmatmul.mubr.bf16.vlgmr.msra.gmra.mrb[16].mxu1 %v10151_v43 }
 0x4ab   : > { %6725 = vmatpush1.bf16.msra.mxu0 %v9232_v56  ;;  %6756 = vmatprep.mubr.bf16.mxu0 %v10122_v15  ;;  %v9250_v15 = vld [vmem:[#allocation11 + $0x130] ss:$24 sps:$4 sm:$0xff]   ;;  %v9318_v56 = vld [vmem:[#allocation11 + $0x554] ss:$24 sps:$4 sm:$0xff]  }
 0x4ac   : > { %6726 = vmatprep.subr.bf16.mxu0 %v9237_v44  ;;  %v9316_v44 = vld [vmem:[#allocation11 + $0x550] ss:$24 sps:$4 sm:$0xff]  }
 0x4af   : > { %6727 = vmatpush1.bf16.msra.mxu0 %v9235_v45  ;;  %v9321_v45 = vld [vmem:[#allocation11 + $0x584] ss:$24 sps:$4 sm:$0xff]  }
 0x4b0   : > { %6728 = vmatprep.subr.bf16.mxu0 %v9240_v49  ;;  %v9319_v49 = vld [vmem:[#allocation11 + $0x580] ss:$24 sps:$4 sm:$0xff]  }
 0x4b3   : > { %6729 = vmatpush1.bf16.msra.mxu0 %v9238_v50  ;;  %v9324_v50 = vld [vmem:[#allocation11 + $0x5b4] ss:$24 sps:$4 sm:$0xff]  }
 0x4b4   : > { %6730 = vmatprep.subr.bf16.mxu0 %v9243_v51  ;;  %v9322_v51 = vld [vmem:[#allocation11 + $0x5b0] ss:$24 sps:$4 sm:$0xff]  }
 0x4b7   : > { %6731 = vmatpush1.bf16.msra.mxu0 %v9241_v53  ;;  %v9327_v53 = vld [vmem:[#allocation11 + $0x5e4] ss:$24 sps:$4 sm:$0xff]  }
 0x4b8   : > { %6732 = vmatprep.subr.bf16.mxu0 %v9246_v54  ;;  %v9325_v54 = vld [vmem:[#allocation11 + $0x5e0] ss:$24 sps:$4 sm:$0xff]  }
 0x4bb   : > { %6733 = vmatpush1.bf16.msra.mxu0 %v9244_v52  ;;  %v9330_v52 = vld [vmem:[#allocation11 + $0x614] ss:$24 sps:$4 sm:$0xff]  }
 0x4bc   : > { %6734 = vmatprep.subr.bf16.mxu0 %v9249_v58  ;;  %v9328_v58 = vld [vmem:[#allocation11 + $0x610] ss:$24 sps:$4 sm:$0xff]  }
 0x4bf   : > { %6735 = vmatpush1.bf16.msra.mxu0 %v9247_v25  ;;  %v9333_v25 = vld [vmem:[#allocation11 + $0x644] ss:$24 sps:$4 sm:$0xff]  }
 0x4c0   : > { %6736 = vmatprep.subr.bf16.mxu0 %v9252_v59  ;;  %v9331_v59 = vld [vmem:[#allocation11 + $0x640] ss:$24 sps:$4 sm:$0xff]  }
 0x4c3   : > { %6737 = vmatpush1.bf16.msra.mxu0 %v9250_v15  ;;  %v9336_v15 = vld [vmem:[#allocation11 + $0x674] ss:$24 sps:$4 sm:$0xff]  }
 0x4c4   : > { %6738 = vmatprep.subr.bf16.mxu0 %v9255_v60  ;;  %v9334_v60 = vld [vmem:[#allocation11 + $0x670] ss:$24 sps:$4 sm:$0xff]  }
 0x4c7   : > { %6739 = vmatpush1.bf16.msra.mxu0 %v9253_v61  ;;  %v9339_v61 = vld [vmem:[#allocation11 + $0x6a4] ss:$24 sps:$4 sm:$0xff]  }
 0x4c8   : > { %6740 = vmatprep.subr.bf16.mxu0 %v9258_v46  ;;  %v9337_v46 = vld [vmem:[#allocation11 + $0x6a0] ss:$24 sps:$4 sm:$0xff]  }
 0x4cb   : > { %6741 = vmatpush1.bf16.msra.mxu0 %v9256_v62  ;;  %v9342_v62 = vld [vmem:[#allocation11 + $0x6d4] ss:$24 sps:$4 sm:$0xff]  }
 0x4cc   : > { %6742 = vmatprep.subr.bf16.mxu0 %v9261_v63  ;;  %v9340_v63 = vld [vmem:[#allocation11 + $0x6d0] ss:$24 sps:$4 sm:$0xff]  }
 0x4cf   : > { %6743 = vmatpush1.bf16.msra.mxu0 %v9259_v1  ;;  %v9345_v1 = vld [vmem:[#allocation11 + $0x704] ss:$24 sps:$4 sm:$0xff]  }
 0x4d0   : > { %6744 = vmatprep.subr.bf16.mxu0 %v9264_v2  ;;  %v9348_v2 = vld [vmem:[#allocation11 + $0x734] ss:$24 sps:$4 sm:$0xff]  }
 0x4d3   : > { %6745 = vmatpush1.bf16.msra.mxu0 %v9262_v3  ;;  %v9351_v3 = vld [vmem:[#allocation11 + $0x764] ss:$24 sps:$4 sm:$0xff]  }
 0x4d4   : > { %6746 = vmatprep.subr.bf16.mxu0 %v9267_v4  ;;  %v9349_v4 = vld [vmem:[#allocation11 + $0x760] ss:$24 sps:$4 sm:$0xff]  }
 0x4d7   : > { %6747 = vmatpush1.bf16.msra.mxu0 %v9265_v5  ;;  %v9354_v5 = vld [vmem:[#allocation11 + $0x794] ss:$24 sps:$4 sm:$0xff]  }
 0x4d8   : > { %6748 = vmatprep.subr.bf16.mxu0 %v9270_v6  ;;  %v9352_v6 = vld [vmem:[#allocation11 + $0x790] ss:$24 sps:$4 sm:$0xff]  }
 0x4db   : > { %6749 = vmatpush1.bf16.msra.mxu0 %v9268_v7  ;;  %v9357_v7 = vld [vmem:[#allocation11 + $0x7c4] ss:$24 sps:$4 sm:$0xff]  }
 0x4dc   : > { %6750 = vmatprep.subr.bf16.mxu0 %v9273_v9  ;;  %v9355_v9 = vld [vmem:[#allocation11 + $0x7c0] ss:$24 sps:$4 sm:$0xff]  }
 0x4df   : > { %6751 = vmatpush1.bf16.msra.mxu0 %v9271_v10  ;;  %v9360_v10 = vld [vmem:[#allocation11 + $0x7f4] ss:$24 sps:$4 sm:$0xff]  }
 0x4e0   : > { %6752 = vmatprep.subr.bf16.mxu0 %v9276_v12  ;;  %v9358_v12 = vld [vmem:[#allocation11 + $0x7f0] ss:$24 sps:$4 sm:$0xff]  }
 0x4e3   : > { %6753 = vmatpush1.bf16.msra.mxu0 %v9274_v13  ;;  %v9363_v13 = vld [vmem:[#allocation11 + $0x824] ss:$24 sps:$4 sm:$0xff]  }
 0x4e4   : > { %6754 = vmatprep.subr.bf16.mxu0 %v9279_v14  ;;  %v9361_v14 = vld [vmem:[#allocation11 + $0x820] ss:$24 sps:$4 sm:$0xff]  }
 0x4e7   : > { %6755 = vmatpush1.bf16.msra.mxu0 %v9277_v16  ;;  %v9366_v16 = vld [vmem:[#allocation11 + $0x854] ss:$24 sps:$4 sm:$0xff]  }
 0x4e8   : > { %6765 = vmatprep.subr.bf16.mxu0 %v9282_v19  ;;  %v9364_v19 = vld [vmem:[#allocation11 + $0x850] ss:$24 sps:$4 sm:$0xff]  }
 0x4ea   : > { %6757 = vmatmul.mubr.bf16.vlgmr.msra.gmra.mrb[16].mxu0 %v10124_v41  ;;  %v9295_v41 = vld [vmem:[#allocation11 + $0x400] ss:$24 sps:$4 sm:$0xff]  }
 0x4eb   : > { %6766 = vmatpush1.bf16.msra.mxu0 %v9280_v20  ;;  %6797 = vmatprep.mubr.bf16.mxu0 %v10126_v11  ;;  %v9298_v11 = vld [vmem:[#allocation11 + $0x430] ss:$24 sps:$4 sm:$0xff]   ;;  %v9369_v20 = vld [vmem:[#allocation11 + $0x884] ss:$24 sps:$4 sm:$0xff]  }
 0x4ec   : > { %6767 = vmatprep.subr.bf16.mxu0 %v9285_v21  ;;  %v9367_v21 = vld [vmem:[#allocation11 + $0x880] ss:$24 sps:$4 sm:$0xff]  }
 0x4ef   : > { %6768 = vmatpush1.bf16.msra.mxu0 %v9283_v57  ;;  %v9372_v57 = vld [vmem:[#allocation11 + $0x8b4] ss:$24 sps:$4 sm:$0xff]  }
 0x4f0   : > { %6769 = vmatprep.subr.bf16.mxu0 %v9288_v22  ;;  %v9370_v22 = vld [vmem:[#allocation11 + $0x8b0] ss:$24 sps:$4 sm:$0xff]  }
 0x4f3   : > { %6770 = vmatpush1.bf16.msra.mxu0 %v9286_v23  ;;  %v9375_v23 = vld [vmem:[#allocation11 + $0x8e4] ss:$24 sps:$4 sm:$0xff]  }
 0x4f4   : > { %6771 = vmatprep.subr.bf16.mxu0 %v9291_v24  ;;  %v9373_v24 = vld [vmem:[#allocation11 + $0x8e0] ss:$24 sps:$4 sm:$0xff]  }
 0x4f7   : > { %6772 = vmatpush1.bf16.msra.mxu0 %v9289_v18  ;;  %v1242_v18 = vld [vmem:[#allocation13] sm:$0x3f] }
 0x4f8   : > { %6773 = vmatprep.subr.bf16.mxu0 %v9294_v55  ;;  %v5011_v55 = vrot.slane %v1242_v18, %v10053_v39 }
 0x4fb   : > { %6774 = vmatpush1.bf16.msra.mxu0 %v9292_v26  ;;  %v5019_v26 = vrot.slane %v1242_v18, %v10073_v32 }
 0x4fc   : > { %6775 = vmatprep.subr.bf16.mxu0 %v9297_v27  ;;  %v5015_v27 = vrot.slane %v1242_v18, %v10056_v17  ;;  %v5027_v17 = vrot.slane %v1242_v18, %v10091_v31 }
 0x4ff   : > { %6776 = vmatpush1.bf16.msra.mxu0 %v9295_v41  ;;  %v5023_v41 = vrot.slane %v1242_v18, %v10076_v33  ;;  %v5031_v33 = vrot.slane %v1242_v18, %v10094_v8 }
 0x500   : > { %6777 = vmatprep.subr.bf16.mxu0 %v9300_v47 }
 0x503   : > { %6778 = vmatpush1.bf16.msra.mxu0 %v9298_v11 }
 0x504   : > { %6779 = vmatprep.subr.bf16.mxu0 %v9303_v28 }
 0x507   : > { %6780 = vmatpush1.bf16.msra.mxu0 %v9301_v29 }
 0x508   : > { %6781 = vmatprep.subr.bf16.mxu0 %v9306_v30 }
 0x50b   : > { %6782 = vmatpush1.bf16.msra.mxu0 %v9304_v34 }
 0x50c   : > { %6783 = vmatprep.subr.bf16.mxu0 %v9309_v48 }
 0x50f   : > { %6784 = vmatpush1.bf16.msra.mxu0 %v9307_v36 }
 0x510   : > { %6785 = vmatprep.subr.bf16.mxu0 %v9312_v37 }
 0x513   : > { %6786 = vmatpush1.bf16.msra.mxu0 %v9310_v38 }
 0x514   : > { %6787 = vmatprep.subr.bf16.mxu0 %v9315_v40 }
 0x517   : > { %6788 = vmatpush1.bf16.msra.mxu0 %v9313_v35 }
 0x518   : > { %6789 = vmatprep.subr.bf16.mxu0 %v9318_v56 }
 0x51b   : > { %6790 = vmatpush1.bf16.msra.mxu0 %v9316_v44 }
 0x51c   : > { %6791 = vmatprep.subr.bf16.mxu0 %v9321_v45 }
 0x51f   : > { %6792 = vmatpush1.bf16.msra.mxu0 %v9319_v49 }
 0x520   : > { %6793 = vmatprep.subr.bf16.mxu0 %v9324_v50 }
 0x523   : > { %6794 = vmatpush1.bf16.msra.mxu0 %v9322_v51 }
 0x524   : > { %6795 = vmatprep.subr.bf16.mxu0 %v9327_v53 }
 0x527   : > { %6796 = vmatpush1.bf16.msra.mxu0 %v9325_v54 }
 0x528   : > { %6806 = vmatprep.subr.bf16.mxu0 %v9330_v52 }
 0x52a   : > { %6798 = vmatmul.mubr.bf16.vlgmr.msra.gmra.mrb[16].mxu0 %v10141_v0  ;;  %v9343_v0 = vld [vmem:[#allocation11 + $0x700] ss:$24 sps:$4 sm:$0xff]  }
 0x52b   : > { %6807 = vmatpush1.bf16.msra.mxu0 %v9328_v58  ;;  %6838 = vmatprep.mubr.bf16.mxu0 %v10149_v42  ;;  %v9346_v42 = vld [vmem:[#allocation11 + $0x730] ss:$24 sps:$4 sm:$0xff]  }
 0x52c   : > { %6808 = vmatprep.subr.bf16.mxu0 %v9333_v25 }
 0x52f   : > { %6809 = vmatpush1.bf16.msra.mxu0 %v9331_v59 }
 0x530   : > { %6810 = vmatprep.subr.bf16.mxu0 %v9336_v15 }
 0x533   : > { %6811 = vmatpush1.bf16.msra.mxu0 %v9334_v60 }
 0x534   : > { %6812 = vmatprep.subr.bf16.mxu0 %v9339_v61 }
 0x537   : > { %6813 = vmatpush1.bf16.msra.mxu0 %v9337_v46 }
 0x538   : > { %6814 = vmatprep.subr.bf16.mxu0 %v9342_v62 }
 0x53b   : > { %6815 = vmatpush1.bf16.msra.mxu0 %v9340_v63 }
 0x53c   : > { %6816 = vmatprep.subr.bf16.mxu0 %v9345_v1 }
 0x53f   : > { %6817 = vmatpush1.bf16.msra.mxu0 %v9343_v0 }
 0x540   : > { %6818 = vmatprep.subr.bf16.mxu0 %v9348_v2 }
 0x543   : > { %6819 = vmatpush1.bf16.msra.mxu0 %v9346_v42 }
 0x544   : > { %6820 = vmatprep.subr.bf16.mxu0 %v9351_v3 }
 0x547   : > { %6821 = vmatpush1.bf16.msra.mxu0 %v9349_v4 }
 0x548   : > { %6822 = vmatprep.subr.bf16.mxu0 %v9354_v5 }
 0x54b   : > { %6823 = vmatpush1.bf16.msra.mxu0 %v9352_v6 }
 0x54c   : > { %6824 = vmatprep.subr.bf16.mxu0 %v9357_v7 }
 0x54f   : > { %6825 = vmatpush1.bf16.msra.mxu0 %v9355_v9 }
 0x550   : > { %6826 = vmatprep.subr.bf16.mxu0 %v9360_v10 }
 0x553   : > { %6827 = vmatpush1.bf16.msra.mxu0 %v9358_v12 }
 0x554   : > { %6828 = vmatprep.subr.bf16.mxu0 %v9363_v13 }
 0x557   : > { %6829 = vmatpush1.bf16.msra.mxu0 %v9361_v14 }
 0x558   : > { %6830 = vmatprep.subr.bf16.mxu0 %v9366_v16 }
 0x55b   : > { %6831 = vmatpush1.bf16.msra.mxu0 %v9364_v19 }
 0x55c   : > { %6832 = vmatprep.subr.bf16.mxu0 %v9369_v20 }
 0x55f   : > { %6833 = vmatpush1.bf16.msra.mxu0 %v9367_v21 }
 0x560   : > { %6834 = vmatprep.subr.bf16.mxu0 %v9372_v57 }
 0x563   : > { %6835 = vmatpush1.bf16.msra.mxu0 %v9370_v22 }
 0x564   : > { %6836 = vmatprep.subr.bf16.mxu0 %v9375_v23 }
 0x567   : > { %6837 = vmatpush1.bf16.msra.mxu0 %v9373_v24 }
 0x56a   : > { %6839 = vmatmul.mubr.bf16.vlgmr.msra.gmra.mrb[16].mxu0 %v10151_v43 }
 0x57d   : > { %v6594_v47 = vpop.f32.mrb[12].mxu0  ;;  %v6717_v11 = vpop.f32.mrb[16].mxu1 }
 0x57e   : > { %v7893_v28 = vadd.f32 %v6594_v47, %v5011_v55  ;;  %v7895_v29 = vadd.f32 %v6717_v11, %v5019_v26  ;;  %v6596_v30 = vpop.f32.mrb[13].mxu0  ;;  %v6719_v34 = vpop.f32.mrb[17].mxu1 }
 0x57f   : > { %v7894_v48 = vadd.f32 %v6596_v30, %v5015_v27  ;;  %v7896_v36 = vadd.f32 %v6719_v34, %v5023_v41  ;;  %v6598_v43 = vpop.f32.mrb[14].mxu0  ;;  %v6721_v37 = vpop.f32.mrb[18].mxu1 }
 0x580   : > { %6847 = vst [vmem:[%s375_s8] sm:$0xff] %v7893_v28  ;;  %6849 = vst [vmem:[%s375_s8 + $0x10] sm:$0xff] %v7895_v29  ;;  %v6599_v39 = vpop.f32.mrb[15].mxu0  ;;  %v6722_v32 = vpop.f32.mrb[19].mxu1 }
 0x581   : > { %6848 = vst [vmem:[%s375_s8 + $0x8] sm:$0xff] %v7894_v48  ;;  %6850 = vst [vmem:[%s375_s8 + $0x18] sm:$0xff] %v7896_v36 }
 0x63d   : > { %v6840_v38 = vpop.f32.mrb[16].mxu0 }
 0x63e   : > { %v7897_v40 = vadd.f32 %v6840_v38, %v5027_v17  ;;  %v6842_v35 = vpop.f32.mrb[17].mxu0 }
 0x63f   : > { %v7898_v56 = vadd.f32 %v6842_v35, %v5031_v33  ;;  %v6844_v44 = vpop.f32.mrb[18].mxu0 }
 0x640   : > { %6851 = vst [vmem:[%s375_s8 + $0x20] sm:$0xff] %v7897_v40  ;;  %v6845_v31 = vpop.f32.mrb[19].mxu0 }
 0x641   : > { %6852 = vst [vmem:[%s375_s8 + $0x28] sm:$0xff] %v7898_v56 }
 0x642   : > { %9612 = shalt.err (!%p9609_p0)
}
 0x643   : > { %s9613_s1 = scalar_lea.hbm %s10175_s19, 768  ;;  %s9617_s22 = scalar_lea.hbm %s10226_s7, 1536 }
 0x644   : > { %p9614_p4 = scmp.ne.s32.totalorder %s10175_s19, %s9613_s1  ;;  %p9618_p8 = scmp.lt.u32.totalorder %s10175_s19, %s10226_s7 }
 0x645   : > { %p9619_p6 = scmp.lt.u32.totalorder %s9617_s22, %s9613_s1  ;;  %p9621_p5 = scmp.lt.u32.totalorder %s9613_s1, %s10175_s19 }
 0x646   : > { %p9615_p10 = pnand %p9614_p4, %p10247_p9 }
 0x647   : > { %p9620_p7 = por %p9619_p6, %p9618_p8 }
 0x648   : > { %p9616_p11 = pneg %p9615_p10 }
 0x649   : > { %p9622_p12 = por %p9621_p5, %p9620_p7 }
 0x64b   : > { %p9623_p13 = pnand %p9622_p12, %p9616_p11 }
 0x64d   : > { %9626 = shalt.err (!%p9623_p13)
}
 0x64e   : > { %7997 = dma.vmem_to_hbm [thread:$0]  (%p10247_p9), %s10177_s12, 768, %s10175_s19, %s6854_s30  }
 0x64f PF: > { %s6880_s21 = sand.u32 1, %s9665_s24   ;;  %p10248_p1 = scmp.ne.s32.totalorder %s10238_s28, 0 }
 0x650   : > { %p10249_p3 = scmp.ge.s32.totalorder %s9677_s27, 2  ;;  %s6881_s14 = scalar_lea.sflag [#allocation4], %s6880_s21 }
 0x652   : > { %p8023_p2 = pnand %p10249_p3, %p10248_p1 }
 0x654   : > { %9660 = dma.done.wait (!%p8023_p2), %s6881_s14, 768  }
 0x655   : > { %9662 = vsyncadd (!%p8023_p2), %s6881_s14, 4294966528  ;;  %p23_p0 = scmp.ge.s32.totalorder %s9914_s11, 4   ;;  %s10250_s24 = smov %s9669_s25 }
 0x656   : > { %s10251_s25 = smov %s9673_s26  ;;  %s10252_s26 = smov %s9925_s10 }
 0x657   : > { %s10253_s27 = smov %s9914_s11  ;;  %25 = sbr.rel (!%p23_p0) target bundleno = 10 (0xa), region = 117 }
 0x65e   :  { %6886 = vsyncpa [#allocation3], 1 }
 0x65f   :  { %6888 = vsyncpa [#allocation3 + $0x1], 1 }
 0x660   :  { %6889 = vsyncpa [#allocation6], 1 }
 0x661   :  { %6890 = vsyncpa [#allocation9], 1 }
 0x662   :  { %6891 = vsyncpa [#allocation12], 1 }
 0x663   :  { %6892 = vsyncpa [#allocation4], 1 }
 0x664   :  { %6894 = vsyncpa [#allocation4 + $0x1], 1 }

</bundles_post_ra>
